<compile_context>
chip_gen: v7x
topology: tpu7x:2x2x1
jax: 0.10.0
libtpu: 0.0.40
codegen_flags: <defaults>
</compile_context>

<pallas_src>
import functools

import jax
import jax.numpy as jnp
import numpy as np
from jax.experimental import pallas as pl
from jax.experimental.pallas import tpu as pltpu


# ----------------------------------------------------------------------------
# Pallas kernel: direct conv as K*K shifted-slice matmuls + fused bias/act
# ----------------------------------------------------------------------------
def _conv_kernel(*refs, act, taps, out_len):
    # x_ref: (Cin, band_len_padded)  bf16, padded-row band (flattened spatial)
    # w_ref: (K*K, Cout, Cin)        bf16, one (Cout, Cin) matrix per tap
    # b_ref: (Cout, 1)               f32
    # a_ref: (Cout, 1)               f32 (PReLU/LeakyReLU slope) - optional
    # o_ref: (Cout, out_len)         f32, spatial on the lane axis
    if act == "none":
        x_ref, w_ref, b_ref, o_ref = refs
        a_ref = None
    else:
        x_ref, w_ref, b_ref, a_ref, o_ref = refs

    cout = w_ref.shape[1]
    acc = jnp.zeros((cout, out_len), jnp.float32)
    # Statically unrolled tap loop: each tap is one MXU dot, accumulated f32.
    for i, off in enumerate(taps):
        x_slice = x_ref[:, pl.ds(off, out_len)]               # (Cin, L) bf16
        acc = acc + jnp.dot(w_ref[i], x_slice,
                            preferred_element_type=jnp.float32)
    acc = acc + b_ref[...]                                    # (Cout,1) bcast
    if act in ("prelu", "leaky"):
        acc = jnp.where(acc >= 0.0, acc, acc * a_ref[...])
    o_ref[...] = acc.astype(o_ref.dtype)


def _round_up(x, m):
    return ((x + m - 1) // m) * m


def _choose_row_tile(H, halo_rows, Wp, cin, cout, budget_bytes=4 * 1024 * 1024):
    """Largest divisor TH of H whose (double-buffered) blocks fit the budget."""
    for th in range(H, 0, -1):
        if H % th:
            continue
        in_bytes = (th + halo_rows) * Wp * cin * 2            # bf16 band tile
        out_bytes = th * Wp * cout * 4                        # f32 out tile
        if 2 * (in_bytes + out_bytes) <= budget_bytes:
            return th
    return 1


def pallas_conv2d(x, w, b, *, act="none", alpha=None):
    """'same' 2D conv (padding = K//2), NCHW in/out, fused bias + activation.

    x: (N, Cin, H, W) float32   w: (Cout, Cin, K, K)   b: (Cout,)
    act: "none" | "prelu" | "leaky" ; alpha: (Cout,) negative-side slopes
    returns: (N, Cout, H, W) float32
    """
    N, Cin, H, W = x.shape
    Cout, _, K, _ = w.shape
    p = K // 2
    Hp, Wp = H + 2 * p, W + 2 * p
    KK = K * K

    th = _choose_row_tile(H, 2 * p, Wp, Cin, Cout)
    T = H // th
    band_rows = th + 2 * p
    L = th * Wp                                   # flat output length per tile
    bs = band_rows * Wp                           # flat band length (w/ halo)
    bsr = _round_up(bs + K, 128)                  # lane pad + tap-shift overrun

    # --- glue: pad + row-band the activation (bf16, halo rows duplicated) ---
    xb = x.astype(jnp.bfloat16)
    if p:
        xb = jnp.pad(xb, ((0, 0), (0, 0), (p, p), (p, p)))
    if T == 1:
        bands = xb.reshape(N, 1, Cin, bs)
    else:
        bands = jnp.stack(
            [xb[:, :, t * th:t * th + band_rows, :] for t in range(T)], axis=1
        ).reshape(N, T, Cin, bs)
    bands = jnp.pad(bands, ((0, 0), (0, 0), (0, 0), (0, bsr - bs)))

    # weights -> (K*K, Cout, Cin); taps -> flat offsets inside the band
    wm = jnp.transpose(w, (2, 3, 0, 1)).reshape(KK, Cout, Cin).astype(jnp.bfloat16)
    b2 = b.reshape(Cout, 1).astype(jnp.float32)
    taps = tuple(dy * Wp + dx for dy in range(K) for dx in range(K))

    operands = [bands, wm, b2]
    in_specs = [
        pl.BlockSpec((None, None, Cin, bsr), lambda n, t: (n, t, 0, 0)),
        pl.BlockSpec((KK, Cout, Cin), lambda n, t: (0, 0, 0)),
        pl.BlockSpec((Cout, 1), lambda n, t: (0, 0)),
    ]
    if act != "none":
        operands.append(alpha.reshape(Cout, 1).astype(jnp.float32))
        in_specs.append(pl.BlockSpec((Cout, 1), lambda n, t: (0, 0)))

    flops = 2 * N * T * L * KK * Cin * Cout
    bytes_accessed = int(bands.size * 2 + wm.size * 2 + N * T * Cout * L * 4)

    out = pl.pallas_call(
        functools.partial(_conv_kernel, act=act, taps=taps, out_len=L),
        out_shape=jax.ShapeDtypeStruct((N, T, Cout, L), jnp.float32),
        grid=(N, T),
        in_specs=in_specs,
        out_specs=pl.BlockSpec((None, None, Cout, L), lambda n, t: (n, t, 0, 0)),
        compiler_params=pltpu.CompilerParams(
            dimension_semantics=("parallel", "parallel"),
            vmem_limit_bytes=32 * 1024 * 1024),
        cost_estimate=pl.CostEstimate(flops=flops, transcendentals=0,
                                      bytes_accessed=bytes_accessed),
    )(*operands)

    # (N, T, Cout, th*Wp) -> (N, Cout, H, W); drop the padded columns.
    out = out.reshape(N, T, Cout, th, Wp)
    out = jnp.transpose(out, (0, 2, 1, 3, 4)).reshape(N, Cout, H, Wp)
    return out[:, :, :, :W]


# ----------------------------------------------------------------------------
# Haar DWT / IWT and MeanShift (strided reshuffles -> plain JAX glue)
# ----------------------------------------------------------------------------
def dwt_haar(x):
    x01 = x[:, :, 0::2, :] / 2.0
    x02 = x[:, :, 1::2, :] / 2.0
    x1 = x01[:, :, :, 0::2]
    x2 = x02[:, :, :, 0::2]
    x3 = x01[:, :, :, 1::2]
    x4 = x02[:, :, :, 1::2]
    ll = x1 + x2 + x3 + x4
    hl = -x1 - x2 + x3 + x4
    lh = -x1 + x2 - x3 + x4
    hh = x1 - x2 - x3 + x4
    return jnp.concatenate([ll, hl, lh, hh], axis=1)


def iwt_haar(x):
    N, C4, h, w = x.shape
    C = C4 // 4
    x1 = x[:, 0 * C:1 * C] / 2.0
    x2 = x[:, 1 * C:2 * C] / 2.0
    x3 = x[:, 2 * C:3 * C] / 2.0
    x4 = x[:, 3 * C:4 * C] / 2.0
    a = x1 - x2 - x3 + x4   # out[0::2, 0::2]
    bb = x1 - x2 + x3 - x4  # out[1::2, 0::2]
    c = x1 + x2 - x3 - x4   # out[0::2, 1::2]
    d = x1 + x2 + x3 + x4   # out[1::2, 1::2]
    top = jnp.stack([a, c], axis=-1).reshape(N, C, h, 2 * w)   # even rows
    bot = jnp.stack([bb, d], axis=-1).reshape(N, C, h, 2 * w)  # odd rows
    return jnp.stack([top, bot], axis=-2).reshape(N, C, 2 * h, 2 * w)


_RGB_MEAN = jnp.array([0.4488, 0.4371, 0.4040], jnp.float32)


def mean_shift(x, rgb_range, sign):
    return x + sign * rgb_range * _RGB_MEAN.reshape(1, 3, 1, 1)


# ----------------------------------------------------------------------------
# ResClique block (n_stage = 2)
# ----------------------------------------------------------------------------
def res_clique(x, bp, g, res_scale):
    def conv(inp, name):
        return pallas_conv2d(inp, bp[name + "_w"], bp[name + "_b"],
                             act="prelu", alpha=bp[name + "_a"])

    ll0 = x[:, 0 * g:1 * g]
    lh0 = x[:, 1 * g:2 * g]
    hl0 = x[:, 2 * g:3 * g]
    hh0 = x[:, 3 * g:4 * g]

    ll1 = conv(ll0, "Fll1")
    lh1 = conv(jnp.concatenate([ll1, lh0], axis=1), "Flh1")
    hl1 = conv(jnp.concatenate([ll1, hl0], axis=1), "Fhl1")
    hh1 = conv(jnp.concatenate([ll1, lh1, hl1, hh0], axis=1), "Fhh1")

    hh2 = conv(hh1, "Fhh2")
    hl2 = conv(jnp.concatenate([hl1, hh2], axis=1), "Fhl2")
    lh2 = conv(jnp.concatenate([lh1, hh2], axis=1), "Flh2")
    ll2 = conv(jnp.concatenate([ll1, lh2, hl2, hh2], axis=1), "Fll2")

    return jnp.concatenate([ll2, lh2, hl2, hh2], axis=1) * res_scale + x


# ----------------------------------------------------------------------------
# CliqueNet forward
# ----------------------------------------------------------------------------
def cliquenet_forward(x, params, *, n_block, n_feats, res_scale, rgb_range):
    x = mean_shift(x, rgb_range, sign=-1.0)                      # sub_mean
    wvt = dwt_haar(x)                                            # (N, 4*colors, H/2, W/2)
    lrsb_1 = pallas_conv2d(wvt, params["preConv0_w"], params["preConv0_b"],
                           act="none")
    lrsb = pallas_conv2d(lrsb_1, params["preConv1_w"], params["preConv1_b"],
                         act="none")
    mid_feats = []
    for i in range(n_block):
        lrsb = res_clique(lrsb, params["blocks"][i], n_feats, res_scale)
        mid_feats.append(lrsb)
    cat = jnp.concatenate(mid_feats, axis=1)
    fused = pallas_conv2d(cat, params["fusion_w"], params["fusion_b"],
                          act="leaky",
                          alpha=jnp.full((n_feats,), 0.01, jnp.float32))
    srsb = fused + lrsb_1
    srsb = pallas_conv2d(srsb, params["tail_w"], params["tail_b"], act="none")
    out = iwt_haar(srsb)
    out = mean_shift(out, rgb_range, sign=+1.0)                  # add_mean
    return out


# ----------------------------------------------------------------------------
# Deterministic parameter init
# ----------------------------------------------------------------------------
def _conv_init(key, cout, cin, k):
    kw, kb = jax.random.split(key)
    fan_in = cin * k * k
    w = jax.random.normal(kw, (cout, cin, k, k), jnp.float32) / np.sqrt(fan_in)
    b = jax.random.normal(kb, (cout,), jnp.float32) * 0.01
    return w, b


def init_params(key, *, n_feats, n_colors, n_block):
    g = n_feats
    params = {}
    keys = jax.random.split(key, 4 + n_block)
    params["preConv0_w"], params["preConv0_b"] = _conv_init(keys[0], g, n_colors * 4, 3)
    params["preConv1_w"], params["preConv1_b"] = _conv_init(keys[1], 4 * g, g, 3)
    params["fusion_w"], params["fusion_b"] = _conv_init(keys[2], g, 4 * g * n_block, 1)
    params["tail_w"], params["tail_b"] = _conv_init(keys[3], n_colors * 4, g, 3)

    cins = {"Fll1": g, "Flh1": 2 * g, "Fhl1": 2 * g, "Fhh1": 4 * g,
            "Fll2": 4 * g, "Flh2": 2 * g, "Fhl2": 2 * g, "Fhh2": g}
    blocks = []
    for bi in range(n_block):
        bkeys = jax.random.split(keys[4 + bi], len(cins))
        bp = {}
        for (name, cin), bk in zip(cins.items(), bkeys):
            w, b = _conv_init(bk, g, cin, 3)
            bp[name + "_w"] = w
            bp[name + "_b"] = b
            bp[name + "_a"] = jnp.full((g,), 0.25, jnp.float32)  # PReLU default
        blocks.append(bp)
    params["blocks"] = blocks
    return params


# ----------------------------------------------------------------------------
if __name__ == "__main__":
    # Small config consistent with the module:
    #   nBlocks=2, n_feats_p=4, n_colors=3, scale=[2], res_scale_p=1.0,
    #   n_stage=2, rgb_range=1.0
    n_block, n_feats, n_colors = 2, 4, 3
    res_scale, rgb_range = 1.0, 1.0

    key = jax.random.PRNGKey(0)
    k_in, k_par = jax.random.split(key)
    x = jax.random.uniform(k_in, (2, n_colors, 16, 16), jnp.float32)  # NCHW
    params = init_params(k_par, n_feats=n_feats, n_colors=n_colors, n_block=n_block)

    fwd = jax.jit(functools.partial(cliquenet_forward,
                                    n_block=n_block, n_feats=n_feats,
                                    res_scale=res_scale, rgb_range=rgb_range))
    out = fwd(x, params)
    out = jax.block_until_ready(out)

    assert out.shape == x.shape, out.shape
    assert bool(jnp.all(jnp.isfinite(out)))
    print("KERNEL_OK")
</pallas_src>

<mosaic_0001>
module attributes {stable_mosaic.version = 11 : i64} {
  func.func @_conv_kernel(%arg0: i32, %arg1: i32, %arg2: memref<1x1x12x128xbf16, #tpu.memory_space<vmem>>, %arg3: memref<9x4x12xbf16, #tpu.memory_space<vmem>>, %arg4: memref<4x1xf32, #tpu.memory_space<vmem>>, %arg5: memref<1x1x4x80xf32, #tpu.memory_space<vmem>>) attributes {dimension_semantics = [#tpu.dimension_semantics<parallel>, #tpu.dimension_semantics<parallel>], iteration_bounds = array<i64: 2, 1>, scalar_prefetch = 0 : i64, scratch_operands = 0 : i64, tpu.core_type = #tpu.core_type<tc>, window_params = [{transform_indices = @transform_0, window_bounds = array<i64: 1, 1, 12, 128>}, {pipeline_mode = #tpu.pipeline_mode<synchronous>, transform_indices = @transform_1, window_bounds = array<i64: 9, 4, 12>}, {pipeline_mode = #tpu.pipeline_mode<synchronous>, transform_indices = @transform_2, window_bounds = array<i64: 4, 1>}, {transform_indices = @transform_3, window_bounds = array<i64: 1, 1, 4, 80>}]} {
    %cst = arith.constant 0.000000e+00 : f32
    %0 = vector.broadcast %cst : f32 to vector<4x80xf32>
    %c0 = arith.constant 0 : index
    %c0_0 = arith.constant 0 : index
    %c0_1 = arith.constant 0 : index
    %c0_2 = arith.constant 0 : index
    %1 = vector.load %arg2[%c0, %c0_0, %c0_1, %c0_2] : memref<1x1x12x128xbf16, #tpu.memory_space<vmem>>, vector<1x1x12x80xbf16>
    %2 = vector.shape_cast %1 : vector<1x1x12x80xbf16> to vector<12x80xbf16>
    %c0_3 = arith.constant 0 : index
    %c0_4 = arith.constant 0 : index
    %c0_5 = arith.constant 0 : index
    %3 = vector.load %arg3[%c0_3, %c0_4, %c0_5] : memref<9x4x12xbf16, #tpu.memory_space<vmem>>, vector<1x4x12xbf16>
    %4 = vector.shape_cast %3 : vector<1x4x12xbf16> to vector<4x12xbf16>
    %cst_6 = arith.constant dense<0.000000e+00> : vector<4x80xf32>
    %5 = tpu.matmul %4, %2, %cst_6 {dimension_numbers = #tpu.dot_dimension_numbers<[1], [0], [0], [1], [0, 0, 1, 1], [], []>} : vector<4x12xbf16>, vector<12x80xbf16>, vector<4x80xf32> -> vector<4x80xf32>
    %6 = arith.addf %0, %5 : vector<4x80xf32>
    %c0_7 = arith.constant 0 : index
    %c0_8 = arith.constant 0 : index
    %c0_9 = arith.constant 0 : index
    %c1 = arith.constant 1 : index
    %7 = vector.load %arg2[%c0_7, %c0_8, %c0_9, %c1] : memref<1x1x12x128xbf16, #tpu.memory_space<vmem>>, vector<1x1x12x80xbf16>
    %8 = vector.shape_cast %7 : vector<1x1x12x80xbf16> to vector<12x80xbf16>
    %c1_10 = arith.constant 1 : index
    %c0_11 = arith.constant 0 : index
    %c0_12 = arith.constant 0 : index
    %9 = vector.load %arg3[%c1_10, %c0_11, %c0_12] : memref<9x4x12xbf16, #tpu.memory_space<vmem>>, vector<1x4x12xbf16>
    %10 = vector.shape_cast %9 : vector<1x4x12xbf16> to vector<4x12xbf16>
    %cst_13 = arith.constant dense<0.000000e+00> : vector<4x80xf32>
    %11 = tpu.matmul %10, %8, %cst_13 {dimension_numbers = #tpu.dot_dimension_numbers<[1], [0], [0], [1], [0, 0, 1, 1], [], []>} : vector<4x12xbf16>, vector<12x80xbf16>, vector<4x80xf32> -> vector<4x80xf32>
    %12 = arith.addf %6, %11 : vector<4x80xf32>
    %c0_14 = arith.constant 0 : index
    %c0_15 = arith.constant 0 : index
    %c0_16 = arith.constant 0 : index
    %c2 = arith.constant 2 : index
    %13 = vector.load %arg2[%c0_14, %c0_15, %c0_16, %c2] : memref<1x1x12x128xbf16, #tpu.memory_space<vmem>>, vector<1x1x12x80xbf16>
    %14 = vector.shape_cast %13 : vector<1x1x12x80xbf16> to vector<12x80xbf16>
    %c2_17 = arith.constant 2 : index
    %c0_18 = arith.constant 0 : index
    %c0_19 = arith.constant 0 : index
    %15 = vector.load %arg3[%c2_17, %c0_18, %c0_19] : memref<9x4x12xbf16, #tpu.memory_space<vmem>>, vector<1x4x12xbf16>
    %16 = vector.shape_cast %15 : vector<1x4x12xbf16> to vector<4x12xbf16>
    %cst_20 = arith.constant dense<0.000000e+00> : vector<4x80xf32>
    %17 = tpu.matmul %16, %14, %cst_20 {dimension_numbers = #tpu.dot_dimension_numbers<[1], [0], [0], [1], [0, 0, 1, 1], [], []>} : vector<4x12xbf16>, vector<12x80xbf16>, vector<4x80xf32> -> vector<4x80xf32>
    %18 = arith.addf %12, %17 : vector<4x80xf32>
    %c0_21 = arith.constant 0 : index
    %c0_22 = arith.constant 0 : index
    %c0_23 = arith.constant 0 : index
    %c10 = arith.constant 10 : index
    %19 = vector.load %arg2[%c0_21, %c0_22, %c0_23, %c10] : memref<1x1x12x128xbf16, #tpu.memory_space<vmem>>, vector<1x1x12x80xbf16>
    %20 = vector.shape_cast %19 : vector<1x1x12x80xbf16> to vector<12x80xbf16>
    %c3 = arith.constant 3 : index
    %c0_24 = arith.constant 0 : index
    %c0_25 = arith.constant 0 : index
    %21 = vector.load %arg3[%c3, %c0_24, %c0_25] : memref<9x4x12xbf16, #tpu.memory_space<vmem>>, vector<1x4x12xbf16>
    %22 = vector.shape_cast %21 : vector<1x4x12xbf16> to vector<4x12xbf16>
    %cst_26 = arith.constant dense<0.000000e+00> : vector<4x80xf32>
    %23 = tpu.matmul %22, %20, %cst_26 {dimension_numbers = #tpu.dot_dimension_numbers<[1], [0], [0], [1], [0, 0, 1, 1], [], []>} : vector<4x12xbf16>, vector<12x80xbf16>, vector<4x80xf32> -> vector<4x80xf32>
    %24 = arith.addf %18, %23 : vector<4x80xf32>
    %c0_27 = arith.constant 0 : index
    %c0_28 = arith.constant 0 : index
    %c0_29 = arith.constant 0 : index
    %c11 = arith.constant 11 : index
    %25 = vector.load %arg2[%c0_27, %c0_28, %c0_29, %c11] : memref<1x1x12x128xbf16, #tpu.memory_space<vmem>>, vector<1x1x12x80xbf16>
    %26 = vector.shape_cast %25 : vector<1x1x12x80xbf16> to vector<12x80xbf16>
    %c4 = arith.constant 4 : index
    %c0_30 = arith.constant 0 : index
    %c0_31 = arith.constant 0 : index
    %27 = vector.load %arg3[%c4, %c0_30, %c0_31] : memref<9x4x12xbf16, #tpu.memory_space<vmem>>, vector<1x4x12xbf16>
    %28 = vector.shape_cast %27 : vector<1x4x12xbf16> to vector<4x12xbf16>
    %cst_32 = arith.constant dense<0.000000e+00> : vector<4x80xf32>
    %29 = tpu.matmul %28, %26, %cst_32 {dimension_numbers = #tpu.dot_dimension_numbers<[1], [0], [0], [1], [0, 0, 1, 1], [], []>} : vector<4x12xbf16>, vector<12x80xbf16>, vector<4x80xf32> -> vector<4x80xf32>
    %30 = arith.addf %24, %29 : vector<4x80xf32>
    %c0_33 = arith.constant 0 : index
    %c0_34 = arith.constant 0 : index
    %c0_35 = arith.constant 0 : index
    %c12 = arith.constant 12 : index
    %31 = vector.load %arg2[%c0_33, %c0_34, %c0_35, %c12] : memref<1x1x12x128xbf16, #tpu.memory_space<vmem>>, vector<1x1x12x80xbf16>
    %32 = vector.shape_cast %31 : vector<1x1x12x80xbf16> to vector<12x80xbf16>
    %c5 = arith.constant 5 : index
    %c0_36 = arith.constant 0 : index
    %c0_37 = arith.constant 0 : index
    %33 = vector.load %arg3[%c5, %c0_36, %c0_37] : memref<9x4x12xbf16, #tpu.memory_space<vmem>>, vector<1x4x12xbf16>
    %34 = vector.shape_cast %33 : vector<1x4x12xbf16> to vector<4x12xbf16>
    %cst_38 = arith.constant dense<0.000000e+00> : vector<4x80xf32>
    %35 = tpu.matmul %34, %32, %cst_38 {dimension_numbers = #tpu.dot_dimension_numbers<[1], [0], [0], [1], [0, 0, 1, 1], [], []>} : vector<4x12xbf16>, vector<12x80xbf16>, vector<4x80xf32> -> vector<4x80xf32>
    %36 = arith.addf %30, %35 : vector<4x80xf32>
    %c0_39 = arith.constant 0 : index
    %c0_40 = arith.constant 0 : index
    %c0_41 = arith.constant 0 : index
    %c20 = arith.constant 20 : index
    %37 = vector.load %arg2[%c0_39, %c0_40, %c0_41, %c20] : memref<1x1x12x128xbf16, #tpu.memory_space<vmem>>, vector<1x1x12x80xbf16>
    %38 = vector.shape_cast %37 : vector<1x1x12x80xbf16> to vector<12x80xbf16>
    %c6 = arith.constant 6 : index
    %c0_42 = arith.constant 0 : index
    %c0_43 = arith.constant 0 : index
    %39 = vector.load %arg3[%c6, %c0_42, %c0_43] : memref<9x4x12xbf16, #tpu.memory_space<vmem>>, vector<1x4x12xbf16>
    %40 = vector.shape_cast %39 : vector<1x4x12xbf16> to vector<4x12xbf16>
    %cst_44 = arith.constant dense<0.000000e+00> : vector<4x80xf32>
    %41 = tpu.matmul %40, %38, %cst_44 {dimension_numbers = #tpu.dot_dimension_numbers<[1], [0], [0], [1], [0, 0, 1, 1], [], []>} : vector<4x12xbf16>, vector<12x80xbf16>, vector<4x80xf32> -> vector<4x80xf32>
    %42 = arith.addf %36, %41 : vector<4x80xf32>
    %c0_45 = arith.constant 0 : index
    %c0_46 = arith.constant 0 : index
    %c0_47 = arith.constant 0 : index
    %c21 = arith.constant 21 : index
    %43 = vector.load %arg2[%c0_45, %c0_46, %c0_47, %c21] : memref<1x1x12x128xbf16, #tpu.memory_space<vmem>>, vector<1x1x12x80xbf16>
    %44 = vector.shape_cast %43 : vector<1x1x12x80xbf16> to vector<12x80xbf16>
    %c7 = arith.constant 7 : index
    %c0_48 = arith.constant 0 : index
    %c0_49 = arith.constant 0 : index
    %45 = vector.load %arg3[%c7, %c0_48, %c0_49] : memref<9x4x12xbf16, #tpu.memory_space<vmem>>, vector<1x4x12xbf16>
    %46 = vector.shape_cast %45 : vector<1x4x12xbf16> to vector<4x12xbf16>
    %cst_50 = arith.constant dense<0.000000e+00> : vector<4x80xf32>
    %47 = tpu.matmul %46, %44, %cst_50 {dimension_numbers = #tpu.dot_dimension_numbers<[1], [0], [0], [1], [0, 0, 1, 1], [], []>} : vector<4x12xbf16>, vector<12x80xbf16>, vector<4x80xf32> -> vector<4x80xf32>
    %48 = arith.addf %42, %47 : vector<4x80xf32>
    %c0_51 = arith.constant 0 : index
    %c0_52 = arith.constant 0 : index
    %c0_53 = arith.constant 0 : index
    %c22 = arith.constant 22 : index
    %49 = vector.load %arg2[%c0_51, %c0_52, %c0_53, %c22] : memref<1x1x12x128xbf16, #tpu.memory_space<vmem>>, vector<1x1x12x80xbf16>
    %50 = vector.shape_cast %49 : vector<1x1x12x80xbf16> to vector<12x80xbf16>
    %c8 = arith.constant 8 : index
    %c0_54 = arith.constant 0 : index
    %c0_55 = arith.constant 0 : index
    %51 = vector.load %arg3[%c8, %c0_54, %c0_55] : memref<9x4x12xbf16, #tpu.memory_space<vmem>>, vector<1x4x12xbf16>
    %52 = vector.shape_cast %51 : vector<1x4x12xbf16> to vector<4x12xbf16>
    %cst_56 = arith.constant dense<0.000000e+00> : vector<4x80xf32>
    %53 = tpu.matmul %52, %50, %cst_56 {dimension_numbers = #tpu.dot_dimension_numbers<[1], [0], [0], [1], [0, 0, 1, 1], [], []>} : vector<4x12xbf16>, vector<12x80xbf16>, vector<4x80xf32> -> vector<4x80xf32>
    %54 = arith.addf %48, %53 : vector<4x80xf32>
    %c0_57 = arith.constant 0 : index
    %c0_58 = arith.constant 0 : index
    %55 = vector.load %arg4[%c0_57, %c0_58] : memref<4x1xf32, #tpu.memory_space<vmem>>, vector<4x1xf32>
    %56 = vector.broadcast %55 : vector<4x1xf32> to vector<4x80xf32>
    %57 = arith.addf %54, %56 : vector<4x80xf32>
    %c0_59 = arith.constant 0 : index
    %c0_60 = arith.constant 0 : index
    %c0_61 = arith.constant 0 : index
    %c0_62 = arith.constant 0 : index
    %58 = vector.load %arg5[%c0_59, %c0_60, %c0_61, %c0_62] : memref<1x1x4x80xf32, #tpu.memory_space<vmem>>, vector<1x1x4x80xf32>
    %59 = vector.shape_cast %58 : vector<1x1x4x80xf32> to vector<4x80xf32>
    %60 = vector.shape_cast %57 : vector<4x80xf32> to vector<1x1x4x80xf32>
    tpu.vector_store %arg5[%c0_59, %c0_60, %c0_61, %c0_62], %60 {strides = array<i32>} : memref<1x1x4x80xf32, #tpu.memory_space<vmem>>, vector<1x1x4x80xf32>,
    return
  }
  func.func @transform_0(%arg0: i32, %arg1: i32) -> (i32, i32, i32, i32) {
    %c0_i32 = arith.constant 0 : i32
    %c0_i32_0 = arith.constant 0 : i32
    %c0_i32_1 = arith.constant 0 : i32
    return %arg0, %arg1, %c0_i32, %c0_i32_0 : i32, i32, i32, i32
  }
  func.func @transform_1(%arg0: i32, %arg1: i32) -> (i32, i32, i32) {
    %c0_i32 = arith.constant 0 : i32
    %c0_i32_0 = arith.constant 0 : i32
    %c0_i32_1 = arith.constant 0 : i32
    %c0_i32_2 = arith.constant 0 : i32
    return %c0_i32, %c0_i32_0, %c0_i32_1 : i32, i32, i32
  }
  func.func @transform_2(%arg0: i32, %arg1: i32) -> (i32, i32) {
    %c0_i32 = arith.constant 0 : i32
    %c0_i32_0 = arith.constant 0 : i32
    %c0_i32_1 = arith.constant 0 : i32
    return %c0_i32, %c0_i32_0 : i32, i32
  }
  func.func @transform_3(%arg0: i32, %arg1: i32) -> (i32, i32, i32, i32) {
    %c0_i32 = arith.constant 0 : i32
    %c0_i32_0 = arith.constant 0 : i32
    %c0_i32_1 = arith.constant 0 : i32
    return %arg0, %arg1, %c0_i32, %c0_i32_0 : i32, i32, i32, i32
  }
}

module attributes {stable_mosaic.version = 11 : i64} {
  func.func @_conv_kernel(%arg0: i32, %arg1: i32, %arg2: memref<1x1x4x128xbf16, #tpu.memory_space<vmem>>, %arg3: memref<9x16x4xbf16, #tpu.memory_space<vmem>>, %arg4: memref<16x1xf32, #tpu.memory_space<vmem>>, %arg5: memref<1x1x16x80xf32, #tpu.memory_space<vmem>>) attributes {dimension_semantics = [#tpu.dimension_semantics<parallel>, #tpu.dimension_semantics<parallel>], iteration_bounds = array<i64: 2, 1>, scalar_prefetch = 0 : i64, scratch_operands = 0 : i64, tpu.core_type = #tpu.core_type<tc>, window_params = [{transform_indices = @transform_0, window_bounds = array<i64: 1, 1, 4, 128>}, {pipeline_mode = #tpu.pipeline_mode<synchronous>, transform_indices = @transform_1, window_bounds = array<i64: 9, 16, 4>}, {pipeline_mode = #tpu.pipeline_mode<synchronous>, transform_indices = @transform_2, window_bounds = array<i64: 16, 1>}, {transform_indices = @transform_3, window_bounds = array<i64: 1, 1, 16, 80>}]} {
    %cst = arith.constant 0.000000e+00 : f32
    %0 = vector.broadcast %cst : f32 to vector<16x80xf32>
    %c0 = arith.constant 0 : index
    %c0_0 = arith.constant 0 : index
    %c0_1 = arith.constant 0 : index
    %c0_2 = arith.constant 0 : index
    %1 = vector.load %arg2[%c0, %c0_0, %c0_1, %c0_2] : memref<1x1x4x128xbf16, #tpu.memory_space<vmem>>, vector<1x1x4x80xbf16>
    %2 = vector.shape_cast %1 : vector<1x1x4x80xbf16> to vector<4x80xbf16>
    %c0_3 = arith.constant 0 : index
    %c0_4 = arith.constant 0 : index
    %c0_5 = arith.constant 0 : index
    %3 = vector.load %arg3[%c0_3, %c0_4, %c0_5] : memref<9x16x4xbf16, #tpu.memory_space<vmem>>, vector<1x16x4xbf16>
    %4 = vector.shape_cast %3 : vector<1x16x4xbf16> to vector<16x4xbf16>
    %cst_6 = arith.constant dense<0.000000e+00> : vector<16x80xf32>
    %5 = tpu.matmul %4, %2, %cst_6 {dimension_numbers = #tpu.dot_dimension_numbers<[1], [0], [0], [1], [0, 0, 1, 1], [], []>} : vector<16x4xbf16>, vector<4x80xbf16>, vector<16x80xf32> -> vector<16x80xf32>
    %6 = arith.addf %0, %5 : vector<16x80xf32>
    %c0_7 = arith.constant 0 : index
    %c0_8 = arith.constant 0 : index
    %c0_9 = arith.constant 0 : index
    %c1 = arith.constant 1 : index
    %7 = vector.load %arg2[%c0_7, %c0_8, %c0_9, %c1] : memref<1x1x4x128xbf16, #tpu.memory_space<vmem>>, vector<1x1x4x80xbf16>
    %8 = vector.shape_cast %7 : vector<1x1x4x80xbf16> to vector<4x80xbf16>
    %c1_10 = arith.constant 1 : index
    %c0_11 = arith.constant 0 : index
    %c0_12 = arith.constant 0 : index
    %9 = vector.load %arg3[%c1_10, %c0_11, %c0_12] : memref<9x16x4xbf16, #tpu.memory_space<vmem>>, vector<1x16x4xbf16>
    %10 = vector.shape_cast %9 : vector<1x16x4xbf16> to vector<16x4xbf16>
    %cst_13 = arith.constant dense<0.000000e+00> : vector<16x80xf32>
    %11 = tpu.matmul %10, %8, %cst_13 {dimension_numbers = #tpu.dot_dimension_numbers<[1], [0], [0], [1], [0, 0, 1, 1], [], []>} : vector<16x4xbf16>, vector<4x80xbf16>, vector<16x80xf32> -> vector<16x80xf32>
    %12 = arith.addf %6, %11 : vector<16x80xf32>
    %c0_14 = arith.constant 0 : index
    %c0_15 = arith.constant 0 : index
    %c0_16 = arith.constant 0 : index
    %c2 = arith.constant 2 : index
    %13 = vector.load %arg2[%c0_14, %c0_15, %c0_16, %c2] : memref<1x1x4x128xbf16, #tpu.memory_space<vmem>>, vector<1x1x4x80xbf16>
    %14 = vector.shape_cast %13 : vector<1x1x4x80xbf16> to vector<4x80xbf16>
    %c2_17 = arith.constant 2 : index
    %c0_18 = arith.constant 0 : index
    %c0_19 = arith.constant 0 : index
    %15 = vector.load %arg3[%c2_17, %c0_18, %c0_19] : memref<9x16x4xbf16, #tpu.memory_space<vmem>>, vector<1x16x4xbf16>
    %16 = vector.shape_cast %15 : vector<1x16x4xbf16> to vector<16x4xbf16>
    %cst_20 = arith.constant dense<0.000000e+00> : vector<16x80xf32>
    %17 = tpu.matmul %16, %14, %cst_20 {dimension_numbers = #tpu.dot_dimension_numbers<[1], [0], [0], [1], [0, 0, 1, 1], [], []>} : vector<16x4xbf16>, vector<4x80xbf16>, vector<16x80xf32> -> vector<16x80xf32>
    %18 = arith.addf %12, %17 : vector<16x80xf32>
    %c0_21 = arith.constant 0 : index
    %c0_22 = arith.constant 0 : index
    %c0_23 = arith.constant 0 : index
    %c10 = arith.constant 10 : index
    %19 = vector.load %arg2[%c0_21, %c0_22, %c0_23, %c10] : memref<1x1x4x128xbf16, #tpu.memory_space<vmem>>, vector<1x1x4x80xbf16>
    %20 = vector.shape_cast %19 : vector<1x1x4x80xbf16> to vector<4x80xbf16>
    %c3 = arith.constant 3 : index
    %c0_24 = arith.constant 0 : index
    %c0_25 = arith.constant 0 : index
    %21 = vector.load %arg3[%c3, %c0_24, %c0_25] : memref<9x16x4xbf16, #tpu.memory_space<vmem>>, vector<1x16x4xbf16>
    %22 = vector.shape_cast %21 : vector<1x16x4xbf16> to vector<16x4xbf16>
    %cst_26 = arith.constant dense<0.000000e+00> : vector<16x80xf32>
    %23 = tpu.matmul %22, %20, %cst_26 {dimension_numbers = #tpu.dot_dimension_numbers<[1], [0], [0], [1], [0, 0, 1, 1], [], []>} : vector<16x4xbf16>, vector<4x80xbf16>, vector<16x80xf32> -> vector<16x80xf32>
    %24 = arith.addf %18, %23 : vector<16x80xf32>
    %c0_27 = arith.constant 0 : index
    %c0_28 = arith.constant 0 : index
    %c0_29 = arith.constant 0 : index
    %c11 = arith.constant 11 : index
    %25 = vector.load %arg2[%c0_27, %c0_28, %c0_29, %c11] : memref<1x1x4x128xbf16, #tpu.memory_space<vmem>>, vector<1x1x4x80xbf16>
    %26 = vector.shape_cast %25 : vector<1x1x4x80xbf16> to vector<4x80xbf16>
    %c4 = arith.constant 4 : index
    %c0_30 = arith.constant 0 : index
    %c0_31 = arith.constant 0 : index
    %27 = vector.load %arg3[%c4, %c0_30, %c0_31] : memref<9x16x4xbf16, #tpu.memory_space<vmem>>, vector<1x16x4xbf16>
    %28 = vector.shape_cast %27 : vector<1x16x4xbf16> to vector<16x4xbf16>
    %cst_32 = arith.constant dense<0.000000e+00> : vector<16x80xf32>
    %29 = tpu.matmul %28, %26, %cst_32 {dimension_numbers = #tpu.dot_dimension_numbers<[1], [0], [0], [1], [0, 0, 1, 1], [], []>} : vector<16x4xbf16>, vector<4x80xbf16>, vector<16x80xf32> -> vector<16x80xf32>
    %30 = arith.addf %24, %29 : vector<16x80xf32>
    %c0_33 = arith.constant 0 : index
    %c0_34 = arith.constant 0 : index
    %c0_35 = arith.constant 0 : index
    %c12 = arith.constant 12 : index
    %31 = vector.load %arg2[%c0_33, %c0_34, %c0_35, %c12] : memref<1x1x4x128xbf16, #tpu.memory_space<vmem>>, vector<1x1x4x80xbf16>
    %32 = vector.shape_cast %31 : vector<1x1x4x80xbf16> to vector<4x80xbf16>
    %c5 = arith.constant 5 : index
    %c0_36 = arith.constant 0 : index
    %c0_37 = arith.constant 0 : index
    %33 = vector.load %arg3[%c5, %c0_36, %c0_37] : memref<9x16x4xbf16, #tpu.memory_space<vmem>>, vector<1x16x4xbf16>
    %34 = vector.shape_cast %33 : vector<1x16x4xbf16> to vector<16x4xbf16>
    %cst_38 = arith.constant dense<0.000000e+00> : vector<16x80xf32>
    %35 = tpu.matmul %34, %32, %cst_38 {dimension_numbers = #tpu.dot_dimension_numbers<[1], [0], [0], [1], [0, 0, 1, 1], [], []>} : vector<16x4xbf16>, vector<4x80xbf16>, vector<16x80xf32> -> vector<16x80xf32>
    %36 = arith.addf %30, %35 : vector<16x80xf32>
    %c0_39 = arith.constant 0 : index
    %c0_40 = arith.constant 0 : index
    %c0_41 = arith.constant 0 : index
    %c20 = arith.constant 20 : index
    %37 = vector.load %arg2[%c0_39, %c0_40, %c0_41, %c20] : memref<1x1x4x128xbf16, #tpu.memory_space<vmem>>, vector<1x1x4x80xbf16>
    %38 = vector.shape_cast %37 : vector<1x1x4x80xbf16> to vector<4x80xbf16>
    %c6 = arith.constant 6 : index
    %c0_42 = arith.constant 0 : index
    %c0_43 = arith.constant 0 : index
    %39 = vector.load %arg3[%c6, %c0_42, %c0_43] : memref<9x16x4xbf16, #tpu.memory_space<vmem>>, vector<1x16x4xbf16>
    %40 = vector.shape_cast %39 : vector<1x16x4xbf16> to vector<16x4xbf16>
    %cst_44 = arith.constant dense<0.000000e+00> : vector<16x80xf32>
    %41 = tpu.matmul %40, %38, %cst_44 {dimension_numbers = #tpu.dot_dimension_numbers<[1], [0], [0], [1], [0, 0, 1, 1], [], []>} : vector<16x4xbf16>, vector<4x80xbf16>, vector<16x80xf32> -> vector<16x80xf32>
    %42 = arith.addf %36, %41 : vector<16x80xf32>
    %c0_45 = arith.constant 0 : index
    %c0_46 = arith.constant 0 : index
    %c0_47 = arith.constant 0 : index
    %c21 = arith.constant 21 : index
    %43 = vector.load %arg2[%c0_45, %c0_46, %c0_47, %c21] : memref<1x1x4x128xbf16, #tpu.memory_space<vmem>>, vector<1x1x4x80xbf16>
    %44 = vector.shape_cast %43 : vector<1x1x4x80xbf16> to vector<4x80xbf16>
    %c7 = arith.constant 7 : index
    %c0_48 = arith.constant 0 : index
    %c0_49 = arith.constant 0 : index
    %45 = vector.load %arg3[%c7, %c0_48, %c0_49] : memref<9x16x4xbf16, #tpu.memory_space<vmem>>, vector<1x16x4xbf16>
    %46 = vector.shape_cast %45 : vector<1x16x4xbf16> to vector<16x4xbf16>
    %cst_50 = arith.constant dense<0.000000e+00> : vector<16x80xf32>
    %47 = tpu.matmul %46, %44, %cst_50 {dimension_numbers = #tpu.dot_dimension_numbers<[1], [0], [0], [1], [0, 0, 1, 1], [], []>} : vector<16x4xbf16>, vector<4x80xbf16>, vector<16x80xf32> -> vector<16x80xf32>
    %48 = arith.addf %42, %47 : vector<16x80xf32>
    %c0_51 = arith.constant 0 : index
    %c0_52 = arith.constant 0 : index
    %c0_53 = arith.constant 0 : index
    %c22 = arith.constant 22 : index
    %49 = vector.load %arg2[%c0_51, %c0_52, %c0_53, %c22] : memref<1x1x4x128xbf16, #tpu.memory_space<vmem>>, vector<1x1x4x80xbf16>
    %50 = vector.shape_cast %49 : vector<1x1x4x80xbf16> to vector<4x80xbf16>
    %c8 = arith.constant 8 : index
    %c0_54 = arith.constant 0 : index
    %c0_55 = arith.constant 0 : index
    %51 = vector.load %arg3[%c8, %c0_54, %c0_55] : memref<9x16x4xbf16, #tpu.memory_space<vmem>>, vector<1x16x4xbf16>
    %52 = vector.shape_cast %51 : vector<1x16x4xbf16> to vector<16x4xbf16>
    %cst_56 = arith.constant dense<0.000000e+00> : vector<16x80xf32>
    %53 = tpu.matmul %52, %50, %cst_56 {dimension_numbers = #tpu.dot_dimension_numbers<[1], [0], [0], [1], [0, 0, 1, 1], [], []>} : vector<16x4xbf16>, vector<4x80xbf16>, vector<16x80xf32> -> vector<16x80xf32>
    %54 = arith.addf %48, %53 : vector<16x80xf32>
    %c0_57 = arith.constant 0 : index
    %c0_58 = arith.constant 0 : index
    %55 = vector.load %arg4[%c0_57, %c0_58] : memref<16x1xf32, #tpu.memory_space<vmem>>, vector<16x1xf32>
    %56 = vector.broadcast %55 : vector<16x1xf32> to vector<16x80xf32>
    %57 = arith.addf %54, %56 : vector<16x80xf32>
    %c0_59 = arith.constant 0 : index
    %c0_60 = arith.constant 0 : index
    %c0_61 = arith.constant 0 : index
    %c0_62 = arith.constant 0 : index
    %58 = vector.load %arg5[%c0_59, %c0_60, %c0_61, %c0_62] : memref<1x1x16x80xf32, #tpu.memory_space<vmem>>, vector<1x1x16x80xf32>
    %59 = vector.shape_cast %58 : vector<1x1x16x80xf32> to vector<16x80xf32>
    %60 = vector.shape_cast %57 : vector<16x80xf32> to vector<1x1x16x80xf32>
    tpu.vector_store %arg5[%c0_59, %c0_60, %c0_61, %c0_62], %60 {strides = array<i32>} : memref<1x1x16x80xf32, #tpu.memory_space<vmem>>, vector<1x1x16x80xf32>,
    return
  }
  func.func @transform_0(%arg0: i32, %arg1: i32) -> (i32, i32, i32, i32) {
    %c0_i32 = arith.constant 0 : i32
    %c0_i32_0 = arith.constant 0 : i32
    %c0_i32_1 = arith.constant 0 : i32
    return %arg0, %arg1, %c0_i32, %c0_i32_0 : i32, i32, i32, i32
  }
  func.func @transform_1(%arg0: i32, %arg1: i32) -> (i32, i32, i32) {
    %c0_i32 = arith.constant 0 : i32
    %c0_i32_0 = arith.constant 0 : i32
    %c0_i32_1 = arith.constant 0 : i32
    %c0_i32_2 = arith.constant 0 : i32
    return %c0_i32, %c0_i32_0, %c0_i32_1 : i32, i32, i32
  }
  func.func @transform_2(%arg0: i32, %arg1: i32) -> (i32, i32) {
    %c0_i32 = arith.constant 0 : i32
    %c0_i32_0 = arith.constant 0 : i32
    %c0_i32_1 = arith.constant 0 : i32
    return %c0_i32, %c0_i32_0 : i32, i32
  }
  func.func @transform_3(%arg0: i32, %arg1: i32) -> (i32, i32, i32, i32) {
    %c0_i32 = arith.constant 0 : i32
    %c0_i32_0 = arith.constant 0 : i32
    %c0_i32_1 = arith.constant 0 : i32
    return %arg0, %arg1, %c0_i32, %c0_i32_0 : i32, i32, i32, i32
  }
}

module attributes {stable_mosaic.version = 11 : i64} {
  func.func @_conv_kernel(%arg0: i32, %arg1: i32, %arg2: memref<1x1x4x128xbf16, #tpu.memory_space<vmem>>, %arg3: memref<9x4x4xbf16, #tpu.memory_space<vmem>>, %arg4: memref<4x1xf32, #tpu.memory_space<vmem>>, %arg5: memref<4x1xf32, #tpu.memory_space<vmem>>, %arg6: memref<1x1x4x80xf32, #tpu.memory_space<vmem>>) attributes {dimension_semantics = [#tpu.dimension_semantics<parallel>, #tpu.dimension_semantics<parallel>], iteration_bounds = array<i64: 2, 1>, scalar_prefetch = 0 : i64, scratch_operands = 0 : i64, tpu.core_type = #tpu.core_type<tc>, window_params = [{transform_indices = @transform_0, window_bounds = array<i64: 1, 1, 4, 128>}, {pipeline_mode = #tpu.pipeline_mode<synchronous>, transform_indices = @transform_1, window_bounds = array<i64: 9, 4, 4>}, {pipeline_mode = #tpu.pipeline_mode<synchronous>, transform_indices = @transform_2, window_bounds = array<i64: 4, 1>}, {pipeline_mode = #tpu.pipeline_mode<synchronous>, transform_indices = @transform_3, window_bounds = array<i64: 4, 1>}, {transform_indices = @transform_4, window_bounds = array<i64: 1, 1, 4, 80>}]} {
    %cst = arith.constant 0.000000e+00 : f32
    %0 = vector.broadcast %cst : f32 to vector<4x80xf32>
    %c0 = arith.constant 0 : index
    %c0_0 = arith.constant 0 : index
    %c0_1 = arith.constant 0 : index
    %c0_2 = arith.constant 0 : index
    %1 = vector.load %arg2[%c0, %c0_0, %c0_1, %c0_2] : memref<1x1x4x128xbf16, #tpu.memory_space<vmem>>, vector<1x1x4x80xbf16>
    %2 = vector.shape_cast %1 : vector<1x1x4x80xbf16> to vector<4x80xbf16>
    %c0_3 = arith.constant 0 : index
    %c0_4 = arith.constant 0 : index
    %c0_5 = arith.constant 0 : index
    %3 = vector.load %arg3[%c0_3, %c0_4, %c0_5] : memref<9x4x4xbf16, #tpu.memory_space<vmem>>, vector<1x4x4xbf16>
    %4 = vector.shape_cast %3 : vector<1x4x4xbf16> to vector<4x4xbf16>
    %cst_6 = arith.constant dense<0.000000e+00> : vector<4x80xf32>
    %5 = tpu.matmul %4, %2, %cst_6 {dimension_numbers = #tpu.dot_dimension_numbers<[1], [0], [0], [1], [0, 0, 1, 1], [], []>} : vector<4x4xbf16>, vector<4x80xbf16>, vector<4x80xf32> -> vector<4x80xf32>
    %6 = arith.addf %0, %5 : vector<4x80xf32>
    %c0_7 = arith.constant 0 : index
    %c0_8 = arith.constant 0 : index
    %c0_9 = arith.constant 0 : index
    %c1 = arith.constant 1 : index
    %7 = vector.load %arg2[%c0_7, %c0_8, %c0_9, %c1] : memref<1x1x4x128xbf16, #tpu.memory_space<vmem>>, vector<1x1x4x80xbf16>
    %8 = vector.shape_cast %7 : vector<1x1x4x80xbf16> to vector<4x80xbf16>
    %c1_10 = arith.constant 1 : index
    %c0_11 = arith.constant 0 : index
    %c0_12 = arith.constant 0 : index
    %9 = vector.load %arg3[%c1_10, %c0_11, %c0_12] : memref<9x4x4xbf16, #tpu.memory_space<vmem>>, vector<1x4x4xbf16>
    %10 = vector.shape_cast %9 : vector<1x4x4xbf16> to vector<4x4xbf16>
    %cst_13 = arith.constant dense<0.000000e+00> : vector<4x80xf32>
    %11 = tpu.matmul %10, %8, %cst_13 {dimension_numbers = #tpu.dot_dimension_numbers<[1], [0], [0], [1], [0, 0, 1, 1], [], []>} : vector<4x4xbf16>, vector<4x80xbf16>, vector<4x80xf32> -> vector<4x80xf32>
    %12 = arith.addf %6, %11 : vector<4x80xf32>
    %c0_14 = arith.constant 0 : index
    %c0_15 = arith.constant 0 : index
    %c0_16 = arith.constant 0 : index
    %c2 = arith.constant 2 : index
    %13 = vector.load %arg2[%c0_14, %c0_15, %c0_16, %c2] : memref<1x1x4x128xbf16, #tpu.memory_space<vmem>>, vector<1x1x4x80xbf16>
    %14 = vector.shape_cast %13 : vector<1x1x4x80xbf16> to vector<4x80xbf16>
    %c2_17 = arith.constant 2 : index
    %c0_18 = arith.constant 0 : index
    %c0_19 = arith.constant 0 : index
    %15 = vector.load %arg3[%c2_17, %c0_18, %c0_19] : memref<9x4x4xbf16, #tpu.memory_space<vmem>>, vector<1x4x4xbf16>
    %16 = vector.shape_cast %15 : vector<1x4x4xbf16> to vector<4x4xbf16>
    %cst_20 = arith.constant dense<0.000000e+00> : vector<4x80xf32>
    %17 = tpu.matmul %16, %14, %cst_20 {dimension_numbers = #tpu.dot_dimension_numbers<[1], [0], [0], [1], [0, 0, 1, 1], [], []>} : vector<4x4xbf16>, vector<4x80xbf16>, vector<4x80xf32> -> vector<4x80xf32>
    %18 = arith.addf %12, %17 : vector<4x80xf32>
    %c0_21 = arith.constant 0 : index
    %c0_22 = arith.constant 0 : index
    %c0_23 = arith.constant 0 : index
    %c10 = arith.constant 10 : index
    %19 = vector.load %arg2[%c0_21, %c0_22, %c0_23, %c10] : memref<1x1x4x128xbf16, #tpu.memory_space<vmem>>, vector<1x1x4x80xbf16>
    %20 = vector.shape_cast %19 : vector<1x1x4x80xbf16> to vector<4x80xbf16>
    %c3 = arith.constant 3 : index
    %c0_24 = arith.constant 0 : index
    %c0_25 = arith.constant 0 : index
    %21 = vector.load %arg3[%c3, %c0_24, %c0_25] : memref<9x4x4xbf16, #tpu.memory_space<vmem>>, vector<1x4x4xbf16>
    %22 = vector.shape_cast %21 : vector<1x4x4xbf16> to vector<4x4xbf16>
    %cst_26 = arith.constant dense<0.000000e+00> : vector<4x80xf32>
    %23 = tpu.matmul %22, %20, %cst_26 {dimension_numbers = #tpu.dot_dimension_numbers<[1], [0], [0], [1], [0, 0, 1, 1], [], []>} : vector<4x4xbf16>, vector<4x80xbf16>, vector<4x80xf32> -> vector<4x80xf32>
    %24 = arith.addf %18, %23 : vector<4x80xf32>
    %c0_27 = arith.constant 0 : index
    %c0_28 = arith.constant 0 : index
    %c0_29 = arith.constant 0 : index
    %c11 = arith.constant 11 : index
    %25 = vector.load %arg2[%c0_27, %c0_28, %c0_29, %c11] : memref<1x1x4x128xbf16, #tpu.memory_space<vmem>>, vector<1x1x4x80xbf16>
    %26 = vector.shape_cast %25 : vector<1x1x4x80xbf16> to vector<4x80xbf16>
    %c4 = arith.constant 4 : index
    %c0_30 = arith.constant 0 : index
    %c0_31 = arith.constant 0 : index
    %27 = vector.load %arg3[%c4, %c0_30, %c0_31] : memref<9x4x4xbf16, #tpu.memory_space<vmem>>, vector<1x4x4xbf16>
    %28 = vector.shape_cast %27 : vector<1x4x4xbf16> to vector<4x4xbf16>
    %cst_32 = arith.constant dense<0.000000e+00> : vector<4x80xf32>
    %29 = tpu.matmul %28, %26, %cst_32 {dimension_numbers = #tpu.dot_dimension_numbers<[1], [0], [0], [1], [0, 0, 1, 1], [], []>} : vector<4x4xbf16>, vector<4x80xbf16>, vector<4x80xf32> -> vector<4x80xf32>
    %30 = arith.addf %24, %29 : vector<4x80xf32>
    %c0_33 = arith.constant 0 : index
    %c0_34 = arith.constant 0 : index
    %c0_35 = arith.constant 0 : index
    %c12 = arith.constant 12 : index
    %31 = vector.load %arg2[%c0_33, %c0_34, %c0_35, %c12] : memref<1x1x4x128xbf16, #tpu.memory_space<vmem>>, vector<1x1x4x80xbf16>
    %32 = vector.shape_cast %31 : vector<1x1x4x80xbf16> to vector<4x80xbf16>
    %c5 = arith.constant 5 : index
    %c0_36 = arith.constant 0 : index
    %c0_37 = arith.constant 0 : index
    %33 = vector.load %arg3[%c5, %c0_36, %c0_37] : memref<9x4x4xbf16, #tpu.memory_space<vmem>>, vector<1x4x4xbf16>
    %34 = vector.shape_cast %33 : vector<1x4x4xbf16> to vector<4x4xbf16>
    %cst_38 = arith.constant dense<0.000000e+00> : vector<4x80xf32>
    %35 = tpu.matmul %34, %32, %cst_38 {dimension_numbers = #tpu.dot_dimension_numbers<[1], [0], [0], [1], [0, 0, 1, 1], [], []>} : vector<4x4xbf16>, vector<4x80xbf16>, vector<4x80xf32> -> vector<4x80xf32>
    %36 = arith.addf %30, %35 : vector<4x80xf32>
    %c0_39 = arith.constant 0 : index
    %c0_40 = arith.constant 0 : index
    %c0_41 = arith.constant 0 : index
    %c20 = arith.constant 20 : index
    %37 = vector.load %arg2[%c0_39, %c0_40, %c0_41, %c20] : memref<1x1x4x128xbf16, #tpu.memory_space<vmem>>, vector<1x1x4x80xbf16>
    %38 = vector.shape_cast %37 : vector<1x1x4x80xbf16> to vector<4x80xbf16>
    %c6 = arith.constant 6 : index
    %c0_42 = arith.constant 0 : index
    %c0_43 = arith.constant 0 : index
    %39 = vector.load %arg3[%c6, %c0_42, %c0_43] : memref<9x4x4xbf16, #tpu.memory_space<vmem>>, vector<1x4x4xbf16>
    %40 = vector.shape_cast %39 : vector<1x4x4xbf16> to vector<4x4xbf16>
    %cst_44 = arith.constant dense<0.000000e+00> : vector<4x80xf32>
    %41 = tpu.matmul %40, %38, %cst_44 {dimension_numbers = #tpu.dot_dimension_numbers<[1], [0], [0], [1], [0, 0, 1, 1], [], []>} : vector<4x4xbf16>, vector<4x80xbf16>, vector<4x80xf32> -> vector<4x80xf32>
    %42 = arith.addf %36, %41 : vector<4x80xf32>
    %c0_45 = arith.constant 0 : index
    %c0_46 = arith.constant 0 : index
    %c0_47 = arith.constant 0 : index
    %c21 = arith.constant 21 : index
    %43 = vector.load %arg2[%c0_45, %c0_46, %c0_47, %c21] : memref<1x1x4x128xbf16, #tpu.memory_space<vmem>>, vector<1x1x4x80xbf16>
    %44 = vector.shape_cast %43 : vector<1x1x4x80xbf16> to vector<4x80xbf16>
    %c7 = arith.constant 7 : index
    %c0_48 = arith.constant 0 : index
    %c0_49 = arith.constant 0 : index
    %45 = vector.load %arg3[%c7, %c0_48, %c0_49] : memref<9x4x4xbf16, #tpu.memory_space<vmem>>, vector<1x4x4xbf16>
    %46 = vector.shape_cast %45 : vector<1x4x4xbf16> to vector<4x4xbf16>
    %cst_50 = arith.constant dense<0.000000e+00> : vector<4x80xf32>
    %47 = tpu.matmul %46, %44, %cst_50 {dimension_numbers = #tpu.dot_dimension_numbers<[1], [0], [0], [1], [0, 0, 1, 1], [], []>} : vector<4x4xbf16>, vector<4x80xbf16>, vector<4x80xf32> -> vector<4x80xf32>
    %48 = arith.addf %42, %47 : vector<4x80xf32>
    %c0_51 = arith.constant 0 : index
    %c0_52 = arith.constant 0 : index
    %c0_53 = arith.constant 0 : index
    %c22 = arith.constant 22 : index
    %49 = vector.load %arg2[%c0_51, %c0_52, %c0_53, %c22] : memref<1x1x4x128xbf16, #tpu.memory_space<vmem>>, vector<1x1x4x80xbf16>
    %50 = vector.shape_cast %49 : vector<1x1x4x80xbf16> to vector<4x80xbf16>
    %c8 = arith.constant 8 : index
    %c0_54 = arith.constant 0 : index
    %c0_55 = arith.constant 0 : index
    %51 = vector.load %arg3[%c8, %c0_54, %c0_55] : memref<9x4x4xbf16, #tpu.memory_space<vmem>>, vector<1x4x4xbf16>
    %52 = vector.shape_cast %51 : vector<1x4x4xbf16> to vector<4x4xbf16>
    %cst_56 = arith.constant dense<0.000000e+00> : vector<4x80xf32>
    %53 = tpu.matmul %52, %50, %cst_56 {dimension_numbers = #tpu.dot_dimension_numbers<[1], [0], [0], [1], [0, 0, 1, 1], [], []>} : vector<4x4xbf16>, vector<4x80xbf16>, vector<4x80xf32> -> vector<4x80xf32>
    %54 = arith.addf %48, %53 : vector<4x80xf32>
    %c0_57 = arith.constant 0 : index
    %c0_58 = arith.constant 0 : index
    %55 = vector.load %arg4[%c0_57, %c0_58] : memref<4x1xf32, #tpu.memory_space<vmem>>, vector<4x1xf32>
    %56 = vector.broadcast %55 : vector<4x1xf32> to vector<4x80xf32>
    %57 = arith.addf %54, %56 : vector<4x80xf32>
    %cst_59 = arith.constant 0.000000e+00 : f32
    %58 = vector.broadcast %cst_59 : f32 to vector<4x80xf32>
    %59 = arith.cmpf oge, %57, %58 : vector<4x80xf32>
    %c0_60 = arith.constant 0 : index
    %c0_61 = arith.constant 0 : index
    %60 = vector.load %arg5[%c0_60, %c0_61] : memref<4x1xf32, #tpu.memory_space<vmem>>, vector<4x1xf32>
    %61 = vector.broadcast %60 : vector<4x1xf32> to vector<4x80xf32>
    %62 = arith.mulf %57, %61 : vector<4x80xf32>
    %63 = arith.select %59, %57, %62 : vector<4x80xi1>, vector<4x80xf32>
    %c0_62 = arith.constant 0 : index
    %c0_63 = arith.constant 0 : index
    %c0_64 = arith.constant 0 : index
    %c0_65 = arith.constant 0 : index
    %64 = vector.load %arg6[%c0_62, %c0_63, %c0_64, %c0_65] : memref<1x1x4x80xf32, #tpu.memory_space<vmem>>, vector<1x1x4x80xf32>
    %65 = vector.shape_cast %64 : vector<1x1x4x80xf32> to vector<4x80xf32>
    %66 = vector.shape_cast %63 : vector<4x80xf32> to vector<1x1x4x80xf32>
    tpu.vector_store %arg6[%c0_62, %c0_63, %c0_64, %c0_65], %66 {strides = array<i32>} : memref<1x1x4x80xf32, #tpu.memory_space<vmem>>, vector<1x1x4x80xf32>,
    return
  }
  func.func @transform_0(%arg0: i32, %arg1: i32) -> (i32, i32, i32, i32) {
    %c0_i32 = arith.constant 0 : i32
    %c0_i32_0 = arith.constant 0 : i32
    %c0_i32_1 = arith.constant 0 : i32
    return %arg0, %arg1, %c0_i32, %c0_i32_0 : i32, i32, i32, i32
  }
  func.func @transform_1(%arg0: i32, %arg1: i32) -> (i32, i32, i32) {
    %c0_i32 = arith.constant 0 : i32
    %c0_i32_0 = arith.constant 0 : i32
    %c0_i32_1 = arith.constant 0 : i32
    %c0_i32_2 = arith.constant 0 : i32
    return %c0_i32, %c0_i32_0, %c0_i32_1 : i32, i32, i32
  }
  func.func @transform_2(%arg0: i32, %arg1: i32) -> (i32, i32) {
    %c0_i32 = arith.constant 0 : i32
    %c0_i32_0 = arith.constant 0 : i32
    %c0_i32_1 = arith.constant 0 : i32
    return %c0_i32, %c0_i32_0 : i32, i32
  }
  func.func @transform_3(%arg0: i32, %arg1: i32) -> (i32, i32) {
    %c0_i32 = arith.constant 0 : i32
    %c0_i32_0 = arith.constant 0 : i32
    %c0_i32_1 = arith.constant 0 : i32
    return %c0_i32, %c0_i32_0 : i32, i32
  }
  func.func @transform_4(%arg0: i32, %arg1: i32) -> (i32, i32, i32, i32) {
    %c0_i32 = arith.constant 0 : i32
    %c0_i32_0 = arith.constant 0 : i32
    %c0_i32_1 = arith.constant 0 : i32
    return %arg0, %arg1, %c0_i32, %c0_i32_0 : i32, i32, i32, i32
  }
}

module attributes {stable_mosaic.version = 11 : i64} {
  func.func @_conv_kernel(%arg0: i32, %arg1: i32, %arg2: memref<1x1x8x128xbf16, #tpu.memory_space<vmem>>, %arg3: memref<9x4x8xbf16, #tpu.memory_space<vmem>>, %arg4: memref<4x1xf32, #tpu.memory_space<vmem>>, %arg5: memref<4x1xf32, #tpu.memory_space<vmem>>, %arg6: memref<1x1x4x80xf32, #tpu.memory_space<vmem>>) attributes {dimension_semantics = [#tpu.dimension_semantics<parallel>, #tpu.dimension_semantics<parallel>], iteration_bounds = array<i64: 2, 1>, scalar_prefetch = 0 : i64, scratch_operands = 0 : i64, tpu.core_type = #tpu.core_type<tc>, window_params = [{transform_indices = @transform_0, window_bounds = array<i64: 1, 1, 8, 128>}, {pipeline_mode = #tpu.pipeline_mode<synchronous>, transform_indices = @transform_1, window_bounds = array<i64: 9, 4, 8>}, {pipeline_mode = #tpu.pipeline_mode<synchronous>, transform_indices = @transform_2, window_bounds = array<i64: 4, 1>}, {pipeline_mode = #tpu.pipeline_mode<synchronous>, transform_indices = @transform_3, window_bounds = array<i64: 4, 1>}, {transform_indices = @transform_4, window_bounds = array<i64: 1, 1, 4, 80>}]} {
    %cst = arith.constant 0.000000e+00 : f32
    %0 = vector.broadcast %cst : f32 to vector<4x80xf32>
    %c0 = arith.constant 0 : index
    %c0_0 = arith.constant 0 : index
    %c0_1 = arith.constant 0 : index
    %c0_2 = arith.constant 0 : index
    %1 = vector.load %arg2[%c0, %c0_0, %c0_1, %c0_2] : memref<1x1x8x128xbf16, #tpu.memory_space<vmem>>, vector<1x1x8x80xbf16>
    %2 = vector.shape_cast %1 : vector<1x1x8x80xbf16> to vector<8x80xbf16>
    %c0_3 = arith.constant 0 : index
    %c0_4 = arith.constant 0 : index
    %c0_5 = arith.constant 0 : index
    %3 = vector.load %arg3[%c0_3, %c0_4, %c0_5] : memref<9x4x8xbf16, #tpu.memory_space<vmem>>, vector<1x4x8xbf16>
    %4 = vector.shape_cast %3 : vector<1x4x8xbf16> to vector<4x8xbf16>
    %cst_6 = arith.constant dense<0.000000e+00> : vector<4x80xf32>
    %5 = tpu.matmul %4, %2, %cst_6 {dimension_numbers = #tpu.dot_dimension_numbers<[1], [0], [0], [1], [0, 0, 1, 1], [], []>} : vector<4x8xbf16>, vector<8x80xbf16>, vector<4x80xf32> -> vector<4x80xf32>
    %6 = arith.addf %0, %5 : vector<4x80xf32>
    %c0_7 = arith.constant 0 : index
    %c0_8 = arith.constant 0 : index
    %c0_9 = arith.constant 0 : index
    %c1 = arith.constant 1 : index
    %7 = vector.load %arg2[%c0_7, %c0_8, %c0_9, %c1] : memref<1x1x8x128xbf16, #tpu.memory_space<vmem>>, vector<1x1x8x80xbf16>
    %8 = vector.shape_cast %7 : vector<1x1x8x80xbf16> to vector<8x80xbf16>
    %c1_10 = arith.constant 1 : index
    %c0_11 = arith.constant 0 : index
    %c0_12 = arith.constant 0 : index
    %9 = vector.load %arg3[%c1_10, %c0_11, %c0_12] : memref<9x4x8xbf16, #tpu.memory_space<vmem>>, vector<1x4x8xbf16>
    %10 = vector.shape_cast %9 : vector<1x4x8xbf16> to vector<4x8xbf16>
    %cst_13 = arith.constant dense<0.000000e+00> : vector<4x80xf32>
    %11 = tpu.matmul %10, %8, %cst_13 {dimension_numbers = #tpu.dot_dimension_numbers<[1], [0], [0], [1], [0, 0, 1, 1], [], []>} : vector<4x8xbf16>, vector<8x80xbf16>, vector<4x80xf32> -> vector<4x80xf32>
    %12 = arith.addf %6, %11 : vector<4x80xf32>
    %c0_14 = arith.constant 0 : index
    %c0_15 = arith.constant 0 : index
    %c0_16 = arith.constant 0 : index
    %c2 = arith.constant 2 : index
    %13 = vector.load %arg2[%c0_14, %c0_15, %c0_16, %c2] : memref<1x1x8x128xbf16, #tpu.memory_space<vmem>>, vector<1x1x8x80xbf16>
    %14 = vector.shape_cast %13 : vector<1x1x8x80xbf16> to vector<8x80xbf16>
    %c2_17 = arith.constant 2 : index
    %c0_18 = arith.constant 0 : index
    %c0_19 = arith.constant 0 : index
    %15 = vector.load %arg3[%c2_17, %c0_18, %c0_19] : memref<9x4x8xbf16, #tpu.memory_space<vmem>>, vector<1x4x8xbf16>
    %16 = vector.shape_cast %15 : vector<1x4x8xbf16> to vector<4x8xbf16>
    %cst_20 = arith.constant dense<0.000000e+00> : vector<4x80xf32>
    %17 = tpu.matmul %16, %14, %cst_20 {dimension_numbers = #tpu.dot_dimension_numbers<[1], [0], [0], [1], [0, 0, 1, 1], [], []>} : vector<4x8xbf16>, vector<8x80xbf16>, vector<4x80xf32> -> vector<4x80xf32>
    %18 = arith.addf %12, %17 : vector<4x80xf32>
    %c0_21 = arith.constant 0 : index
    %c0_22 = arith.constant 0 : index
    %c0_23 = arith.constant 0 : index
    %c10 = arith.constant 10 : index
    %19 = vector.load %arg2[%c0_21, %c0_22, %c0_23, %c10] : memref<1x1x8x128xbf16, #tpu.memory_space<vmem>>, vector<1x1x8x80xbf16>
    %20 = vector.shape_cast %19 : vector<1x1x8x80xbf16> to vector<8x80xbf16>
    %c3 = arith.constant 3 : index
    %c0_24 = arith.constant 0 : index
    %c0_25 = arith.constant 0 : index
    %21 = vector.load %arg3[%c3, %c0_24, %c0_25] : memref<9x4x8xbf16, #tpu.memory_space<vmem>>, vector<1x4x8xbf16>
    %22 = vector.shape_cast %21 : vector<1x4x8xbf16> to vector<4x8xbf16>
    %cst_26 = arith.constant dense<0.000000e+00> : vector<4x80xf32>
    %23 = tpu.matmul %22, %20, %cst_26 {dimension_numbers = #tpu.dot_dimension_numbers<[1], [0], [0], [1], [0, 0, 1, 1], [], []>} : vector<4x8xbf16>, vector<8x80xbf16>, vector<4x80xf32> -> vector<4x80xf32>
    %24 = arith.addf %18, %23 : vector<4x80xf32>
    %c0_27 = arith.constant 0 : index
    %c0_28 = arith.constant 0 : index
    %c0_29 = arith.constant 0 : index
    %c11 = arith.constant 11 : index
    %25 = vector.load %arg2[%c0_27, %c0_28, %c0_29, %c11] : memref<1x1x8x128xbf16, #tpu.memory_space<vmem>>, vector<1x1x8x80xbf16>
    %26 = vector.shape_cast %25 : vector<1x1x8x80xbf16> to vector<8x80xbf16>
    %c4 = arith.constant 4 : index
    %c0_30 = arith.constant 0 : index
    %c0_31 = arith.constant 0 : index
    %27 = vector.load %arg3[%c4, %c0_30, %c0_31] : memref<9x4x8xbf16, #tpu.memory_space<vmem>>, vector<1x4x8xbf16>
    %28 = vector.shape_cast %27 : vector<1x4x8xbf16> to vector<4x8xbf16>
    %cst_32 = arith.constant dense<0.000000e+00> : vector<4x80xf32>
    %29 = tpu.matmul %28, %26, %cst_32 {dimension_numbers = #tpu.dot_dimension_numbers<[1], [0], [0], [1], [0, 0, 1, 1], [], []>} : vector<4x8xbf16>, vector<8x80xbf16>, vector<4x80xf32> -> vector<4x80xf32>
    %30 = arith.addf %24, %29 : vector<4x80xf32>
    %c0_33 = arith.constant 0 : index
    %c0_34 = arith.constant 0 : index
    %c0_35 = arith.constant 0 : index
    %c12 = arith.constant 12 : index
    %31 = vector.load %arg2[%c0_33, %c0_34, %c0_35, %c12] : memref<1x1x8x128xbf16, #tpu.memory_space<vmem>>, vector<1x1x8x80xbf16>
    %32 = vector.shape_cast %31 : vector<1x1x8x80xbf16> to vector<8x80xbf16>
    %c5 = arith.constant 5 : index
    %c0_36 = arith.constant 0 : index
    %c0_37 = arith.constant 0 : index
    %33 = vector.load %arg3[%c5, %c0_36, %c0_37] : memref<9x4x8xbf16, #tpu.memory_space<vmem>>, vector<1x4x8xbf16>
    %34 = vector.shape_cast %33 : vector<1x4x8xbf16> to vector<4x8xbf16>
    %cst_38 = arith.constant dense<0.000000e+00> : vector<4x80xf32>
    %35 = tpu.matmul %34, %32, %cst_38 {dimension_numbers = #tpu.dot_dimension_numbers<[1], [0], [0], [1], [0, 0, 1, 1], [], []>} : vector<4x8xbf16>, vector<8x80xbf16>, vector<4x80xf32> -> vector<4x80xf32>
    %36 = arith.addf %30, %35 : vector<4x80xf32>
    %c0_39 = arith.constant 0 : index
    %c0_40 = arith.constant 0 : index
    %c0_41 = arith.constant 0 : index
    %c20 = arith.constant 20 : index
    %37 = vector.load %arg2[%c0_39, %c0_40, %c0_41, %c20] : memref<1x1x8x128xbf16, #tpu.memory_space<vmem>>, vector<1x1x8x80xbf16>
    %38 = vector.shape_cast %37 : vector<1x1x8x80xbf16> to vector<8x80xbf16>
    %c6 = arith.constant 6 : index
    %c0_42 = arith.constant 0 : index
    %c0_43 = arith.constant 0 : index
    %39 = vector.load %arg3[%c6, %c0_42, %c0_43] : memref<9x4x8xbf16, #tpu.memory_space<vmem>>, vector<1x4x8xbf16>
    %40 = vector.shape_cast %39 : vector<1x4x8xbf16> to vector<4x8xbf16>
    %cst_44 = arith.constant dense<0.000000e+00> : vector<4x80xf32>
    %41 = tpu.matmul %40, %38, %cst_44 {dimension_numbers = #tpu.dot_dimension_numbers<[1], [0], [0], [1], [0, 0, 1, 1], [], []>} : vector<4x8xbf16>, vector<8x80xbf16>, vector<4x80xf32> -> vector<4x80xf32>
    %42 = arith.addf %36, %41 : vector<4x80xf32>
    %c0_45 = arith.constant 0 : index
    %c0_46 = arith.constant 0 : index
    %c0_47 = arith.constant 0 : index
    %c21 = arith.constant 21 : index
    %43 = vector.load %arg2[%c0_45, %c0_46, %c0_47, %c21] : memref<1x1x8x128xbf16, #tpu.memory_space<vmem>>, vector<1x1x8x80xbf16>
    %44 = vector.shape_cast %43 : vector<1x1x8x80xbf16> to vector<8x80xbf16>
    %c7 = arith.constant 7 : index
    %c0_48 = arith.constant 0 : index
    %c0_49 = arith.constant 0 : index
    %45 = vector.load %arg3[%c7, %c0_48, %c0_49] : memref<9x4x8xbf16, #tpu.memory_space<vmem>>, vector<1x4x8xbf16>
    %46 = vector.shape_cast %45 : vector<1x4x8xbf16> to vector<4x8xbf16>
    %cst_50 = arith.constant dense<0.000000e+00> : vector<4x80xf32>
    %47 = tpu.matmul %46, %44, %cst_50 {dimension_numbers = #tpu.dot_dimension_numbers<[1], [0], [0], [1], [0, 0, 1, 1], [], []>} : vector<4x8xbf16>, vector<8x80xbf16>, vector<4x80xf32> -> vector<4x80xf32>
    %48 = arith.addf %42, %47 : vector<4x80xf32>
    %c0_51 = arith.constant 0 : index
    %c0_52 = arith.constant 0 : index
    %c0_53 = arith.constant 0 : index
    %c22 = arith.constant 22 : index
    %49 = vector.load %arg2[%c0_51, %c0_52, %c0_53, %c22] : memref<1x1x8x128xbf16, #tpu.memory_space<vmem>>, vector<1x1x8x80xbf16>
    %50 = vector.shape_cast %49 : vector<1x1x8x80xbf16> to vector<8x80xbf16>
    %c8 = arith.constant 8 : index
    %c0_54 = arith.constant 0 : index
    %c0_55 = arith.constant 0 : index
    %51 = vector.load %arg3[%c8, %c0_54, %c0_55] : memref<9x4x8xbf16, #tpu.memory_space<vmem>>, vector<1x4x8xbf16>
    %52 = vector.shape_cast %51 : vector<1x4x8xbf16> to vector<4x8xbf16>
    %cst_56 = arith.constant dense<0.000000e+00> : vector<4x80xf32>
    %53 = tpu.matmul %52, %50, %cst_56 {dimension_numbers = #tpu.dot_dimension_numbers<[1], [0], [0], [1], [0, 0, 1, 1], [], []>} : vector<4x8xbf16>, vector<8x80xbf16>, vector<4x80xf32> -> vector<4x80xf32>
    %54 = arith.addf %48, %53 : vector<4x80xf32>
    %c0_57 = arith.constant 0 : index
    %c0_58 = arith.constant 0 : index
    %55 = vector.load %arg4[%c0_57, %c0_58] : memref<4x1xf32, #tpu.memory_space<vmem>>, vector<4x1xf32>
    %56 = vector.broadcast %55 : vector<4x1xf32> to vector<4x80xf32>
    %57 = arith.addf %54, %56 : vector<4x80xf32>
    %cst_59 = arith.constant 0.000000e+00 : f32
    %58 = vector.broadcast %cst_59 : f32 to vector<4x80xf32>
    %59 = arith.cmpf oge, %57, %58 : vector<4x80xf32>
    %c0_60 = arith.constant 0 : index
    %c0_61 = arith.constant 0 : index
    %60 = vector.load %arg5[%c0_60, %c0_61] : memref<4x1xf32, #tpu.memory_space<vmem>>, vector<4x1xf32>
    %61 = vector.broadcast %60 : vector<4x1xf32> to vector<4x80xf32>
    %62 = arith.mulf %57, %61 : vector<4x80xf32>
    %63 = arith.select %59, %57, %62 : vector<4x80xi1>, vector<4x80xf32>
    %c0_62 = arith.constant 0 : index
    %c0_63 = arith.constant 0 : index
    %c0_64 = arith.constant 0 : index
    %c0_65 = arith.constant 0 : index
    %64 = vector.load %arg6[%c0_62, %c0_63, %c0_64, %c0_65] : memref<1x1x4x80xf32, #tpu.memory_space<vmem>>, vector<1x1x4x80xf32>
    %65 = vector.shape_cast %64 : vector<1x1x4x80xf32> to vector<4x80xf32>
    %66 = vector.shape_cast %63 : vector<4x80xf32> to vector<1x1x4x80xf32>
    tpu.vector_store %arg6[%c0_62, %c0_63, %c0_64, %c0_65], %66 {strides = array<i32>} : memref<1x1x4x80xf32, #tpu.memory_space<vmem>>, vector<1x1x4x80xf32>,
    return
  }
  func.func @transform_0(%arg0: i32, %arg1: i32) -> (i32, i32, i32, i32) {
    %c0_i32 = arith.constant 0 : i32
    %c0_i32_0 = arith.constant 0 : i32
    %c0_i32_1 = arith.constant 0 : i32
    return %arg0, %arg1, %c0_i32, %c0_i32_0 : i32, i32, i32, i32
  }
  func.func @transform_1(%arg0: i32, %arg1: i32) -> (i32, i32, i32) {
    %c0_i32 = arith.constant 0 : i32
    %c0_i32_0 = arith.constant 0 : i32
    %c0_i32_1 = arith.constant 0 : i32
    %c0_i32_2 = arith.constant 0 : i32
    return %c0_i32, %c0_i32_0, %c0_i32_1 : i32, i32, i32
  }
  func.func @transform_2(%arg0: i32, %arg1: i32) -> (i32, i32) {
    %c0_i32 = arith.constant 0 : i32
    %c0_i32_0 = arith.constant 0 : i32
    %c0_i32_1 = arith.constant 0 : i32
    return %c0_i32, %c0_i32_0 : i32, i32
  }
  func.func @transform_3(%arg0: i32, %arg1: i32) -> (i32, i32) {
    %c0_i32 = arith.constant 0 : i32
    %c0_i32_0 = arith.constant 0 : i32
    %c0_i32_1 = arith.constant 0 : i32
    return %c0_i32, %c0_i32_0 : i32, i32
  }
  func.func @transform_4(%arg0: i32, %arg1: i32) -> (i32, i32, i32, i32) {
    %c0_i32 = arith.constant 0 : i32
    %c0_i32_0 = arith.constant 0 : i32
    %c0_i32_1 = arith.constant 0 : i32
    return %arg0, %arg1, %c0_i32, %c0_i32_0 : i32, i32, i32, i32
  }
}

module attributes {stable_mosaic.version = 11 : i64} {
  func.func @_conv_kernel(%arg0: i32, %arg1: i32, %arg2: memref<1x1x16x128xbf16, #tpu.memory_space<vmem>>, %arg3: memref<9x4x16xbf16, #tpu.memory_space<vmem>>, %arg4: memref<4x1xf32, #tpu.memory_space<vmem>>, %arg5: memref<4x1xf32, #tpu.memory_space<vmem>>, %arg6: memref<1x1x4x80xf32, #tpu.memory_space<vmem>>) attributes {dimension_semantics = [#tpu.dimension_semantics<parallel>, #tpu.dimension_semantics<parallel>], iteration_bounds = array<i64: 2, 1>, scalar_prefetch = 0 : i64, scratch_operands = 0 : i64, tpu.core_type = #tpu.core_type<tc>, window_params = [{transform_indices = @transform_0, window_bounds = array<i64: 1, 1, 16, 128>}, {pipeline_mode = #tpu.pipeline_mode<synchronous>, transform_indices = @transform_1, window_bounds = array<i64: 9, 4, 16>}, {pipeline_mode = #tpu.pipeline_mode<synchronous>, transform_indices = @transform_2, window_bounds = array<i64: 4, 1>}, {pipeline_mode = #tpu.pipeline_mode<synchronous>, transform_indices = @transform_3, window_bounds = array<i64: 4, 1>}, {transform_indices = @transform_4, window_bounds = array<i64: 1, 1, 4, 80>}]} {
    %cst = arith.constant 0.000000e+00 : f32
    %0 = vector.broadcast %cst : f32 to vector<4x80xf32>
    %c0 = arith.constant 0 : index
    %c0_0 = arith.constant 0 : index
    %c0_1 = arith.constant 0 : index
    %c0_2 = arith.constant 0 : index
    %1 = vector.load %arg2[%c0, %c0_0, %c0_1, %c0_2] : memref<1x1x16x128xbf16, #tpu.memory_space<vmem>>, vector<1x1x16x80xbf16>
    %2 = vector.shape_cast %1 : vector<1x1x16x80xbf16> to vector<16x80xbf16>
    %c0_3 = arith.constant 0 : index
    %c0_4 = arith.constant 0 : index
    %c0_5 = arith.constant 0 : index
    %3 = vector.load %arg3[%c0_3, %c0_4, %c0_5] : memref<9x4x16xbf16, #tpu.memory_space<vmem>>, vector<1x4x16xbf16>
    %4 = vector.shape_cast %3 : vector<1x4x16xbf16> to vector<4x16xbf16>
    %cst_6 = arith.constant dense<0.000000e+00> : vector<4x80xf32>
    %5 = tpu.matmul %4, %2, %cst_6 {dimension_numbers = #tpu.dot_dimension_numbers<[1], [0], [0], [1], [0, 0, 1, 1], [], []>} : vector<4x16xbf16>, vector<16x80xbf16>, vector<4x80xf32> -> vector<4x80xf32>
    %6 = arith.addf %0, %5 : vector<4x80xf32>
    %c0_7 = arith.constant 0 : index
    %c0_8 = arith.constant 0 : index
    %c0_9 = arith.constant 0 : index
    %c1 = arith.constant 1 : index
    %7 = vector.load %arg2[%c0_7, %c0_8, %c0_9, %c1] : memref<1x1x16x128xbf16, #tpu.memory_space<vmem>>, vector<1x1x16x80xbf16>
    %8 = vector.shape_cast %7 : vector<1x1x16x80xbf16> to vector<16x80xbf16>
    %c1_10 = arith.constant 1 : index
    %c0_11 = arith.constant 0 : index
    %c0_12 = arith.constant 0 : index
    %9 = vector.load %arg3[%c1_10, %c0_11, %c0_12] : memref<9x4x16xbf16, #tpu.memory_space<vmem>>, vector<1x4x16xbf16>
    %10 = vector.shape_cast %9 : vector<1x4x16xbf16> to vector<4x16xbf16>
    %cst_13 = arith.constant dense<0.000000e+00> : vector<4x80xf32>
    %11 = tpu.matmul %10, %8, %cst_13 {dimension_numbers = #tpu.dot_dimension_numbers<[1], [0], [0], [1], [0, 0, 1, 1], [], []>} : vector<4x16xbf16>, vector<16x80xbf16>, vector<4x80xf32> -> vector<4x80xf32>
    %12 = arith.addf %6, %11 : vector<4x80xf32>
    %c0_14 = arith.constant 0 : index
    %c0_15 = arith.constant 0 : index
    %c0_16 = arith.constant 0 : index
    %c2 = arith.constant 2 : index
    %13 = vector.load %arg2[%c0_14, %c0_15, %c0_16, %c2] : memref<1x1x16x128xbf16, #tpu.memory_space<vmem>>, vector<1x1x16x80xbf16>
    %14 = vector.shape_cast %13 : vector<1x1x16x80xbf16> to vector<16x80xbf16>
    %c2_17 = arith.constant 2 : index
    %c0_18 = arith.constant 0 : index
    %c0_19 = arith.constant 0 : index
    %15 = vector.load %arg3[%c2_17, %c0_18, %c0_19] : memref<9x4x16xbf16, #tpu.memory_space<vmem>>, vector<1x4x16xbf16>
    %16 = vector.shape_cast %15 : vector<1x4x16xbf16> to vector<4x16xbf16>
    %cst_20 = arith.constant dense<0.000000e+00> : vector<4x80xf32>
    %17 = tpu.matmul %16, %14, %cst_20 {dimension_numbers = #tpu.dot_dimension_numbers<[1], [0], [0], [1], [0, 0, 1, 1], [], []>} : vector<4x16xbf16>, vector<16x80xbf16>, vector<4x80xf32> -> vector<4x80xf32>
    %18 = arith.addf %12, %17 : vector<4x80xf32>
    %c0_21 = arith.constant 0 : index
    %c0_22 = arith.constant 0 : index
    %c0_23 = arith.constant 0 : index
    %c10 = arith.constant 10 : index
    %19 = vector.load %arg2[%c0_21, %c0_22, %c0_23, %c10] : memref<1x1x16x128xbf16, #tpu.memory_space<vmem>>, vector<1x1x16x80xbf16>
    %20 = vector.shape_cast %19 : vector<1x1x16x80xbf16> to vector<16x80xbf16>
    %c3 = arith.constant 3 : index
    %c0_24 = arith.constant 0 : index
    %c0_25 = arith.constant 0 : index
    %21 = vector.load %arg3[%c3, %c0_24, %c0_25] : memref<9x4x16xbf16, #tpu.memory_space<vmem>>, vector<1x4x16xbf16>
    %22 = vector.shape_cast %21 : vector<1x4x16xbf16> to vector<4x16xbf16>
    %cst_26 = arith.constant dense<0.000000e+00> : vector<4x80xf32>
    %23 = tpu.matmul %22, %20, %cst_26 {dimension_numbers = #tpu.dot_dimension_numbers<[1], [0], [0], [1], [0, 0, 1, 1], [], []>} : vector<4x16xbf16>, vector<16x80xbf16>, vector<4x80xf32> -> vector<4x80xf32>
    %24 = arith.addf %18, %23 : vector<4x80xf32>
    %c0_27 = arith.constant 0 : index
    %c0_28 = arith.constant 0 : index
    %c0_29 = arith.constant 0 : index
    %c11 = arith.constant 11 : index
    %25 = vector.load %arg2[%c0_27, %c0_28, %c0_29, %c11] : memref<1x1x16x128xbf16, #tpu.memory_space<vmem>>, vector<1x1x16x80xbf16>
    %26 = vector.shape_cast %25 : vector<1x1x16x80xbf16> to vector<16x80xbf16>
    %c4 = arith.constant 4 : index
    %c0_30 = arith.constant 0 : index
    %c0_31 = arith.constant 0 : index
    %27 = vector.load %arg3[%c4, %c0_30, %c0_31] : memref<9x4x16xbf16, #tpu.memory_space<vmem>>, vector<1x4x16xbf16>
    %28 = vector.shape_cast %27 : vector<1x4x16xbf16> to vector<4x16xbf16>
    %cst_32 = arith.constant dense<0.000000e+00> : vector<4x80xf32>
    %29 = tpu.matmul %28, %26, %cst_32 {dimension_numbers = #tpu.dot_dimension_numbers<[1], [0], [0], [1], [0, 0, 1, 1], [], []>} : vector<4x16xbf16>, vector<16x80xbf16>, vector<4x80xf32> -> vector<4x80xf32>
    %30 = arith.addf %24, %29 : vector<4x80xf32>
    %c0_33 = arith.constant 0 : index
    %c0_34 = arith.constant 0 : index
    %c0_35 = arith.constant 0 : index
    %c12 = arith.constant 12 : index
    %31 = vector.load %arg2[%c0_33, %c0_34, %c0_35, %c12] : memref<1x1x16x128xbf16, #tpu.memory_space<vmem>>, vector<1x1x16x80xbf16>
    %32 = vector.shape_cast %31 : vector<1x1x16x80xbf16> to vector<16x80xbf16>
    %c5 = arith.constant 5 : index
    %c0_36 = arith.constant 0 : index
    %c0_37 = arith.constant 0 : index
    %33 = vector.load %arg3[%c5, %c0_36, %c0_37] : memref<9x4x16xbf16, #tpu.memory_space<vmem>>, vector<1x4x16xbf16>
    %34 = vector.shape_cast %33 : vector<1x4x16xbf16> to vector<4x16xbf16>
    %cst_38 = arith.constant dense<0.000000e+00> : vector<4x80xf32>
    %35 = tpu.matmul %34, %32, %cst_38 {dimension_numbers = #tpu.dot_dimension_numbers<[1], [0], [0], [1], [0, 0, 1, 1], [], []>} : vector<4x16xbf16>, vector<16x80xbf16>, vector<4x80xf32> -> vector<4x80xf32>
    %36 = arith.addf %30, %35 : vector<4x80xf32>
    %c0_39 = arith.constant 0 : index
    %c0_40 = arith.constant 0 : index
    %c0_41 = arith.constant 0 : index
    %c20 = arith.constant 20 : index
    %37 = vector.load %arg2[%c0_39, %c0_40, %c0_41, %c20] : memref<1x1x16x128xbf16, #tpu.memory_space<vmem>>, vector<1x1x16x80xbf16>
    %38 = vector.shape_cast %37 : vector<1x1x16x80xbf16> to vector<16x80xbf16>
    %c6 = arith.constant 6 : index
    %c0_42 = arith.constant 0 : index
    %c0_43 = arith.constant 0 : index
    %39 = vector.load %arg3[%c6, %c0_42, %c0_43] : memref<9x4x16xbf16, #tpu.memory_space<vmem>>, vector<1x4x16xbf16>
    %40 = vector.shape_cast %39 : vector<1x4x16xbf16> to vector<4x16xbf16>
    %cst_44 = arith.constant dense<0.000000e+00> : vector<4x80xf32>
    %41 = tpu.matmul %40, %38, %cst_44 {dimension_numbers = #tpu.dot_dimension_numbers<[1], [0], [0], [1], [0, 0, 1, 1], [], []>} : vector<4x16xbf16>, vector<16x80xbf16>, vector<4x80xf32> -> vector<4x80xf32>
    %42 = arith.addf %36, %41 : vector<4x80xf32>
    %c0_45 = arith.constant 0 : index
    %c0_46 = arith.constant 0 : index
    %c0_47 = arith.constant 0 : index
    %c21 = arith.constant 21 : index
    %43 = vector.load %arg2[%c0_45, %c0_46, %c0_47, %c21] : memref<1x1x16x128xbf16, #tpu.memory_space<vmem>>, vector<1x1x16x80xbf16>
    %44 = vector.shape_cast %43 : vector<1x1x16x80xbf16> to vector<16x80xbf16>
    %c7 = arith.constant 7 : index
    %c0_48 = arith.constant 0 : index
    %c0_49 = arith.constant 0 : index
    %45 = vector.load %arg3[%c7, %c0_48, %c0_49] : memref<9x4x16xbf16, #tpu.memory_space<vmem>>, vector<1x4x16xbf16>
    %46 = vector.shape_cast %45 : vector<1x4x16xbf16> to vector<4x16xbf16>
    %cst_50 = arith.constant dense<0.000000e+00> : vector<4x80xf32>
    %47 = tpu.matmul %46, %44, %cst_50 {dimension_numbers = #tpu.dot_dimension_numbers<[1], [0], [0], [1], [0, 0, 1, 1], [], []>} : vector<4x16xbf16>, vector<16x80xbf16>, vector<4x80xf32> -> vector<4x80xf32>
    %48 = arith.addf %42, %47 : vector<4x80xf32>
    %c0_51 = arith.constant 0 : index
    %c0_52 = arith.constant 0 : index
    %c0_53 = arith.constant 0 : index
    %c22 = arith.constant 22 : index
    %49 = vector.load %arg2[%c0_51, %c0_52, %c0_53, %c22] : memref<1x1x16x128xbf16, #tpu.memory_space<vmem>>, vector<1x1x16x80xbf16>
    %50 = vector.shape_cast %49 : vector<1x1x16x80xbf16> to vector<16x80xbf16>
    %c8 = arith.constant 8 : index
    %c0_54 = arith.constant 0 : index
    %c0_55 = arith.constant 0 : index
    %51 = vector.load %arg3[%c8, %c0_54, %c0_55] : memref<9x4x16xbf16, #tpu.memory_space<vmem>>, vector<1x4x16xbf16>
    %52 = vector.shape_cast %51 : vector<1x4x16xbf16> to vector<4x16xbf16>
    %cst_56 = arith.constant dense<0.000000e+00> : vector<4x80xf32>
    %53 = tpu.matmul %52, %50, %cst_56 {dimension_numbers = #tpu.dot_dimension_numbers<[1], [0], [0], [1], [0, 0, 1, 1], [], []>} : vector<4x16xbf16>, vector<16x80xbf16>, vector<4x80xf32> -> vector<4x80xf32>
    %54 = arith.addf %48, %53 : vector<4x80xf32>
    %c0_57 = arith.constant 0 : index
    %c0_58 = arith.constant 0 : index
    %55 = vector.load %arg4[%c0_57, %c0_58] : memref<4x1xf32, #tpu.memory_space<vmem>>, vector<4x1xf32>
    %56 = vector.broadcast %55 : vector<4x1xf32> to vector<4x80xf32>
    %57 = arith.addf %54, %56 : vector<4x80xf32>
    %cst_59 = arith.constant 0.000000e+00 : f32
    %58 = vector.broadcast %cst_59 : f32 to vector<4x80xf32>
    %59 = arith.cmpf oge, %57, %58 : vector<4x80xf32>
    %c0_60 = arith.constant 0 : index
    %c0_61 = arith.constant 0 : index
    %60 = vector.load %arg5[%c0_60, %c0_61] : memref<4x1xf32, #tpu.memory_space<vmem>>, vector<4x1xf32>
    %61 = vector.broadcast %60 : vector<4x1xf32> to vector<4x80xf32>
    %62 = arith.mulf %57, %61 : vector<4x80xf32>
    %63 = arith.select %59, %57, %62 : vector<4x80xi1>, vector<4x80xf32>
    %c0_62 = arith.constant 0 : index
    %c0_63 = arith.constant 0 : index
    %c0_64 = arith.constant 0 : index
    %c0_65 = arith.constant 0 : index
    %64 = vector.load %arg6[%c0_62, %c0_63, %c0_64, %c0_65] : memref<1x1x4x80xf32, #tpu.memory_space<vmem>>, vector<1x1x4x80xf32>
    %65 = vector.shape_cast %64 : vector<1x1x4x80xf32> to vector<4x80xf32>
    %66 = vector.shape_cast %63 : vector<4x80xf32> to vector<1x1x4x80xf32>
    tpu.vector_store %arg6[%c0_62, %c0_63, %c0_64, %c0_65], %66 {strides = array<i32>} : memref<1x1x4x80xf32, #tpu.memory_space<vmem>>, vector<1x1x4x80xf32>,
    return
  }
  func.func @transform_0(%arg0: i32, %arg1: i32) -> (i32, i32, i32, i32) {
    %c0_i32 = arith.constant 0 : i32
    %c0_i32_0 = arith.constant 0 : i32
    %c0_i32_1 = arith.constant 0 : i32
    return %arg0, %arg1, %c0_i32, %c0_i32_0 : i32, i32, i32, i32
  }
  func.func @transform_1(%arg0: i32, %arg1: i32) -> (i32, i32, i32) {
    %c0_i32 = arith.constant 0 : i32
    %c0_i32_0 = arith.constant 0 : i32
    %c0_i32_1 = arith.constant 0 : i32
    %c0_i32_2 = arith.constant 0 : i32
    return %c0_i32, %c0_i32_0, %c0_i32_1 : i32, i32, i32
  }
  func.func @transform_2(%arg0: i32, %arg1: i32) -> (i32, i32) {
    %c0_i32 = arith.constant 0 : i32
    %c0_i32_0 = arith.constant 0 : i32
    %c0_i32_1 = arith.constant 0 : i32
    return %c0_i32, %c0_i32_0 : i32, i32
  }
  func.func @transform_3(%arg0: i32, %arg1: i32) -> (i32, i32) {
    %c0_i32 = arith.constant 0 : i32
    %c0_i32_0 = arith.constant 0 : i32
    %c0_i32_1 = arith.constant 0 : i32
    return %c0_i32, %c0_i32_0 : i32, i32
  }
  func.func @transform_4(%arg0: i32, %arg1: i32) -> (i32, i32, i32, i32) {
    %c0_i32 = arith.constant 0 : i32
    %c0_i32_0 = arith.constant 0 : i32
    %c0_i32_1 = arith.constant 0 : i32
    return %arg0, %arg1, %c0_i32, %c0_i32_0 : i32, i32, i32, i32
  }
}

module attributes {stable_mosaic.version = 11 : i64} {
  func.func @_conv_kernel(%arg0: i32, %arg1: i32, %arg2: memref<1x1x32x128xbf16, #tpu.memory_space<vmem>>, %arg3: memref<1x4x32xbf16, #tpu.memory_space<vmem>>, %arg4: memref<4x1xf32, #tpu.memory_space<vmem>>, %arg5: memref<4x1xf32, #tpu.memory_space<vmem>>, %arg6: memref<1x1x4x64xf32, #tpu.memory_space<vmem>>) attributes {dimension_semantics = [#tpu.dimension_semantics<parallel>, #tpu.dimension_semantics<parallel>], iteration_bounds = array<i64: 2, 1>, scalar_prefetch = 0 : i64, scratch_operands = 0 : i64, tpu.core_type = #tpu.core_type<tc>, window_params = [{transform_indices = @transform_0, window_bounds = array<i64: 1, 1, 32, 128>}, {pipeline_mode = #tpu.pipeline_mode<synchronous>, transform_indices = @transform_1, window_bounds = array<i64: 1, 4, 32>}, {pipeline_mode = #tpu.pipeline_mode<synchronous>, transform_indices = @transform_2, window_bounds = array<i64: 4, 1>}, {pipeline_mode = #tpu.pipeline_mode<synchronous>, transform_indices = @transform_3, window_bounds = array<i64: 4, 1>}, {transform_indices = @transform_4, window_bounds = array<i64: 1, 1, 4, 64>}]} {
    %cst = arith.constant 0.000000e+00 : f32
    %0 = vector.broadcast %cst : f32 to vector<4x64xf32>
    %c0 = arith.constant 0 : index
    %c0_0 = arith.constant 0 : index
    %c0_1 = arith.constant 0 : index
    %c0_2 = arith.constant 0 : index
    %1 = vector.load %arg2[%c0, %c0_0, %c0_1, %c0_2] : memref<1x1x32x128xbf16, #tpu.memory_space<vmem>>, vector<1x1x32x64xbf16>
    %2 = vector.shape_cast %1 : vector<1x1x32x64xbf16> to vector<32x64xbf16>
    %c0_3 = arith.constant 0 : index
    %c0_4 = arith.constant 0 : index
    %c0_5 = arith.constant 0 : index
    %3 = vector.load %arg3[%c0_3, %c0_4, %c0_5] : memref<1x4x32xbf16, #tpu.memory_space<vmem>>, vector<1x4x32xbf16>
    %4 = vector.shape_cast %3 : vector<1x4x32xbf16> to vector<4x32xbf16>
    %cst_6 = arith.constant dense<0.000000e+00> : vector<4x64xf32>
    %5 = tpu.matmul %4, %2, %cst_6 {dimension_numbers = #tpu.dot_dimension_numbers<[1], [0], [0], [1], [0, 0, 1, 1], [], []>} : vector<4x32xbf16>, vector<32x64xbf16>, vector<4x64xf32> -> vector<4x64xf32>
    %6 = arith.addf %0, %5 : vector<4x64xf32>
    %c0_7 = arith.constant 0 : index
    %c0_8 = arith.constant 0 : index
    %7 = vector.load %arg4[%c0_7, %c0_8] : memref<4x1xf32, #tpu.memory_space<vmem>>, vector<4x1xf32>
    %8 = vector.broadcast %7 : vector<4x1xf32> to vector<4x64xf32>
    %9 = arith.addf %6, %8 : vector<4x64xf32>
    %cst_9 = arith.constant 0.000000e+00 : f32
    %10 = vector.broadcast %cst_9 : f32 to vector<4x64xf32>
    %11 = arith.cmpf oge, %9, %10 : vector<4x64xf32>
    %c0_10 = arith.constant 0 : index
    %c0_11 = arith.constant 0 : index
    %12 = vector.load %arg5[%c0_10, %c0_11] : memref<4x1xf32, #tpu.memory_space<vmem>>, vector<4x1xf32>
    %13 = vector.broadcast %12 : vector<4x1xf32> to vector<4x64xf32>
    %14 = arith.mulf %9, %13 : vector<4x64xf32>
    %15 = arith.select %11, %9, %14 : vector<4x64xi1>, vector<4x64xf32>
    %c0_12 = arith.constant 0 : index
    %c0_13 = arith.constant 0 : index
    %c0_14 = arith.constant 0 : index
    %c0_15 = arith.constant 0 : index
    %16 = vector.load %arg6[%c0_12, %c0_13, %c0_14, %c0_15] : memref<1x1x4x64xf32, #tpu.memory_space<vmem>>, vector<1x1x4x64xf32>
    %17 = vector.shape_cast %16 : vector<1x1x4x64xf32> to vector<4x64xf32>
    %18 = vector.shape_cast %15 : vector<4x64xf32> to vector<1x1x4x64xf32>
    tpu.vector_store %arg6[%c0_12, %c0_13, %c0_14, %c0_15], %18 {strides = array<i32>} : memref<1x1x4x64xf32, #tpu.memory_space<vmem>>, vector<1x1x4x64xf32>,
    return
  }
  func.func @transform_0(%arg0: i32, %arg1: i32) -> (i32, i32, i32, i32) {
    %c0_i32 = arith.constant 0 : i32
    %c0_i32_0 = arith.constant 0 : i32
    %c0_i32_1 = arith.constant 0 : i32
    return %arg0, %arg1, %c0_i32, %c0_i32_0 : i32, i32, i32, i32
  }
  func.func @transform_1(%arg0: i32, %arg1: i32) -> (i32, i32, i32) {
    %c0_i32 = arith.constant 0 : i32
    %c0_i32_0 = arith.constant 0 : i32
    %c0_i32_1 = arith.constant 0 : i32
    %c0_i32_2 = arith.constant 0 : i32
    return %c0_i32, %c0_i32_0, %c0_i32_1 : i32, i32, i32
  }
  func.func @transform_2(%arg0: i32, %arg1: i32) -> (i32, i32) {
    %c0_i32 = arith.constant 0 : i32
    %c0_i32_0 = arith.constant 0 : i32
    %c0_i32_1 = arith.constant 0 : i32
    return %c0_i32, %c0_i32_0 : i32, i32
  }
  func.func @transform_3(%arg0: i32, %arg1: i32) -> (i32, i32) {
    %c0_i32 = arith.constant 0 : i32
    %c0_i32_0 = arith.constant 0 : i32
    %c0_i32_1 = arith.constant 0 : i32
    return %c0_i32, %c0_i32_0 : i32, i32
  }
  func.func @transform_4(%arg0: i32, %arg1: i32) -> (i32, i32, i32, i32) {
    %c0_i32 = arith.constant 0 : i32
    %c0_i32_0 = arith.constant 0 : i32
    %c0_i32_1 = arith.constant 0 : i32
    return %arg0, %arg1, %c0_i32, %c0_i32_0 : i32, i32, i32, i32
  }
}

module attributes {stable_mosaic.version = 11 : i64} {
  func.func @_conv_kernel(%arg0: i32, %arg1: i32, %arg2: memref<1x1x4x128xbf16, #tpu.memory_space<vmem>>, %arg3: memref<9x12x4xbf16, #tpu.memory_space<vmem>>, %arg4: memref<12x1xf32, #tpu.memory_space<vmem>>, %arg5: memref<1x1x12x80xf32, #tpu.memory_space<vmem>>) attributes {dimension_semantics = [#tpu.dimension_semantics<parallel>, #tpu.dimension_semantics<parallel>], iteration_bounds = array<i64: 2, 1>, scalar_prefetch = 0 : i64, scratch_operands = 0 : i64, tpu.core_type = #tpu.core_type<tc>, window_params = [{transform_indices = @transform_0, window_bounds = array<i64: 1, 1, 4, 128>}, {pipeline_mode = #tpu.pipeline_mode<synchronous>, transform_indices = @transform_1, window_bounds = array<i64: 9, 12, 4>}, {pipeline_mode = #tpu.pipeline_mode<synchronous>, transform_indices = @transform_2, window_bounds = array<i64: 12, 1>}, {transform_indices = @transform_3, window_bounds = array<i64: 1, 1, 12, 80>}]} {
    %cst = arith.constant 0.000000e+00 : f32
    %0 = vector.broadcast %cst : f32 to vector<12x80xf32>
    %c0 = arith.constant 0 : index
    %c0_0 = arith.constant 0 : index
    %c0_1 = arith.constant 0 : index
    %c0_2 = arith.constant 0 : index
    %1 = vector.load %arg2[%c0, %c0_0, %c0_1, %c0_2] : memref<1x1x4x128xbf16, #tpu.memory_space<vmem>>, vector<1x1x4x80xbf16>
    %2 = vector.shape_cast %1 : vector<1x1x4x80xbf16> to vector<4x80xbf16>
    %c0_3 = arith.constant 0 : index
    %c0_4 = arith.constant 0 : index
    %c0_5 = arith.constant 0 : index
    %3 = vector.load %arg3[%c0_3, %c0_4, %c0_5] : memref<9x12x4xbf16, #tpu.memory_space<vmem>>, vector<1x12x4xbf16>
    %4 = vector.shape_cast %3 : vector<1x12x4xbf16> to vector<12x4xbf16>
    %cst_6 = arith.constant dense<0.000000e+00> : vector<12x80xf32>
    %5 = tpu.matmul %4, %2, %cst_6 {dimension_numbers = #tpu.dot_dimension_numbers<[1], [0], [0], [1], [0, 0, 1, 1], [], []>} : vector<12x4xbf16>, vector<4x80xbf16>, vector<12x80xf32> -> vector<12x80xf32>
    %6 = arith.addf %0, %5 : vector<12x80xf32>
    %c0_7 = arith.constant 0 : index
    %c0_8 = arith.constant 0 : index
    %c0_9 = arith.constant 0 : index
    %c1 = arith.constant 1 : index
    %7 = vector.load %arg2[%c0_7, %c0_8, %c0_9, %c1] : memref<1x1x4x128xbf16, #tpu.memory_space<vmem>>, vector<1x1x4x80xbf16>
    %8 = vector.shape_cast %7 : vector<1x1x4x80xbf16> to vector<4x80xbf16>
    %c1_10 = arith.constant 1 : index
    %c0_11 = arith.constant 0 : index
    %c0_12 = arith.constant 0 : index
    %9 = vector.load %arg3[%c1_10, %c0_11, %c0_12] : memref<9x12x4xbf16, #tpu.memory_space<vmem>>, vector<1x12x4xbf16>
    %10 = vector.shape_cast %9 : vector<1x12x4xbf16> to vector<12x4xbf16>
    %cst_13 = arith.constant dense<0.000000e+00> : vector<12x80xf32>
    %11 = tpu.matmul %10, %8, %cst_13 {dimension_numbers = #tpu.dot_dimension_numbers<[1], [0], [0], [1], [0, 0, 1, 1], [], []>} : vector<12x4xbf16>, vector<4x80xbf16>, vector<12x80xf32> -> vector<12x80xf32>
    %12 = arith.addf %6, %11 : vector<12x80xf32>
    %c0_14 = arith.constant 0 : index
    %c0_15 = arith.constant 0 : index
    %c0_16 = arith.constant 0 : index
    %c2 = arith.constant 2 : index
    %13 = vector.load %arg2[%c0_14, %c0_15, %c0_16, %c2] : memref<1x1x4x128xbf16, #tpu.memory_space<vmem>>, vector<1x1x4x80xbf16>
    %14 = vector.shape_cast %13 : vector<1x1x4x80xbf16> to vector<4x80xbf16>
    %c2_17 = arith.constant 2 : index
    %c0_18 = arith.constant 0 : index
    %c0_19 = arith.constant 0 : index
    %15 = vector.load %arg3[%c2_17, %c0_18, %c0_19] : memref<9x12x4xbf16, #tpu.memory_space<vmem>>, vector<1x12x4xbf16>
    %16 = vector.shape_cast %15 : vector<1x12x4xbf16> to vector<12x4xbf16>
    %cst_20 = arith.constant dense<0.000000e+00> : vector<12x80xf32>
    %17 = tpu.matmul %16, %14, %cst_20 {dimension_numbers = #tpu.dot_dimension_numbers<[1], [0], [0], [1], [0, 0, 1, 1], [], []>} : vector<12x4xbf16>, vector<4x80xbf16>, vector<12x80xf32> -> vector<12x80xf32>
    %18 = arith.addf %12, %17 : vector<12x80xf32>
    %c0_21 = arith.constant 0 : index
    %c0_22 = arith.constant 0 : index
    %c0_23 = arith.constant 0 : index
    %c10 = arith.constant 10 : index
    %19 = vector.load %arg2[%c0_21, %c0_22, %c0_23, %c10] : memref<1x1x4x128xbf16, #tpu.memory_space<vmem>>, vector<1x1x4x80xbf16>
    %20 = vector.shape_cast %19 : vector<1x1x4x80xbf16> to vector<4x80xbf16>
    %c3 = arith.constant 3 : index
    %c0_24 = arith.constant 0 : index
    %c0_25 = arith.constant 0 : index
    %21 = vector.load %arg3[%c3, %c0_24, %c0_25] : memref<9x12x4xbf16, #tpu.memory_space<vmem>>, vector<1x12x4xbf16>
    %22 = vector.shape_cast %21 : vector<1x12x4xbf16> to vector<12x4xbf16>
    %cst_26 = arith.constant dense<0.000000e+00> : vector<12x80xf32>
    %23 = tpu.matmul %22, %20, %cst_26 {dimension_numbers = #tpu.dot_dimension_numbers<[1], [0], [0], [1], [0, 0, 1, 1], [], []>} : vector<12x4xbf16>, vector<4x80xbf16>, vector<12x80xf32> -> vector<12x80xf32>
    %24 = arith.addf %18, %23 : vector<12x80xf32>
    %c0_27 = arith.constant 0 : index
    %c0_28 = arith.constant 0 : index
    %c0_29 = arith.constant 0 : index
    %c11 = arith.constant 11 : index
    %25 = vector.load %arg2[%c0_27, %c0_28, %c0_29, %c11] : memref<1x1x4x128xbf16, #tpu.memory_space<vmem>>, vector<1x1x4x80xbf16>
    %26 = vector.shape_cast %25 : vector<1x1x4x80xbf16> to vector<4x80xbf16>
    %c4 = arith.constant 4 : index
    %c0_30 = arith.constant 0 : index
    %c0_31 = arith.constant 0 : index
    %27 = vector.load %arg3[%c4, %c0_30, %c0_31] : memref<9x12x4xbf16, #tpu.memory_space<vmem>>, vector<1x12x4xbf16>
    %28 = vector.shape_cast %27 : vector<1x12x4xbf16> to vector<12x4xbf16>
    %cst_32 = arith.constant dense<0.000000e+00> : vector<12x80xf32>
    %29 = tpu.matmul %28, %26, %cst_32 {dimension_numbers = #tpu.dot_dimension_numbers<[1], [0], [0], [1], [0, 0, 1, 1], [], []>} : vector<12x4xbf16>, vector<4x80xbf16>, vector<12x80xf32> -> vector<12x80xf32>
    %30 = arith.addf %24, %29 : vector<12x80xf32>
    %c0_33 = arith.constant 0 : index
    %c0_34 = arith.constant 0 : index
    %c0_35 = arith.constant 0 : index
    %c12 = arith.constant 12 : index
    %31 = vector.load %arg2[%c0_33, %c0_34, %c0_35, %c12] : memref<1x1x4x128xbf16, #tpu.memory_space<vmem>>, vector<1x1x4x80xbf16>
    %32 = vector.shape_cast %31 : vector<1x1x4x80xbf16> to vector<4x80xbf16>
    %c5 = arith.constant 5 : index
    %c0_36 = arith.constant 0 : index
    %c0_37 = arith.constant 0 : index
    %33 = vector.load %arg3[%c5, %c0_36, %c0_37] : memref<9x12x4xbf16, #tpu.memory_space<vmem>>, vector<1x12x4xbf16>
    %34 = vector.shape_cast %33 : vector<1x12x4xbf16> to vector<12x4xbf16>
    %cst_38 = arith.constant dense<0.000000e+00> : vector<12x80xf32>
    %35 = tpu.matmul %34, %32, %cst_38 {dimension_numbers = #tpu.dot_dimension_numbers<[1], [0], [0], [1], [0, 0, 1, 1], [], []>} : vector<12x4xbf16>, vector<4x80xbf16>, vector<12x80xf32> -> vector<12x80xf32>
    %36 = arith.addf %30, %35 : vector<12x80xf32>
    %c0_39 = arith.constant 0 : index
    %c0_40 = arith.constant 0 : index
    %c0_41 = arith.constant 0 : index
    %c20 = arith.constant 20 : index
    %37 = vector.load %arg2[%c0_39, %c0_40, %c0_41, %c20] : memref<1x1x4x128xbf16, #tpu.memory_space<vmem>>, vector<1x1x4x80xbf16>
    %38 = vector.shape_cast %37 : vector<1x1x4x80xbf16> to vector<4x80xbf16>
    %c6 = arith.constant 6 : index
    %c0_42 = arith.constant 0 : index
    %c0_43 = arith.constant 0 : index
    %39 = vector.load %arg3[%c6, %c0_42, %c0_43] : memref<9x12x4xbf16, #tpu.memory_space<vmem>>, vector<1x12x4xbf16>
    %40 = vector.shape_cast %39 : vector<1x12x4xbf16> to vector<12x4xbf16>
    %cst_44 = arith.constant dense<0.000000e+00> : vector<12x80xf32>
    %41 = tpu.matmul %40, %38, %cst_44 {dimension_numbers = #tpu.dot_dimension_numbers<[1], [0], [0], [1], [0, 0, 1, 1], [], []>} : vector<12x4xbf16>, vector<4x80xbf16>, vector<12x80xf32> -> vector<12x80xf32>
    %42 = arith.addf %36, %41 : vector<12x80xf32>
    %c0_45 = arith.constant 0 : index
    %c0_46 = arith.constant 0 : index
    %c0_47 = arith.constant 0 : index
    %c21 = arith.constant 21 : index
    %43 = vector.load %arg2[%c0_45, %c0_46, %c0_47, %c21] : memref<1x1x4x128xbf16, #tpu.memory_space<vmem>>, vector<1x1x4x80xbf16>
    %44 = vector.shape_cast %43 : vector<1x1x4x80xbf16> to vector<4x80xbf16>
    %c7 = arith.constant 7 : index
    %c0_48 = arith.constant 0 : index
    %c0_49 = arith.constant 0 : index
    %45 = vector.load %arg3[%c7, %c0_48, %c0_49] : memref<9x12x4xbf16, #tpu.memory_space<vmem>>, vector<1x12x4xbf16>
    %46 = vector.shape_cast %45 : vector<1x12x4xbf16> to vector<12x4xbf16>
    %cst_50 = arith.constant dense<0.000000e+00> : vector<12x80xf32>
    %47 = tpu.matmul %46, %44, %cst_50 {dimension_numbers = #tpu.dot_dimension_numbers<[1], [0], [0], [1], [0, 0, 1, 1], [], []>} : vector<12x4xbf16>, vector<4x80xbf16>, vector<12x80xf32> -> vector<12x80xf32>
    %48 = arith.addf %42, %47 : vector<12x80xf32>
    %c0_51 = arith.constant 0 : index
    %c0_52 = arith.constant 0 : index
    %c0_53 = arith.constant 0 : index
    %c22 = arith.constant 22 : index
    %49 = vector.load %arg2[%c0_51, %c0_52, %c0_53, %c22] : memref<1x1x4x128xbf16, #tpu.memory_space<vmem>>, vector<1x1x4x80xbf16>
    %50 = vector.shape_cast %49 : vector<1x1x4x80xbf16> to vector<4x80xbf16>
    %c8 = arith.constant 8 : index
    %c0_54 = arith.constant 0 : index
    %c0_55 = arith.constant 0 : index
    %51 = vector.load %arg3[%c8, %c0_54, %c0_55] : memref<9x12x4xbf16, #tpu.memory_space<vmem>>, vector<1x12x4xbf16>
    %52 = vector.shape_cast %51 : vector<1x12x4xbf16> to vector<12x4xbf16>
    %cst_56 = arith.constant dense<0.000000e+00> : vector<12x80xf32>
    %53 = tpu.matmul %52, %50, %cst_56 {dimension_numbers = #tpu.dot_dimension_numbers<[1], [0], [0], [1], [0, 0, 1, 1], [], []>} : vector<12x4xbf16>, vector<4x80xbf16>, vector<12x80xf32> -> vector<12x80xf32>
    %54 = arith.addf %48, %53 : vector<12x80xf32>
    %c0_57 = arith.constant 0 : index
    %c0_58 = arith.constant 0 : index
    %55 = vector.load %arg4[%c0_57, %c0_58] : memref<12x1xf32, #tpu.memory_space<vmem>>, vector<12x1xf32>
    %56 = vector.broadcast %55 : vector<12x1xf32> to vector<12x80xf32>
    %57 = arith.addf %54, %56 : vector<12x80xf32>
    %c0_59 = arith.constant 0 : index
    %c0_60 = arith.constant 0 : index
    %c0_61 = arith.constant 0 : index
    %c0_62 = arith.constant 0 : index
    %58 = vector.load %arg5[%c0_59, %c0_60, %c0_61, %c0_62] : memref<1x1x12x80xf32, #tpu.memory_space<vmem>>, vector<1x1x12x80xf32>
    %59 = vector.shape_cast %58 : vector<1x1x12x80xf32> to vector<12x80xf32>
    %60 = vector.shape_cast %57 : vector<12x80xf32> to vector<1x1x12x80xf32>
    tpu.vector_store %arg5[%c0_59, %c0_60, %c0_61, %c0_62], %60 {strides = array<i32>} : memref<1x1x12x80xf32, #tpu.memory_space<vmem>>, vector<1x1x12x80xf32>,
    return
  }
  func.func @transform_0(%arg0: i32, %arg1: i32) -> (i32, i32, i32, i32) {
    %c0_i32 = arith.constant 0 : i32
    %c0_i32_0 = arith.constant 0 : i32
    %c0_i32_1 = arith.constant 0 : i32
    return %arg0, %arg1, %c0_i32, %c0_i32_0 : i32, i32, i32, i32
  }
  func.func @transform_1(%arg0: i32, %arg1: i32) -> (i32, i32, i32) {
    %c0_i32 = arith.constant 0 : i32
    %c0_i32_0 = arith.constant 0 : i32
    %c0_i32_1 = arith.constant 0 : i32
    %c0_i32_2 = arith.constant 0 : i32
    return %c0_i32, %c0_i32_0, %c0_i32_1 : i32, i32, i32
  }
  func.func @transform_2(%arg0: i32, %arg1: i32) -> (i32, i32) {
    %c0_i32 = arith.constant 0 : i32
    %c0_i32_0 = arith.constant 0 : i32
    %c0_i32_1 = arith.constant 0 : i32
    return %c0_i32, %c0_i32_0 : i32, i32
  }
  func.func @transform_3(%arg0: i32, %arg1: i32) -> (i32, i32, i32, i32) {
    %c0_i32 = arith.constant 0 : i32
    %c0_i32_0 = arith.constant 0 : i32
    %c0_i32_1 = arith.constant 0 : i32
    return %arg0, %arg1, %c0_i32, %c0_i32_0 : i32, i32, i32, i32
  }
}

</mosaic_0001>

<bundles_post_ra>
// kernel: cliquenet_forward.20
= control target key start
LH: loop header
LB: loop body
LE: loop exit
PB: predicated region body
PF: predicated region fallthrough
CT: control target
= control target key end

     0   :  { %s949_s12 = smov 0   ;;  %s951_s13 = smov 0   ;;  %s1061_s0 = inlined_call_operand.vmem [shape: bf16[2,1,12,128], index: 0, kind: input, shape index: {}]   ;;  %s1062_s1 = inlined_call_operand.vmem [shape: bf16[9,4,12], index: 1, kind: input, shape index: {}]   ;;  %s1063_s2 = inlined_call_operand.vmem [shape: f32[4,1], index: 2, kind: input, shape index: {}]   ;;  %s1064_s3 = inlined_call_operand.vmem [shape: f32[2,1,4,80], index: 3, kind: output, shape index: {}]  }
   0x1   :  { %s953_s14 = smov 0  }
   0x2 LB: > { %s25_s15 = sadd.s32 1, %s912_s13  ;;  %p760_p0 = scmp.ge.s32.totalorder %s916_s14, 1  ;;  %s916_s14 = sphi %s953_s14, %s13_s14   ;;  %s912_s13 = sphi %s951_s13, %s1066_s13   ;;  %s908_s12 = sphi %s949_s12, %s1065_s12  }
   0x3   : > { %p27_p1 = scmp.ge.s32.totalorder %s25_s15, 2  ;;  %p157_p2 = scmp.lt.s32.totalorder %s916_s14, 3 }
   0x5   : > { %s1068_s15 = smov (%p27_p1, %s25_s15), 0  ;;  %p158_p3 = pnand %p760_p0, %p157_p2 }
   0x6   : > { %p187_p4 = scmp.lt.s32.totalorder (!%p158_p3), %s908_s12, 1  ;;  %v918_v0 = vmov (!%p158_p3), 0.0   ;;  %vm919_vm0 = vmmov (!%p158_p3), 0   ;;  %vm220_vm1 = vcmask (!%p158_p3), 1045504   ;;  %s920_s20 = smov (!%p158_p3), 127   ;;  %vm216_vm2 = vcmask (!%p158_p3), 97280  }
   0x7   : > { %161 = sbr.rel (%p158_p3) target bundleno = 386 (0x182), region = 32  ;;  %803 = vmatprep.subr.bf16.mxu0 (!%p158_p3), %v918_v0  ;;  %809 = vmatprep.subr.bf16.mxu1 (!%p158_p3), %v918_v0  ;;  %s921_s21 = smov (!%p158_p3), 118   ;;  %v206_v3 = vld [vmem:[%s1062_s1] sm:$0x3] (!%p158_p3)  ;;  %v928_v5 = vmov (!%p158_p3), 0   ;;  %vm674_vm3 = vcmask (!%p158_p3), 650240  }
   0x8   : > { %805 = vmatprep.mubr.msk.bf16.mxu0 (!%p158_p3), %vm919_vm0, %v918_v0  ;;  %811 = vmatprep.mubr.msk.bf16.mxu1 (!%p158_p3), %vm919_vm0, %v918_v0  ;;  %s922_s24 = smov (!%p158_p3), 126   ;;  %s923_s25 = smov (!%p158_p3), 117   ;;  %v667_v4 = vld [vmem:[%s1063_s2] sm:$0xf] (!%p158_p3)  ;;  %v770_v11 = vld [vmem:[%s1062_s1 + $0x6] sm:$0x3] (!%p158_p3) }
   0x9   : > { %s924_s26 = smov (!%p158_p3), 116   ;;  %s925_s27 = smov (!%p158_p3), 108   ;;  %892 = vset.pattern.permute.xlu0 (!%p158_p3), %v928_v5  ;;  %v764_v10 = vld [vmem:[%s1062_s1 + $0x2] sm:$0x3] (!%p158_p3)  ;;  %v768_v17 = vld [vmem:[%s1062_s1 + $0x4] sm:$0x3] (!%p158_p3) }
   0xa   : > { %s926_s28 = smov (!%p158_p3), 107   ;;  %s927_s29 = smov (!%p158_p3), 106   ;;  %v774_v18 = vld [vmem:[%s1062_s1 + $0xa] sm:$0x3] (!%p158_p3)  ;;  %v772_v23 = vld [vmem:[%s1062_s1 + $0x8] sm:$0x3] (!%p158_p3) }
   0xb   : > { %v778_v24 = vld [vmem:[%s1062_s1 + $0xe] sm:$0x3] (!%p158_p3)  ;;  %v776_v27 = vld [vmem:[%s1062_s1 + $0xc] sm:$0x3] (!%p158_p3)  ;;  %v780_v29 = vld [vmem:[%s1062_s1 + $0x10] sm:$0x3] (!%p158_p3) }
   0xe   : > { %s1070_s12 = smov (!%p187_p4, %s908_s12), 1 }
   0xf   : > { %s784_s16 = sshll.u32 %s1070_s12, 3 }
  0x10   : > { %s195_s19 = scalar_lea.vmem %s1061_s0, %s784_s16 }
  0x11   : > { %v893_v1 = vld [vmem:[%s195_s19] sm:$0x3f]  }
  0x12   : > { %214 = vrot.lane.b32.xlu0 %v893_v1, %s920_s20  ;;  %363 = vrot.lane.b32.xlu1 %v893_v1, %s921_s21  ;;  %v268_v2 = vsel %vm220_vm1, %v893_v1, 0 }
  0x13   : > { %810 = vmatpush3.bf16.msra.mxu1 %v268_v2 }
  0x14   : > { %821 = vmatprep.subr.bf16.mxu1 %v918_v0 }
  0x16   : > { %312 = vrot.lane.b32.xlu0 %v893_v1, %s922_s24  ;;  %414 = vrot.lane.b32.xlu1 %v893_v1, %s923_s25  ;;  %s763_s25 = sshll.u32 %s1070_s12, 2 }
  0x17   : > { %812 = vmatmul.mubr.msk.bf16.vlgmr.msra.gmra.mrb[0].mxu1 %vm216_vm2, %v206_v3 }
  0x18   : > { %823 = vmatprep.mubr.msk.bf16.mxu1 %vm919_vm0, %v918_v0 }
  0x1a   : > { %465 = vrot.lane.b32.xlu0 %v893_v1, %s924_s26  ;;  %516 = vrot.lane.b32.xlu1 %v893_v1, %s925_s27 }
  0x1e   : > { %567 = vrot.lane.b32.xlu0 %v893_v1, %s926_s28  ;;  %618 = vrot.lane.b32.xlu1 %v893_v1, %s927_s29  ;;  %s202_s28 = scalar_lea.vmem %s1064_s3, %s763_s25 }
  0x22   : > { %670 = vperm.xlu0 %892, %v667_v4  }
  0x84   : > { %v215_v6 = vpop.permute.xlu0 %214  ;;  %v364_v7 = vpop.permute.xlu1 %363 }
  0x85   : > { %v222_v8 = vsel %vm220_vm1, %v215_v6, 0  ;;  %v369_v9 = vsel %vm220_vm1, %v364_v7, 0 }
  0x86   : > { %804 = vmatpush3.bf16.msra.mxu0 %v222_v8  ;;  %822 = vmatpush3.bf16.msra.mxu1 %v369_v9 }
  0x87   : > { %815 = vmatprep.subr.bf16.mxu0 %v918_v0  ;;  %833 = vmatprep.subr.bf16.mxu1 %v918_v0 }
  0x88   : > { %v313_v12 = vpop.permute.xlu0 %312  ;;  %v415_v14 = vpop.permute.xlu1 %414 }
  0x89   : > { %v318_v13 = vsel %vm220_vm1, %v313_v12, 0  ;;  %806 = vmatmul.mubr.msk.bf16.vlgmr.msra.gmra.mrb[0].mxu0 %vm216_vm2, %v764_v10  ;;  %824 = vmatmul.mubr.msk.bf16.vlgmr.msra.gmra.mrb[4].mxu1 %vm216_vm2, %v770_v11  ;;  %v420_v19 = vsel %vm220_vm1, %v415_v14, 0 }
  0x8a   : > { %816 = vmatpush3.bf16.msra.mxu0 %v318_v13  ;;  %817 = vmatprep.mubr.msk.bf16.mxu0 %vm919_vm0, %v918_v0 }
  0x8b   : > { %827 = vmatprep.subr.bf16.mxu0 %v918_v0  ;;  %835 = vmatprep.mubr.msk.bf16.mxu1 %vm919_vm0, %v918_v0 }
  0x8c   : > { %v466_v15 = vpop.permute.xlu0 %465  ;;  %v517_v22 = vpop.permute.xlu1 %516 }
  0x8d   : > { %v471_v16 = vsel %vm220_vm1, %v466_v15, 0  ;;  %v522_v25 = vsel %vm220_vm1, %v517_v22, 0 }
  0x8e   : > { %834 = vmatpush3.bf16.msra.mxu1 %v471_v16 }
  0x8f   : > { %845 = vmatprep.subr.bf16.mxu1 %v918_v0 }
  0x90   : > { %v568_v20 = vpop.permute.xlu0 %567  ;;  %v619_v26 = vpop.permute.xlu1 %618 }
  0x91   : > { %818 = vmatmul.mubr.msk.bf16.vlgmr.msra.gmra.mrb[4].mxu0 %vm216_vm2, %v768_v17  ;;  %836 = vmatmul.mubr.msk.bf16.vlgmr.msra.gmra.mrb[8].mxu1 %vm216_vm2, %v774_v18  ;;  %v573_v21 = vsel %vm220_vm1, %v568_v20, 0  ;;  %v624_v28 = vsel %vm220_vm1, %v619_v26, 0 }
  0x92   : > { %828 = vmatpush3.bf16.msra.mxu0 %v420_v19  ;;  %829 = vmatprep.mubr.msk.bf16.mxu0 %vm919_vm0, %v918_v0 }
  0x93   : > { %839 = vmatprep.subr.bf16.mxu0 %v918_v0  ;;  %846 = vmatpush3.bf16.msra.mxu1 %v573_v21 }
  0x94   : > { %847 = vmatprep.mubr.msk.bf16.mxu1 %vm919_vm0, %v918_v0 }
  0x99   : > { %830 = vmatmul.mubr.msk.bf16.vlgmr.msra.gmra.mrb[8].mxu0 %vm216_vm2, %v772_v23  ;;  %848 = vmatmul.mubr.msk.bf16.vlgmr.msra.gmra.mrb[12].mxu1 %vm216_vm2, %v778_v24 }
  0x9a   : > { %840 = vmatpush3.bf16.msra.mxu0 %v522_v25  ;;  %841 = vmatprep.mubr.msk.bf16.mxu0 %vm919_vm0, %v918_v0 }
  0x9b   : > { %851 = vmatprep.subr.bf16.mxu0 %v918_v0 }
  0xa1   : > { %842 = vmatmul.mubr.msk.bf16.vlgmr.msra.gmra.mrb[12].mxu0 %vm216_vm2, %v776_v27  ;;  %v671_v6 = vpop.permute.xlu0 %670 }
  0xa2   : > { %852 = vmatpush3.bf16.msra.mxu0 %v624_v28  ;;  %853 = vmatprep.mubr.msk.bf16.mxu0 %vm919_vm0, %v918_v0 }
  0xa9   : > { %854 = vmatmul.mubr.msk.bf16.vlgmr.msra.gmra.mrb[16].mxu0 %vm216_vm2, %v780_v29 }
  0xea   : > { %v304_v30 = vpop.f32.mrb[0].mxu1 }
  0xeb   : > { %v813_v31 = vpop.f32.mrb[1].mxu1 }
  0xec   : > { %v307_v32 = vpop.f32.mrb[2].mxu1 }
  0xed   : > { %v814_v33 = vpop.f32.mrb[3].mxu1 }
 0x15c   : > { %v258_v34 = vpop.f32.mrb[0].mxu0  ;;  %v405_v35 = vpop.f32.mrb[4].mxu1 }
 0x15d   : > { %v807_v36 = vpop.f32.mrb[1].mxu0  ;;  %v305_v37 = vadd.f32 %v304_v30, %v258_v34  ;;  %v825_v38 = vpop.f32.mrb[5].mxu1 }
 0x15e   : > { %v261_v39 = vpop.f32.mrb[2].mxu0  ;;  %v408_v40 = vpop.f32.mrb[6].mxu1 }
 0x15f   : > { %v808_v41 = vpop.f32.mrb[3].mxu0  ;;  %v826_v42 = vpop.f32.mrb[7].mxu1 }
 0x164   : > { %v354_v43 = vpop.f32.mrb[4].mxu0  ;;  %v507_v44 = vpop.f32.mrb[8].mxu1 }
 0x165   : > { %v360_v45 = vadd.f32 %v354_v43, %v305_v37  ;;  %v819_v46 = vpop.f32.mrb[5].mxu0  ;;  %v837_v47 = vpop.f32.mrb[9].mxu1 }
 0x166   : > { %v357_v48 = vpop.f32.mrb[6].mxu0  ;;  %v510_v49 = vpop.f32.mrb[10].mxu1 }
 0x167   : > { %v411_v50 = vadd.f32 %v405_v35, %v360_v45  ;;  %v820_v51 = vpop.f32.mrb[7].mxu0  ;;  %v838_v52 = vpop.f32.mrb[11].mxu1 }
 0x16c   : > { %v456_v53 = vpop.f32.mrb[8].mxu0  ;;  %v609_v54 = vpop.f32.mrb[12].mxu1 }
 0x16d   : > { %v462_v55 = vadd.f32 %v456_v53, %v411_v50  ;;  %v831_v56 = vpop.f32.mrb[9].mxu0  ;;  %v849_v57 = vpop.f32.mrb[13].mxu1 }
 0x16e   : > { %v459_v58 = vpop.f32.mrb[10].mxu0  ;;  %v612_v59 = vpop.f32.mrb[14].mxu1 }
 0x16f   : > { %v513_v60 = vadd.f32 %v507_v44, %v462_v55  ;;  %v832_v61 = vpop.f32.mrb[11].mxu0  ;;  %v850_v62 = vpop.f32.mrb[15].mxu1 }
 0x174   : > { %v558_v63 = vpop.f32.mrb[12].mxu0 }
 0x175   : > { %v564_v0 = vadd.f32 %v558_v63, %v513_v60  ;;  %v843_v1 = vpop.f32.mrb[13].mxu0 }
 0x176   : > { %v561_v2 = vpop.f32.mrb[14].mxu0 }
 0x177   : > { %v615_v3 = vadd.f32 %v609_v54, %v564_v0  ;;  %v844_v4 = vpop.f32.mrb[15].mxu0 }
 0x17c   : > { %v660_v5 = vpop.f32.mrb[16].mxu0 }
 0x17d   : > { %v666_v7 = vadd.f32 %v660_v5, %v615_v3  ;;  %v855_v8 = vpop.f32.mrb[17].mxu0 }
 0x17e   : > { %v663_v9 = vpop.f32.mrb[18].mxu0 }
 0x17f   : > { %v673_v10 = vadd.f32 %v671_v6, %v666_v7  ;;  %v856_v11 = vpop.f32.mrb[19].mxu0 }
 0x181   : > { %675 = vst.msk [vmem:[%s202_s28] sm:$0xf] %vm674_vm3, %v673_v10 }
 0x182 PF: > { %s13_s14 = sadd.s32 1, %s916_s14   ;;  %s1065_s12 = smov %s912_s13 }
 0x183   : > { %p10_p5 = scmp.ge.s32.totalorder %s13_s14, 4   ;;  %s1066_s13 = smov %s1068_s15 }
 0x185   :  { %12 = sbr.rel (!%p10_p5) target bundleno = 2 (0x2), region = 70 }

// kernel: cliquenet_forward.21
= control target key start
LH: loop header
LB: loop body
LE: loop exit
PB: predicated region body
PF: predicated region fallthrough
CT: control target
= control target key end

     0   :  { %s1130_s12 = smov 0   ;;  %s1132_s13 = smov 0   ;;  %s1245_s0 = inlined_call_operand.vmem [shape: bf16[2,1,4,128], index: 0, kind: input, shape index: {}]   ;;  %s1246_s1 = inlined_call_operand.vmem [shape: bf16[9,16,4], index: 1, kind: input, shape index: {}]   ;;  %s1247_s2 = inlined_call_operand.vmem [shape: f32[16,1], index: 2, kind: input, shape index: {}]   ;;  %s1248_s3 = inlined_call_operand.vmem [shape: f32[2,1,16,80], index: 3, kind: output, shape index: {}]  }
   0x1   :  { %s1134_s14 = smov 0  }
   0x2 LB: > { %s25_s15 = sadd.s32 1, %s1092_s13  ;;  %p907_p0 = scmp.ge.s32.totalorder %s1096_s14, 1  ;;  %s1096_s14 = sphi %s1134_s14, %s13_s14   ;;  %s1092_s13 = sphi %s1132_s13, %s1250_s13   ;;  %s1088_s12 = sphi %s1130_s12, %s1249_s12  }
   0x3   : > { %p27_p1 = scmp.ge.s32.totalorder %s25_s15, 2  ;;  %p155_p2 = scmp.lt.s32.totalorder %s1096_s14, 3 }
   0x5   : > { %s1252_s15 = smov (%p27_p1, %s25_s15), 0  ;;  %p156_p3 = pnand %p907_p0, %p155_p2 }
   0x6   : > { %p185_p4 = scmp.lt.s32.totalorder (!%p156_p3), %s1088_s12, 1  ;;  %v217_v0 = vlaneseq (!%p156_p3)  ;;  %v1098_v1 = vmov (!%p156_p3), 1983009808   ;;  %v1099_v3 = vmov (!%p156_p3), 0.0   ;;  %vm1100_vm0 = vmmov (!%p156_p3), 0   ;;  %s1101_s20 = smov (!%p156_p3), 118  }
   0x7   : > { %159 = sbr.rel (%p156_p3) target bundleno = 390 (0x186), region = 32  ;;  %v215_v2 = vunpack.c.l.s4 (!%p156_p3), %v1098_v1  ;;  %973 = vmatprep.subr.bf16.mxu0 (!%p156_p3), %v1099_v3  ;;  %979 = vmatprep.subr.bf16.mxu1 (!%p156_p3), %v1099_v3  ;;  %vm227_vm1 = vcmask (!%p156_p3), 1041408   ;;  %v1066_v11 = vld [vmem:[%s1246_s1] sm:$0xff] (!%p156_p3)   ;;  %vm223_vm2 = vcmask (!%p156_p3), 31744   ;;  %s1102_s23 = smov (!%p156_p3), 127   ;;  %v801_v13 = vld [vmem:[%s1247_s2 + $0x8] sm:$0xff] (!%p156_p3) }
   0x8   : > { %v218_v4 = vshrl.u32 (!%p156_p3), %v217_v0, 7  ;;  %975 = vmatprep.mubr.msk.bf16.mxu0 (!%p156_p3), %vm1100_vm0, %v1099_v3  ;;  %981 = vmatprep.mubr.msk.bf16.mxu1 (!%p156_p3), %vm1100_vm0, %v1099_v3  ;;  %s1103_s24 = smov (!%p156_p3), 117   ;;  %s1104_s25 = smov (!%p156_p3), 126   ;;  %v800_v12 = vld [vmem:[%s1247_s2] sm:$0xff] (!%p156_p3)  ;;  %v1109_v14 = vmov (!%p156_p3), 0   ;;  %v1068_v17 = vld [vmem:[%s1246_s1 + $0x18] sm:$0xff] (!%p156_p3)  }
   0x9   : > { %v216_v5 = vunpack.c.0.s8 (!%p156_p3), %v215_v2  ;;  %s1105_s26 = smov (!%p156_p3), 108   ;;  %s1106_s27 = smov (!%p156_p3), 116   ;;  %1063 = vset.pattern.permute.xlu0 (!%p156_p3), %v1109_v14  ;;  %1064 = vset.pattern.permute.xlu1 (!%p156_p3), %v1109_v14  ;;  %v1065_v20 = vld [vmem:[%s1246_s1 + $0x8] sm:$0xff] (!%p156_p3)   ;;  %v1067_v25 = vld [vmem:[%s1246_s1 + $0x10] sm:$0xff] (!%p156_p3)   ;;  %v1069_v32 = vld [vmem:[%s1246_s1 + $0x20] sm:$0xff] (!%p156_p3)   ;;  %vm814_vm3 = vcmask (!%p156_p3), 654336  }
   0xa   : > { %s1107_s28 = smov (!%p156_p3), 106   ;;  %s1108_s29 = smov (!%p156_p3), 107   ;;  %v1070_v27 = vld [vmem:[%s1246_s1 + $0x28] sm:$0xff] (!%p156_p3)   ;;  %v1072_v33 = vld [vmem:[%s1246_s1 + $0x38] sm:$0xff] (!%p156_p3)   ;;  %v1071_v36 = vld [vmem:[%s1246_s1 + $0x30] sm:$0xff] (!%p156_p3)  }
   0xb   : > { %v219_v6 = vsub.s32 (!%p156_p3), %v216_v5, %v218_v4  ;;  %v1073_v38 = vld [vmem:[%s1246_s1 + $0x40] sm:$0xff] (!%p156_p3)  }
   0xe   : > { %s1254_s12 = smov (!%p185_p4, %s1088_s12), 1 }
   0xf   : > { %s908_s16 = sshll.u32 %s1254_s12, 1 }
  0x10   : > { %s191_s19 = scalar_lea.vmem %s1245_s0, %s908_s16 }
  0x11   : > { %v202_v7 = vld [vmem:[%s191_s19] sm:$0x3] }
  0x12   : > { %v920_v8 = vld.sshfl [vmem:[%s191_s19] sm:$0x3 pattern:$0x76325410]  ;;  %v220_v9 = vrot.slane %v202_v7, %v219_v6  ;;  %v281_v10 = vsel %vm227_vm1, %v202_v7, 0 }
  0x13   : > { %409 = vrot.lane.b32.xlu1 %v920_v8, %s1101_s20  ;;  %980 = vmatpush3.bf16.msra.mxu1 %v281_v10 }
  0x14   : > { %221 = vrot.lane.b32.xlu0 %v220_v9, %s1102_s23  ;;  %991 = vmatprep.subr.bf16.mxu1 %v1099_v3 }
  0x16   : > { %982 = vmatmul.mubr.msk.bf16.vlgmr.msra.gmra.mrb[0].mxu1 %vm223_vm2, %v1066_v11 }
  0x17   : > { %477 = vrot.lane.b32.xlu1 %v920_v8, %s1103_s24  ;;  %993 = vmatprep.mubr.msk.bf16.mxu1 %vm1100_vm0, %v1099_v3 }
  0x18   : > { %341 = vrot.lane.b32.xlu0 %v920_v8, %s1104_s25 }
  0x1b   : > { %613 = vrot.lane.b32.xlu1 %v920_v8, %s1105_s26 }
  0x1c   : > { %545 = vrot.lane.b32.xlu0 %v920_v8, %s1106_s27  ;;  %s954_s27 = sshll.u32 %s1254_s12, 4 }
  0x1d   : > { %s200_s30 = scalar_lea.vmem %s1248_s3, %s954_s27 }
  0x1f   : > { %749 = vrot.lane.b32.xlu1 %v920_v8, %s1107_s28 }
  0x20   : > { %681 = vrot.lane.b32.xlu0 %v920_v8, %s1108_s29 }
  0x23   : > { %809 = vperm.xlu1 %1064, %v801_v13  }
  0x24   : > { %804 = vperm.xlu0 %1063, %v800_v12  }
  0x85   : > { %v410_v15 = vpop.permute.xlu1 %409 }
  0x86   : > { %v415_v16 = vsel %vm227_vm1, %v410_v15, 0  ;;  %v222_v18 = vpop.permute.xlu0 %221 }
  0x87   : > { %992 = vmatpush3.bf16.msra.mxu1 %v415_v16  ;;  %v229_v19 = vsel %vm227_vm1, %v222_v18, 0 }
  0x88   : > { %1003 = vmatprep.subr.bf16.mxu1 %v1099_v3  ;;  %974 = vmatpush3.bf16.msra.mxu0 %v229_v19 }
  0x89   : > { %985 = vmatprep.subr.bf16.mxu0 %v1099_v3  ;;  %v478_v23 = vpop.permute.xlu1 %477 }
  0x8a   : > { %994 = vmatmul.mubr.msk.bf16.vlgmr.msra.gmra.mrb[4].mxu1 %vm223_vm2, %v1068_v17  ;;  %v342_v21 = vpop.permute.xlu0 %341  ;;  %v483_v28 = vsel %vm227_vm1, %v478_v23, 0 }
  0x8b   : > { %1005 = vmatprep.mubr.msk.bf16.mxu1 %vm1100_vm0, %v1099_v3  ;;  %v347_v22 = vsel %vm227_vm1, %v342_v21, 0  ;;  %976 = vmatmul.mubr.msk.bf16.vlgmr.msra.gmra.mrb[0].mxu0 %vm223_vm2, %v1065_v20 }
  0x8c   : > { %986 = vmatpush3.bf16.msra.mxu0 %v347_v22  ;;  %987 = vmatprep.mubr.msk.bf16.mxu0 %vm1100_vm0, %v1099_v3 }
  0x8d   : > { %997 = vmatprep.subr.bf16.mxu0 %v1099_v3  ;;  %v614_v31 = vpop.permute.xlu1 %613 }
  0x8e   : > { %v546_v24 = vpop.permute.xlu0 %545  ;;  %v619_v34 = vsel %vm227_vm1, %v614_v31, 0 }
  0x8f   : > { %v551_v26 = vsel %vm227_vm1, %v546_v24, 0 }
  0x90   : > { %1004 = vmatpush3.bf16.msra.mxu1 %v551_v26 }
  0x91   : > { %1015 = vmatprep.subr.bf16.mxu1 %v1099_v3  ;;  %v750_v35 = vpop.permute.xlu1 %749 }
  0x92   : > { %v682_v29 = vpop.permute.xlu0 %681  ;;  %v755_v37 = vsel %vm227_vm1, %v750_v35, 0 }
  0x93   : > { %988 = vmatmul.mubr.msk.bf16.vlgmr.msra.gmra.mrb[4].mxu0 %vm223_vm2, %v1067_v25  ;;  %1006 = vmatmul.mubr.msk.bf16.vlgmr.msra.gmra.mrb[8].mxu1 %vm223_vm2, %v1070_v27  ;;  %v687_v30 = vsel %vm227_vm1, %v682_v29, 0 }
  0x94   : > { %998 = vmatpush3.bf16.msra.mxu0 %v483_v28  ;;  %999 = vmatprep.mubr.msk.bf16.mxu0 %vm1100_vm0, %v1099_v3 }
  0x95   : > { %1009 = vmatprep.subr.bf16.mxu0 %v1099_v3  ;;  %1016 = vmatpush3.bf16.msra.mxu1 %v687_v30 }
  0x96   : > { %1017 = vmatprep.mubr.msk.bf16.mxu1 %vm1100_vm0, %v1099_v3 }
  0x9b   : > { %1000 = vmatmul.mubr.msk.bf16.vlgmr.msra.gmra.mrb[8].mxu0 %vm223_vm2, %v1069_v32  ;;  %1018 = vmatmul.mubr.msk.bf16.vlgmr.msra.gmra.mrb[12].mxu1 %vm223_vm2, %v1072_v33 }
  0x9c   : > { %1010 = vmatpush3.bf16.msra.mxu0 %v619_v34  ;;  %1011 = vmatprep.mubr.msk.bf16.mxu0 %vm1100_vm0, %v1099_v3 }
  0x9d   : > { %1021 = vmatprep.subr.bf16.mxu0 %v1099_v3 }
  0xa2   : > { %v810_v26 = vpop.permute.xlu1 %809 }
  0xa3   : > { %1012 = vmatmul.mubr.msk.bf16.vlgmr.msra.gmra.mrb[12].mxu0 %vm223_vm2, %v1071_v36  ;;  %v805_v22 = vpop.permute.xlu0 %804 }
  0xa4   : > { %1022 = vmatpush3.bf16.msra.mxu0 %v755_v37  ;;  %1023 = vmatprep.mubr.msk.bf16.mxu0 %vm1100_vm0, %v1099_v3 }
  0xab   : > { %1024 = vmatmul.mubr.msk.bf16.vlgmr.msra.gmra.mrb[16].mxu0 %vm223_vm2, %v1073_v38 }
  0xe9   : > { %v317_v39 = vpop.f32.mrb[0].mxu1 }
  0xea   : > { %v983_v40 = vpop.f32.mrb[1].mxu1 }
  0xeb   : > { %v320_v41 = vpop.f32.mrb[2].mxu1 }
  0xec   : > { %v984_v42 = vpop.f32.mrb[3].mxu1 }
 0x15d   : > { %v451_v43 = vpop.f32.mrb[4].mxu1 }
 0x15e   : > { %v995_v44 = vpop.f32.mrb[5].mxu1  ;;  %v265_v45 = vpop.f32.mrb[0].mxu0 }
 0x15f   : > { %v454_v46 = vpop.f32.mrb[6].mxu1  ;;  %v318_v47 = vadd.f32 %v317_v39, %v265_v45  ;;  %v977_v48 = vpop.f32.mrb[1].mxu0 }
 0x160   : > { %v996_v49 = vpop.f32.mrb[7].mxu1  ;;  %v268_v50 = vpop.f32.mrb[2].mxu0 }
 0x161   : > { %v321_v51 = vadd.f32 %v320_v41, %v268_v50  ;;  %v978_v52 = vpop.f32.mrb[3].mxu0 }
 0x166   : > { %v383_v53 = vpop.f32.mrb[4].mxu0  ;;  %v587_v54 = vpop.f32.mrb[8].mxu1 }
 0x167   : > { %v390_v55 = vadd.f32 %v383_v53, %v318_v47  ;;  %v989_v56 = vpop.f32.mrb[5].mxu0  ;;  %v1007_v57 = vpop.f32.mrb[9].mxu1 }
 0x168   : > { %v386_v58 = vpop.f32.mrb[6].mxu0  ;;  %v590_v59 = vpop.f32.mrb[10].mxu1 }
 0x169   : > { %v391_v60 = vadd.f32 %v386_v58, %v321_v51  ;;  %v458_v61 = vadd.f32 %v451_v43, %v390_v55  ;;  %v990_v62 = vpop.f32.mrb[7].mxu0  ;;  %v1008_v63 = vpop.f32.mrb[11].mxu1 }
 0x16b   : > { %v459_v0 = vadd.f32 %v454_v46, %v391_v60 }
 0x16e   : > { %v519_v1 = vpop.f32.mrb[8].mxu0  ;;  %v723_v2 = vpop.f32.mrb[12].mxu1 }
 0x16f   : > { %v526_v3 = vadd.f32 %v519_v1, %v458_v61  ;;  %v1001_v4 = vpop.f32.mrb[9].mxu0  ;;  %v1019_v5 = vpop.f32.mrb[13].mxu1 }
 0x170   : > { %v522_v6 = vpop.f32.mrb[10].mxu0  ;;  %v726_v7 = vpop.f32.mrb[14].mxu1 }
 0x171   : > { %v527_v8 = vadd.f32 %v522_v6, %v459_v0  ;;  %v594_v9 = vadd.f32 %v587_v54, %v526_v3  ;;  %v1002_v10 = vpop.f32.mrb[11].mxu0  ;;  %v1020_v11 = vpop.f32.mrb[15].mxu1 }
 0x173   : > { %v595_v12 = vadd.f32 %v590_v59, %v527_v8 }
 0x176   : > { %v655_v13 = vpop.f32.mrb[12].mxu0 }
 0x177   : > { %v662_v14 = vadd.f32 %v655_v13, %v594_v9  ;;  %v1013_v15 = vpop.f32.mrb[13].mxu0 }
 0x178   : > { %v658_v16 = vpop.f32.mrb[14].mxu0 }
 0x179   : > { %v663_v17 = vadd.f32 %v658_v16, %v595_v12  ;;  %v730_v18 = vadd.f32 %v723_v2, %v662_v14  ;;  %v1014_v19 = vpop.f32.mrb[15].mxu0 }
 0x17b   : > { %v731_v20 = vadd.f32 %v726_v7, %v663_v17 }
 0x17e   : > { %v791_v21 = vpop.f32.mrb[16].mxu0 }
 0x17f   : > { %v798_v23 = vadd.f32 %v791_v21, %v730_v18  ;;  %v1025_v24 = vpop.f32.mrb[17].mxu0 }
 0x180   : > { %v794_v25 = vpop.f32.mrb[18].mxu0 }
 0x181   : > { %v799_v27 = vadd.f32 %v794_v25, %v731_v20  ;;  %v812_v28 = vadd.f32 %v805_v22, %v798_v23  ;;  %v1026_v29 = vpop.f32.mrb[19].mxu0 }
 0x183   : > { %815 = vst.msk [vmem:[%s200_s30] sm:$0xff] %vm814_vm3, %v812_v28  ;;  %v813_v30 = vadd.f32 %v810_v26, %v799_v27 }
 0x185   : > { %816 = vst.msk [vmem:[%s200_s30 + $0x8] sm:$0xff] %vm814_vm3, %v813_v30 }
 0x186 PF: > { %s13_s14 = sadd.s32 1, %s1096_s14   ;;  %s1249_s12 = smov %s1092_s13 }
 0x187   : > { %p10_p5 = scmp.ge.s32.totalorder %s13_s14, 4   ;;  %s1250_s13 = smov %s1252_s15 }
 0x189   :  { %12 = sbr.rel (!%p10_p5) target bundleno = 2 (0x2), region = 70 }

// kernel: cliquenet_forward.22
= control target key start
LH: loop header
LB: loop body
LE: loop exit
PB: predicated region body
PF: predicated region fallthrough
CT: control target
= control target key end

     0   :  { %s1049_s15 = smov 0   ;;  %s1051_s16 = smov 0   ;;  %s1164_s0 = inlined_call_operand.vmem [shape: bf16[2,1,4,128], index: 0, kind: input, shape index: {}]   ;;  %s1165_s1 = inlined_call_operand.vmem [shape: bf16[9,4,4], index: 1, kind: input, shape index: {}]   ;;  %s1166_s2 = inlined_call_operand.vmem [shape: f32[4,1], index: 2, kind: input, shape index: {}]   ;;  %s1167_s3 = inlined_call_operand.vmem [shape: f32[4,1], index: 3, kind: input, shape index: {}]   ;;  %s1168_s4 = inlined_call_operand.vmem [shape: f32[2,1,4,80], index: 4, kind: output, shape index: {}]  }
   0x1   :  { %s1053_s17 = smov 0  }
   0x2 LB: > { %s26_s18 = sadd.s32 1, %s1006_s16  ;;  %p849_p0 = scmp.ge.s32.totalorder %s1010_s17, 1  ;;  %s1010_s17 = sphi %s1053_s17, %s14_s17   ;;  %s1006_s16 = sphi %s1051_s16, %s1170_s16   ;;  %s1002_s15 = sphi %s1049_s15, %s1169_s15  }
   0x3   : > { %p28_p1 = scmp.ge.s32.totalorder %s26_s18, 2  ;;  %p180_p2 = scmp.lt.s32.totalorder %s1010_s17, 3 }
   0x5   : > { %s1172_s18 = smov (%p28_p1, %s26_s18), 0  ;;  %p181_p3 = pnand %p849_p0, %p180_p2 }
   0x6   : > { %p210_p4 = scmp.lt.s32.totalorder (!%p181_p3), %s1002_s15, 1  ;;  %v233_v0 = vlaneseq (!%p181_p3)  ;;  %v1012_v1 = vmov (!%p181_p3), 1983009808   ;;  %v1013_v3 = vmov (!%p181_p3), 0.0   ;;  %vm1014_vm0 = vmmov (!%p181_p3), 0   ;;  %s1015_s23 = smov (!%p181_p3), 118  }
   0x7   : > { %184 = sbr.rel (%p181_p3) target bundleno = 391 (0x187), region = 36  ;;  %v231_v2 = vunpack.c.l.s4 (!%p181_p3), %v1012_v1  ;;  %896 = vmatprep.subr.bf16.mxu0 (!%p181_p3), %v1013_v3  ;;  %902 = vmatprep.subr.bf16.mxu1 (!%p181_p3), %v1013_v3  ;;  %vm243_vm1 = vcmask (!%p181_p3), 1041408   ;;  %vm239_vm2 = vcmask (!%p181_p3), 31744   ;;  %v226_v11 = vld [vmem:[%s1165_s1] sm:$0x3] (!%p181_p3)  ;;  %s1016_s26 = smov (!%p181_p3), 127  }
   0x8   : > { %v234_v4 = vshrl.u32 (!%p181_p3), %v233_v0, 7  ;;  %898 = vmatprep.mubr.msk.bf16.mxu0 (!%p181_p3), %vm1014_vm0, %v1013_v3  ;;  %904 = vmatprep.mubr.msk.bf16.mxu1 (!%p181_p3), %vm1014_vm0, %v1013_v3  ;;  %s1017_s27 = smov (!%p181_p3), 117   ;;  %s1018_s28 = smov (!%p181_p3), 126   ;;  %v753_v12 = vld [vmem:[%s1166_s2] sm:$0xf] (!%p181_p3)  ;;  %v1023_v14 = vmov (!%p181_p3), 0  }
   0x9   : > { %v232_v5 = vunpack.c.0.s8 (!%p181_p3), %v231_v2  ;;  %s1019_s29 = smov (!%p181_p3), 108   ;;  %s1020_s30 = smov (!%p181_p3), 116   ;;  %v761_v13 = vld [vmem:[%s1167_s3] sm:$0xf] (!%p181_p3)  ;;  %986 = vset.pattern.permute.xlu0 (!%p181_p3), %v1023_v14  ;;  %987 = vset.pattern.permute.xlu1 (!%p181_p3), %v1023_v14  ;;  %v858_v18 = vld [vmem:[%s1165_s1 + $0x6] sm:$0x3] (!%p181_p3) }
   0xa   : > { %s1021_s5 = smov (!%p181_p3), 106   ;;  %s1022_s6 = smov (!%p181_p3), 107   ;;  %v852_v20 = vld [vmem:[%s1165_s1 + $0x2] sm:$0x3] (!%p181_p3)  ;;  %v855_v26 = vld [vmem:[%s1165_s1 + $0x4] sm:$0x3] (!%p181_p3) }
   0xb   : > { %v235_v6 = vsub.s32 (!%p181_p3), %v232_v5, %v234_v4  ;;  %v864_v27 = vld [vmem:[%s1165_s1 + $0xa] sm:$0x3] (!%p181_p3)  ;;  %v861_v32 = vld [vmem:[%s1165_s1 + $0x8] sm:$0x3] (!%p181_p3)  ;;  %v870_v33 = vld [vmem:[%s1165_s1 + $0xe] sm:$0x3] (!%p181_p3) }
   0xc   : > { %v867_v36 = vld [vmem:[%s1165_s1 + $0xc] sm:$0x3] (!%p181_p3)  ;;  %v873_v38 = vld [vmem:[%s1165_s1 + $0x10] sm:$0x3] (!%p181_p3)  ;;  %vm769_vm4 = vcmask (!%p181_p3), 650240  }
   0xe   : > { %s1174_s15 = smov (!%p210_p4, %s1002_s15), 1 }
   0xf   : > { %s850_s19 = sshll.u32 %s1174_s15, 1 }
  0x10   : > { %s216_s22 = scalar_lea.vmem %s1164_s0, %s850_s19 }
  0x11   : > { %v225_v7 = vld [vmem:[%s216_s22] sm:$0x3] }
  0x12   : > { %v856_v8 = vld.sshfl [vmem:[%s216_s22] sm:$0x3 pattern:$0x76325410]  ;;  %v236_v9 = vrot.slane %v225_v7, %v235_v6  ;;  %v291_v10 = vsel %vm243_vm1, %v225_v7, 0 }
  0x13   : > { %404 = vrot.lane.b32.xlu1 %v856_v8, %s1015_s23  ;;  %903 = vmatpush3.bf16.msra.mxu1 %v291_v10 }
  0x14   : > { %237 = vrot.lane.b32.xlu0 %v236_v9, %s1016_s26  ;;  %914 = vmatprep.subr.bf16.mxu1 %v1013_v3 }
  0x16   : > { %905 = vmatmul.mubr.msk.bf16.vlgmr.msra.gmra.mrb[0].mxu1 %vm239_vm2, %v226_v11 }
  0x17   : > { %464 = vrot.lane.b32.xlu1 %v856_v8, %s1017_s27  ;;  %916 = vmatprep.mubr.msk.bf16.mxu1 %vm1014_vm0, %v1013_v3 }
  0x18   : > { %344 = vrot.lane.b32.xlu0 %v856_v8, %s1018_s28 }
  0x1b   : > { %584 = vrot.lane.b32.xlu1 %v856_v8, %s1019_s29 }
  0x1c   : > { %524 = vrot.lane.b32.xlu0 %v856_v8, %s1020_s30 }
  0x1f   : > { %704 = vrot.lane.b32.xlu1 %v856_v8, %s1021_s5  ;;  %s851_s5 = sshll.u32 %s1174_s15, 2 }
  0x20   : > { %644 = vrot.lane.b32.xlu0 %v856_v8, %s1022_s6  ;;  %s223_s8 = scalar_lea.vmem %s1168_s4, %s851_s5 }
  0x23   : > { %764 = vperm.xlu1 %987, %v761_v13  }
  0x24   : > { %756 = vperm.xlu0 %986, %v753_v12  }
  0x85   : > { %v405_v15 = vpop.permute.xlu1 %404 }
  0x86   : > { %v410_v16 = vsel %vm243_vm1, %v405_v15, 0  ;;  %v238_v17 = vpop.permute.xlu0 %237 }
  0x87   : > { %915 = vmatpush3.bf16.msra.mxu1 %v410_v16  ;;  %v245_v19 = vsel %vm243_vm1, %v238_v17, 0 }
  0x88   : > { %926 = vmatprep.subr.bf16.mxu1 %v1013_v3  ;;  %897 = vmatpush3.bf16.msra.mxu0 %v245_v19 }
  0x89   : > { %908 = vmatprep.subr.bf16.mxu0 %v1013_v3  ;;  %v465_v23 = vpop.permute.xlu1 %464 }
  0x8a   : > { %917 = vmatmul.mubr.msk.bf16.vlgmr.msra.gmra.mrb[4].mxu1 %vm239_vm2, %v858_v18  ;;  %v345_v21 = vpop.permute.xlu0 %344  ;;  %v470_v28 = vsel %vm243_vm1, %v465_v23, 0 }
  0x8b   : > { %928 = vmatprep.mubr.msk.bf16.mxu1 %vm1014_vm0, %v1013_v3  ;;  %v350_v22 = vsel %vm243_vm1, %v345_v21, 0  ;;  %899 = vmatmul.mubr.msk.bf16.vlgmr.msra.gmra.mrb[0].mxu0 %vm239_vm2, %v852_v20 }
  0x8c   : > { %909 = vmatpush3.bf16.msra.mxu0 %v350_v22  ;;  %910 = vmatprep.mubr.msk.bf16.mxu0 %vm1014_vm0, %v1013_v3 }
  0x8d   : > { %920 = vmatprep.subr.bf16.mxu0 %v1013_v3  ;;  %v585_v31 = vpop.permute.xlu1 %584 }
  0x8e   : > { %v525_v24 = vpop.permute.xlu0 %524  ;;  %v590_v34 = vsel %vm243_vm1, %v585_v31, 0 }
  0x8f   : > { %v530_v25 = vsel %vm243_vm1, %v525_v24, 0 }
  0x90   : > { %927 = vmatpush3.bf16.msra.mxu1 %v530_v25 }
  0x91   : > { %938 = vmatprep.subr.bf16.mxu1 %v1013_v3  ;;  %v705_v35 = vpop.permute.xlu1 %704 }
  0x92   : > { %v645_v29 = vpop.permute.xlu0 %644  ;;  %v710_v37 = vsel %vm243_vm1, %v705_v35, 0 }
  0x93   : > { %911 = vmatmul.mubr.msk.bf16.vlgmr.msra.gmra.mrb[4].mxu0 %vm239_vm2, %v855_v26  ;;  %929 = vmatmul.mubr.msk.bf16.vlgmr.msra.gmra.mrb[8].mxu1 %vm239_vm2, %v864_v27  ;;  %v650_v30 = vsel %vm243_vm1, %v645_v29, 0 }
  0x94   : > { %921 = vmatpush3.bf16.msra.mxu0 %v470_v28  ;;  %922 = vmatprep.mubr.msk.bf16.mxu0 %vm1014_vm0, %v1013_v3 }
  0x95   : > { %932 = vmatprep.subr.bf16.mxu0 %v1013_v3  ;;  %939 = vmatpush3.bf16.msra.mxu1 %v650_v30 }
  0x96   : > { %940 = vmatprep.mubr.msk.bf16.mxu1 %vm1014_vm0, %v1013_v3 }
  0x9b   : > { %923 = vmatmul.mubr.msk.bf16.vlgmr.msra.gmra.mrb[8].mxu0 %vm239_vm2, %v861_v32  ;;  %941 = vmatmul.mubr.msk.bf16.vlgmr.msra.gmra.mrb[12].mxu1 %vm239_vm2, %v870_v33 }
  0x9c   : > { %933 = vmatpush3.bf16.msra.mxu0 %v590_v34  ;;  %934 = vmatprep.mubr.msk.bf16.mxu0 %vm1014_vm0, %v1013_v3 }
  0x9d   : > { %944 = vmatprep.subr.bf16.mxu0 %v1013_v3 }
  0xa2   : > { %v765_v19 = vpop.permute.xlu1 %764 }
  0xa3   : > { %935 = vmatmul.mubr.msk.bf16.vlgmr.msra.gmra.mrb[12].mxu0 %vm239_vm2, %v867_v36  ;;  %v757_v15 = vpop.permute.xlu0 %756 }
  0xa4   : > { %945 = vmatpush3.bf16.msra.mxu0 %v710_v37  ;;  %946 = vmatprep.mubr.msk.bf16.mxu0 %vm1014_vm0, %v1013_v3 }
  0xab   : > { %947 = vmatmul.mubr.msk.bf16.vlgmr.msra.gmra.mrb[16].mxu0 %vm239_vm2, %v873_v38 }
  0xe9   : > { %v327_v39 = vpop.f32.mrb[0].mxu1 }
  0xea   : > { %v906_v40 = vpop.f32.mrb[1].mxu1 }
  0xeb   : > { %v330_v41 = vpop.f32.mrb[2].mxu1 }
  0xec   : > { %v907_v42 = vpop.f32.mrb[3].mxu1 }
 0x15d   : > { %v446_v43 = vpop.f32.mrb[4].mxu1 }
 0x15e   : > { %v918_v44 = vpop.f32.mrb[5].mxu1  ;;  %v281_v45 = vpop.f32.mrb[0].mxu0 }
 0x15f   : > { %v449_v46 = vpop.f32.mrb[6].mxu1  ;;  %v900_v47 = vpop.f32.mrb[1].mxu0  ;;  %v328_v48 = vadd.f32 %v327_v39, %v281_v45 }
 0x160   : > { %v919_v49 = vpop.f32.mrb[7].mxu1  ;;  %v284_v50 = vpop.f32.mrb[2].mxu0 }
 0x161   : > { %v901_v51 = vpop.f32.mrb[3].mxu0 }
 0x166   : > { %v386_v52 = vpop.f32.mrb[4].mxu0  ;;  %v566_v53 = vpop.f32.mrb[8].mxu1 }
 0x167   : > { %v392_v54 = vadd.f32 %v386_v52, %v328_v48  ;;  %v912_v55 = vpop.f32.mrb[5].mxu0  ;;  %v930_v56 = vpop.f32.mrb[9].mxu1 }
 0x168   : > { %v389_v57 = vpop.f32.mrb[6].mxu0  ;;  %v569_v58 = vpop.f32.mrb[10].mxu1 }
 0x169   : > { %v452_v59 = vadd.f32 %v446_v43, %v392_v54  ;;  %v913_v60 = vpop.f32.mrb[7].mxu0  ;;  %v931_v61 = vpop.f32.mrb[11].mxu1 }
 0x16e   : > { %v506_v62 = vpop.f32.mrb[8].mxu0  ;;  %v686_v63 = vpop.f32.mrb[12].mxu1 }
 0x16f   : > { %v512_v0 = vadd.f32 %v506_v62, %v452_v59  ;;  %v924_v1 = vpop.f32.mrb[9].mxu0  ;;  %v942_v2 = vpop.f32.mrb[13].mxu1 }
 0x170   : > { %v509_v3 = vpop.f32.mrb[10].mxu0  ;;  %v689_v4 = vpop.f32.mrb[14].mxu1 }
 0x171   : > { %v572_v5 = vadd.f32 %v566_v53, %v512_v0  ;;  %v925_v6 = vpop.f32.mrb[11].mxu0  ;;  %v943_v7 = vpop.f32.mrb[15].mxu1 }
 0x176   : > { %v626_v8 = vpop.f32.mrb[12].mxu0 }
 0x177   : > { %v632_v9 = vadd.f32 %v626_v8, %v572_v5  ;;  %v936_v10 = vpop.f32.mrb[13].mxu0 }
 0x178   : > { %v629_v11 = vpop.f32.mrb[14].mxu0 }
 0x179   : > { %v692_v12 = vadd.f32 %v686_v63, %v632_v9  ;;  %v937_v13 = vpop.f32.mrb[15].mxu0 }
 0x17e   : > { %v746_v14 = vpop.f32.mrb[16].mxu0 }
 0x17f   : > { %v752_v16 = vadd.f32 %v746_v14, %v692_v12  ;;  %v948_v17 = vpop.f32.mrb[17].mxu0 }
 0x180   : > { %v749_v18 = vpop.f32.mrb[18].mxu0 }
 0x181   : > { %v759_v20 = vadd.f32 %v757_v15, %v752_v16  ;;  %v949_v21 = vpop.f32.mrb[19].mxu0 }
 0x183   : > { %vm760_vm3 = vcmp.ge.f32.partialorder %v759_v20, 0.0  ;;  %v767_v22 = vmul.f32 %v765_v19, %v759_v20 }
 0x185   : > { %v768_v23 = vsel %vm760_vm3, %v759_v20, %v767_v22 }
 0x186   : > { %770 = vst.msk [vmem:[%s223_s8] sm:$0xf] %vm769_vm4, %v768_v23 }
 0x187 PF: > { %s14_s17 = sadd.s32 1, %s1010_s17   ;;  %s1169_s15 = smov %s1006_s16 }
 0x188   : > { %p11_p5 = scmp.ge.s32.totalorder %s14_s17, 4   ;;  %s1170_s16 = smov %s1172_s18 }
 0x18a   :  { %13 = sbr.rel (!%p11_p5) target bundleno = 2 (0x2), region = 74 }

// kernel: cliquenet_forward.24
= control target key start
LH: loop header
LB: loop body
LE: loop exit
PB: predicated region body
PF: predicated region fallthrough
CT: control target
= control target key end

     0   :  { %s974_s15 = smov 0   ;;  %s976_s16 = smov 0   ;;  %s1092_s0 = inlined_call_operand.vmem [shape: bf16[2,1,8,128], index: 0, kind: input, shape index: {}]   ;;  %s1093_s1 = inlined_call_operand.vmem [shape: bf16[9,4,8], index: 1, kind: input, shape index: {}]   ;;  %s1094_s2 = inlined_call_operand.vmem [shape: f32[4,1], index: 2, kind: input, shape index: {}]   ;;  %s1095_s3 = inlined_call_operand.vmem [shape: f32[4,1], index: 3, kind: input, shape index: {}]   ;;  %s1096_s4 = inlined_call_operand.vmem [shape: f32[2,1,4,80], index: 4, kind: output, shape index: {}]  }
   0x1   :  { %s978_s17 = smov 0  }
   0x2 LB: > { %s26_s18 = sadd.s32 1, %s932_s16  ;;  %p781_p0 = scmp.ge.s32.totalorder %s936_s17, 1  ;;  %s936_s17 = sphi %s978_s17, %s14_s17   ;;  %s932_s16 = sphi %s976_s16, %s1098_s16   ;;  %s928_s15 = sphi %s974_s15, %s1097_s15  }
   0x3   : > { %p28_p1 = scmp.ge.s32.totalorder %s26_s18, 2  ;;  %p180_p2 = scmp.lt.s32.totalorder %s936_s17, 3 }
   0x5   : > { %s1100_s18 = smov (%p28_p1, %s26_s18), 0  ;;  %p181_p3 = pnand %p781_p0, %p180_p2 }
   0x6   : > { %p210_p4 = scmp.lt.s32.totalorder (!%p181_p3), %s928_s15, 1  ;;  %v938_v0 = vmov (!%p181_p3), 0.0   ;;  %vm939_vm0 = vmmov (!%p181_p3), 0   ;;  %vm238_vm1 = vcmask (!%p181_p3), 1043456   ;;  %vm234_vm2 = vcmask (!%p181_p3), 64512   ;;  %s940_s25 = smov (!%p181_p3), 127  }
   0x7   : > { %184 = sbr.rel (%p181_p3) target bundleno = 391 (0x187), region = 36  ;;  %822 = vmatprep.subr.bf16.mxu0 (!%p181_p3), %v938_v0  ;;  %828 = vmatprep.subr.bf16.mxu1 (!%p181_p3), %v938_v0  ;;  %v226_v4 = vld [vmem:[%s1093_s1] sm:$0x3] (!%p181_p3)  ;;  %s941_s26 = smov (!%p181_p3), 118   ;;  %v948_v7 = vmov (!%p181_p3), 0   ;;  %vm701_vm4 = vcmask (!%p181_p3), 650240  }
   0x8   : > { %824 = vmatprep.mubr.msk.bf16.mxu0 (!%p181_p3), %vm939_vm0, %v938_v0  ;;  %830 = vmatprep.mubr.msk.bf16.mxu1 (!%p181_p3), %vm939_vm0, %v938_v0  ;;  %s942_s27 = smov (!%p181_p3), 126   ;;  %s943_s28 = smov (!%p181_p3), 117   ;;  %v685_v5 = vld [vmem:[%s1094_s2] sm:$0xf] (!%p181_p3)  ;;  %v790_v13 = vld [vmem:[%s1093_s1 + $0x6] sm:$0x3] (!%p181_p3) }
   0x9   : > { %s944_s29 = smov (!%p181_p3), 116   ;;  %s945_s30 = smov (!%p181_p3), 108   ;;  %v693_v6 = vld [vmem:[%s1095_s3] sm:$0xf] (!%p181_p3)  ;;  %911 = vset.pattern.permute.xlu0 (!%p181_p3), %v948_v7  ;;  %912 = vset.pattern.permute.xlu1 (!%p181_p3), %v948_v7  ;;  %v788_v19 = vld [vmem:[%s1093_s1 + $0x4] sm:$0x3] (!%p181_p3) }
   0xa   : > { %s946_s5 = smov (!%p181_p3), 107   ;;  %s947_s6 = smov (!%p181_p3), 106   ;;  %v784_v12 = vld [vmem:[%s1093_s1 + $0x2] sm:$0x3] (!%p181_p3)  ;;  %v794_v20 = vld [vmem:[%s1093_s1 + $0xa] sm:$0x3] (!%p181_p3) }
   0xb   : > { %v792_v25 = vld [vmem:[%s1093_s1 + $0x8] sm:$0x3] (!%p181_p3)  ;;  %v798_v26 = vld [vmem:[%s1093_s1 + $0xe] sm:$0x3] (!%p181_p3)  ;;  %v796_v29 = vld [vmem:[%s1093_s1 + $0xc] sm:$0x3] (!%p181_p3) }
   0xc   : > { %v800_v31 = vld [vmem:[%s1093_s1 + $0x10] sm:$0x3] (!%p181_p3) }
   0xe   : > { %s1102_s15 = smov (!%p210_p4, %s928_s15), 1 }
   0xf   : > { %s782_s19 = sshll.u32 %s1102_s15, 2 }
  0x10   : > { %s216_s22 = scalar_lea.vmem %s1092_s0, %s782_s19  ;;  %s223_s8 = scalar_lea.vmem %s1096_s4, %s782_s19 }
  0x11   : > { %v225_v1 = vld [vmem:[%s216_s22] sm:$0xf] }
  0x12   : > { %v785_v2 = vcombine.low %v225_v1, %v225_v1  ;;  %v286_v3 = vsel %vm238_vm1, %v225_v1, 0 }
  0x13   : > { %829 = vmatpush3.bf16.msra.mxu1 %v286_v3 }
  0x14   : > { %232 = vrot.lane.b32.xlu0 %v785_v2, %s940_s25  ;;  %381 = vrot.lane.b32.xlu1 %v785_v2, %s941_s26 }
  0x15   : > { %840 = vmatprep.subr.bf16.mxu1 %v938_v0 }
  0x16   : > { %831 = vmatmul.mubr.msk.bf16.vlgmr.msra.gmra.mrb[0].mxu1 %vm234_vm2, %v226_v4 }
  0x17   : > { %842 = vmatprep.mubr.msk.bf16.mxu1 %vm939_vm0, %v938_v0 }
  0x18   : > { %330 = vrot.lane.b32.xlu0 %v785_v2, %s942_s27  ;;  %432 = vrot.lane.b32.xlu1 %v785_v2, %s943_s28 }
  0x1c   : > { %483 = vrot.lane.b32.xlu0 %v785_v2, %s944_s29  ;;  %534 = vrot.lane.b32.xlu1 %v785_v2, %s945_s30 }
  0x20   : > { %585 = vrot.lane.b32.xlu0 %v785_v2, %s946_s5  ;;  %636 = vrot.lane.b32.xlu1 %v785_v2, %s947_s6 }
  0x24   : > { %688 = vperm.xlu0 %911, %v685_v5   ;;  %696 = vperm.xlu1 %912, %v693_v6  }
  0x86   : > { %v233_v8 = vpop.permute.xlu0 %232  ;;  %v382_v9 = vpop.permute.xlu1 %381 }
  0x87   : > { %v240_v10 = vsel %vm238_vm1, %v233_v8, 0  ;;  %v387_v11 = vsel %vm238_vm1, %v382_v9, 0 }
  0x88   : > { %823 = vmatpush3.bf16.msra.mxu0 %v240_v10  ;;  %841 = vmatpush3.bf16.msra.mxu1 %v387_v11 }
  0x89   : > { %834 = vmatprep.subr.bf16.mxu0 %v938_v0  ;;  %852 = vmatprep.subr.bf16.mxu1 %v938_v0 }
  0x8a   : > { %v331_v14 = vpop.permute.xlu0 %330  ;;  %v433_v16 = vpop.permute.xlu1 %432 }
  0x8b   : > { %v336_v15 = vsel %vm238_vm1, %v331_v14, 0  ;;  %825 = vmatmul.mubr.msk.bf16.vlgmr.msra.gmra.mrb[0].mxu0 %vm234_vm2, %v784_v12  ;;  %843 = vmatmul.mubr.msk.bf16.vlgmr.msra.gmra.mrb[4].mxu1 %vm234_vm2, %v790_v13  ;;  %v438_v21 = vsel %vm238_vm1, %v433_v16, 0 }
  0x8c   : > { %835 = vmatpush3.bf16.msra.mxu0 %v336_v15  ;;  %836 = vmatprep.mubr.msk.bf16.mxu0 %vm939_vm0, %v938_v0 }
  0x8d   : > { %846 = vmatprep.subr.bf16.mxu0 %v938_v0  ;;  %854 = vmatprep.mubr.msk.bf16.mxu1 %vm939_vm0, %v938_v0 }
  0x8e   : > { %v484_v17 = vpop.permute.xlu0 %483  ;;  %v535_v24 = vpop.permute.xlu1 %534 }
  0x8f   : > { %v489_v18 = vsel %vm238_vm1, %v484_v17, 0  ;;  %v540_v27 = vsel %vm238_vm1, %v535_v24, 0 }
  0x90   : > { %853 = vmatpush3.bf16.msra.mxu1 %v489_v18 }
  0x91   : > { %864 = vmatprep.subr.bf16.mxu1 %v938_v0 }
  0x92   : > { %v586_v22 = vpop.permute.xlu0 %585  ;;  %v637_v28 = vpop.permute.xlu1 %636 }
  0x93   : > { %837 = vmatmul.mubr.msk.bf16.vlgmr.msra.gmra.mrb[4].mxu0 %vm234_vm2, %v788_v19  ;;  %855 = vmatmul.mubr.msk.bf16.vlgmr.msra.gmra.mrb[8].mxu1 %vm234_vm2, %v794_v20  ;;  %v591_v23 = vsel %vm238_vm1, %v586_v22, 0  ;;  %v642_v30 = vsel %vm238_vm1, %v637_v28, 0 }
  0x94   : > { %847 = vmatpush3.bf16.msra.mxu0 %v438_v21  ;;  %848 = vmatprep.mubr.msk.bf16.mxu0 %vm939_vm0, %v938_v0 }
  0x95   : > { %858 = vmatprep.subr.bf16.mxu0 %v938_v0  ;;  %865 = vmatpush3.bf16.msra.mxu1 %v591_v23 }
  0x96   : > { %866 = vmatprep.mubr.msk.bf16.mxu1 %vm939_vm0, %v938_v0 }
  0x9b   : > { %849 = vmatmul.mubr.msk.bf16.vlgmr.msra.gmra.mrb[8].mxu0 %vm234_vm2, %v792_v25  ;;  %867 = vmatmul.mubr.msk.bf16.vlgmr.msra.gmra.mrb[12].mxu1 %vm234_vm2, %v798_v26 }
  0x9c   : > { %859 = vmatpush3.bf16.msra.mxu0 %v540_v27  ;;  %860 = vmatprep.mubr.msk.bf16.mxu0 %vm939_vm0, %v938_v0 }
  0x9d   : > { %870 = vmatprep.subr.bf16.mxu0 %v938_v0 }
  0xa3   : > { %861 = vmatmul.mubr.msk.bf16.vlgmr.msra.gmra.mrb[12].mxu0 %vm234_vm2, %v796_v29  ;;  %v689_v8 = vpop.permute.xlu0 %688  ;;  %v697_v12 = vpop.permute.xlu1 %696 }
  0xa4   : > { %871 = vmatpush3.bf16.msra.mxu0 %v642_v30  ;;  %872 = vmatprep.mubr.msk.bf16.mxu0 %vm939_vm0, %v938_v0 }
  0xab   : > { %873 = vmatmul.mubr.msk.bf16.vlgmr.msra.gmra.mrb[16].mxu0 %vm234_vm2, %v800_v31 }
  0xe9   : > { %v322_v32 = vpop.f32.mrb[0].mxu1 }
  0xea   : > { %v832_v33 = vpop.f32.mrb[1].mxu1 }
  0xeb   : > { %v325_v34 = vpop.f32.mrb[2].mxu1 }
  0xec   : > { %v833_v35 = vpop.f32.mrb[3].mxu1 }
 0x15e   : > { %v276_v36 = vpop.f32.mrb[0].mxu0  ;;  %v423_v37 = vpop.f32.mrb[4].mxu1 }
 0x15f   : > { %v826_v38 = vpop.f32.mrb[1].mxu0  ;;  %v323_v39 = vadd.f32 %v322_v32, %v276_v36  ;;  %v844_v40 = vpop.f32.mrb[5].mxu1 }
 0x160   : > { %v279_v41 = vpop.f32.mrb[2].mxu0  ;;  %v426_v42 = vpop.f32.mrb[6].mxu1 }
 0x161   : > { %v827_v43 = vpop.f32.mrb[3].mxu0  ;;  %v845_v44 = vpop.f32.mrb[7].mxu1 }
 0x166   : > { %v372_v45 = vpop.f32.mrb[4].mxu0  ;;  %v525_v46 = vpop.f32.mrb[8].mxu1 }
 0x167   : > { %v378_v47 = vadd.f32 %v372_v45, %v323_v39  ;;  %v838_v48 = vpop.f32.mrb[5].mxu0  ;;  %v856_v49 = vpop.f32.mrb[9].mxu1 }
 0x168   : > { %v375_v50 = vpop.f32.mrb[6].mxu0  ;;  %v528_v51 = vpop.f32.mrb[10].mxu1 }
 0x169   : > { %v429_v52 = vadd.f32 %v423_v37, %v378_v47  ;;  %v839_v53 = vpop.f32.mrb[7].mxu0  ;;  %v857_v54 = vpop.f32.mrb[11].mxu1 }
 0x16e   : > { %v474_v55 = vpop.f32.mrb[8].mxu0  ;;  %v627_v56 = vpop.f32.mrb[12].mxu1 }
 0x16f   : > { %v480_v57 = vadd.f32 %v474_v55, %v429_v52  ;;  %v850_v58 = vpop.f32.mrb[9].mxu0  ;;  %v868_v59 = vpop.f32.mrb[13].mxu1 }
 0x170   : > { %v477_v60 = vpop.f32.mrb[10].mxu0  ;;  %v630_v61 = vpop.f32.mrb[14].mxu1 }
 0x171   : > { %v531_v62 = vadd.f32 %v525_v46, %v480_v57  ;;  %v851_v63 = vpop.f32.mrb[11].mxu0  ;;  %v869_v0 = vpop.f32.mrb[15].mxu1 }
 0x176   : > { %v576_v1 = vpop.f32.mrb[12].mxu0 }
 0x177   : > { %v582_v2 = vadd.f32 %v576_v1, %v531_v62  ;;  %v862_v3 = vpop.f32.mrb[13].mxu0 }
 0x178   : > { %v579_v4 = vpop.f32.mrb[14].mxu0 }
 0x179   : > { %v633_v5 = vadd.f32 %v627_v56, %v582_v2  ;;  %v863_v6 = vpop.f32.mrb[15].mxu0 }
 0x17e   : > { %v678_v7 = vpop.f32.mrb[16].mxu0 }
 0x17f   : > { %v684_v9 = vadd.f32 %v678_v7, %v633_v5  ;;  %v874_v10 = vpop.f32.mrb[17].mxu0 }
 0x180   : > { %v681_v11 = vpop.f32.mrb[18].mxu0 }
 0x181   : > { %v691_v13 = vadd.f32 %v689_v8, %v684_v9  ;;  %v875_v14 = vpop.f32.mrb[19].mxu0 }
 0x183   : > { %vm692_vm3 = vcmp.ge.f32.partialorder %v691_v13, 0.0  ;;  %v699_v15 = vmul.f32 %v697_v12, %v691_v13 }
 0x185   : > { %v700_v16 = vsel %vm692_vm3, %v691_v13, %v699_v15 }
 0x186   : > { %702 = vst.msk [vmem:[%s223_s8] sm:$0xf] %vm701_vm4, %v700_v16 }
 0x187 PF: > { %s14_s17 = sadd.s32 1, %s936_s17   ;;  %s1097_s15 = smov %s932_s16 }
 0x188   : > { %p11_p5 = scmp.ge.s32.totalorder %s14_s17, 4   ;;  %s1098_s16 = smov %s1100_s18 }
 0x18a   :  { %13 = sbr.rel (!%p11_p5) target bundleno = 2 (0x2), region = 74 }

// kernel: cliquenet_forward.25
= control target key start
LH: loop header
LB: loop body
LE: loop exit
PB: predicated region body
PF: predicated region fallthrough
CT: control target
= control target key end

     0   :  { %s972_s15 = smov 0   ;;  %s974_s16 = smov 0   ;;  %s1078_s0 = inlined_call_operand.vmem [shape: bf16[2,1,16,128], index: 0, kind: input, shape index: {}]   ;;  %s1079_s1 = inlined_call_operand.vmem [shape: bf16[9,4,16], index: 1, kind: input, shape index: {}]   ;;  %s1080_s2 = inlined_call_operand.vmem [shape: f32[4,1], index: 2, kind: input, shape index: {}]   ;;  %s1081_s3 = inlined_call_operand.vmem [shape: f32[4,1], index: 3, kind: input, shape index: {}]   ;;  %s1082_s4 = inlined_call_operand.vmem [shape: f32[2,1,4,80], index: 4, kind: output, shape index: {}]  }
   0x1   :  { %s976_s17 = smov 0  }
   0x2 LB: > { %s26_s18 = sadd.s32 1, %s930_s16  ;;  %p777_p0 = scmp.ge.s32.totalorder %s934_s17, 1  ;;  %s934_s17 = sphi %s976_s17, %s14_s17   ;;  %s930_s16 = sphi %s974_s16, %s1084_s16   ;;  %s926_s15 = sphi %s972_s15, %s1083_s15  }
   0x3   : > { %p28_p1 = scmp.ge.s32.totalorder %s26_s18, 2  ;;  %p182_p2 = scmp.lt.s32.totalorder %s934_s17, 3 }
   0x5   : > { %s1086_s18 = smov (%p28_p1, %s26_s18), 0  ;;  %p183_p3 = pnand %p777_p0, %p182_p2 }
   0x6   : > { %p214_p4 = scmp.lt.s32.totalorder (!%p183_p3), %s926_s15, 1  ;;  %v936_v0 = vmov (!%p183_p3), 0.0   ;;  %vm937_vm0 = vmmov (!%p183_p3), 0   ;;  %s938_s23 = smov (!%p183_p3), 127   ;;  %vm244_vm1 = vcmask (!%p183_p3), 130048   ;;  %v946_v5 = vmov (!%p183_p3), 0  }
   0x7   : > { %186 = sbr.rel (%p183_p3) target bundleno = 388 (0x184), region = 36  ;;  %820 = vmatprep.subr.bf16.mxu0 (!%p183_p3), %v936_v0  ;;  %826 = vmatprep.subr.bf16.mxu1 (!%p183_p3), %v936_v0  ;;  %s939_s24 = smov (!%p183_p3), 118   ;;  %v233_v2 = vld [vmem:[%s1079_s1] sm:$0x3] (!%p183_p3)  ;;  %v781_v8 = vld [vmem:[%s1079_s1 + $0x2] sm:$0x3] (!%p183_p3) }
   0x8   : > { %822 = vmatprep.mubr.msk.bf16.mxu0 (!%p183_p3), %vm937_vm0, %v936_v0  ;;  %828 = vmatprep.mubr.msk.bf16.mxu1 (!%p183_p3), %vm937_vm0, %v936_v0  ;;  %s940_s27 = smov (!%p183_p3), 126   ;;  %s941_s28 = smov (!%p183_p3), 117   ;;  %v675_v3 = vld [vmem:[%s1080_s2] sm:$0xf] (!%p183_p3)  ;;  %v787_v9 = vld [vmem:[%s1079_s1 + $0x6] sm:$0x3] (!%p183_p3) }
   0x9   : > { %s942_s29 = smov (!%p183_p3), 116   ;;  %s943_s30 = smov (!%p183_p3), 108   ;;  %v683_v4 = vld [vmem:[%s1081_s3] sm:$0xf] (!%p183_p3)  ;;  %909 = vset.pattern.permute.xlu0 (!%p183_p3), %v946_v5  ;;  %910 = vset.pattern.permute.xlu1 (!%p183_p3), %v946_v5  ;;  %v785_v12 = vld [vmem:[%s1079_s1 + $0x4] sm:$0x3] (!%p183_p3) }
   0xa   : > { %s944_s5 = smov (!%p183_p3), 107   ;;  %s945_s6 = smov (!%p183_p3), 106   ;;  %v791_v13 = vld [vmem:[%s1079_s1 + $0xa] sm:$0x3] (!%p183_p3)  ;;  %v789_v16 = vld [vmem:[%s1079_s1 + $0x8] sm:$0x3] (!%p183_p3) }
   0xb   : > { %v795_v17 = vld [vmem:[%s1079_s1 + $0xe] sm:$0x3] (!%p183_p3)  ;;  %v793_v19 = vld [vmem:[%s1079_s1 + $0xc] sm:$0x3] (!%p183_p3)  ;;  %v797_v21 = vld [vmem:[%s1079_s1 + $0x10] sm:$0x3] (!%p183_p3) }
   0xc   : > { %vm691_vm3 = vcmask (!%p183_p3), 650240  }
   0xe   : > { %s1088_s15 = smov (!%p214_p4, %s926_s15), 1 }
   0xf   : > { %s801_s19 = sshll.u32 %s1088_s15, 3 }
  0x10   : > { %s222_s22 = scalar_lea.vmem %s1078_s0, %s801_s19 }
  0x11   : > { %v911_v1 = vld [vmem:[%s222_s22] sm:$0xff]  }
  0x12   : > { %241 = vrot.lane.b32.xlu0 %v911_v1, %s938_s23  ;;  %383 = vrot.lane.b32.xlu1 %v911_v1, %s939_s24 }
  0x13   : > { %827 = vmatpush3.bf16.msra.mxu1 %v911_v1 }
  0x14   : > { %838 = vmatprep.subr.bf16.mxu1 %v936_v0 }
  0x16   : > { %334 = vrot.lane.b32.xlu0 %v911_v1, %s940_s27  ;;  %432 = vrot.lane.b32.xlu1 %v911_v1, %s941_s28 }
  0x17   : > { %829 = vmatmul.mubr.msk.bf16.vlgmr.msra.gmra.mrb[0].mxu1 %vm244_vm1, %v233_v2 }
  0x18   : > { %840 = vmatprep.mubr.msk.bf16.mxu1 %vm937_vm0, %v936_v0 }
  0x1a   : > { %481 = vrot.lane.b32.xlu0 %v911_v1, %s942_s29  ;;  %530 = vrot.lane.b32.xlu1 %v911_v1, %s943_s30 }
  0x1e   : > { %579 = vrot.lane.b32.xlu0 %v911_v1, %s944_s5  ;;  %628 = vrot.lane.b32.xlu1 %v911_v1, %s945_s6  ;;  %s780_s5 = sshll.u32 %s1088_s15, 2 }
  0x1f   : > { %s229_s8 = scalar_lea.vmem %s1082_s4, %s780_s5 }
  0x22   : > { %678 = vperm.xlu0 %909, %v675_v3   ;;  %686 = vperm.xlu1 %910, %v683_v4  }
  0x84   : > { %v242_v6 = vpop.permute.xlu0 %241  ;;  %v384_v7 = vpop.permute.xlu1 %383 }
  0x85   : > { %821 = vmatpush3.bf16.msra.mxu0 %v242_v6  ;;  %839 = vmatpush3.bf16.msra.mxu1 %v384_v7 }
  0x86   : > { %832 = vmatprep.subr.bf16.mxu0 %v936_v0  ;;  %850 = vmatprep.subr.bf16.mxu1 %v936_v0 }
  0x88   : > { %823 = vmatmul.mubr.msk.bf16.vlgmr.msra.gmra.mrb[0].mxu0 %vm244_vm1, %v781_v8  ;;  %v335_v10 = vpop.permute.xlu0 %334  ;;  %841 = vmatmul.mubr.msk.bf16.vlgmr.msra.gmra.mrb[4].mxu1 %vm244_vm1, %v787_v9  ;;  %v433_v14 = vpop.permute.xlu1 %432 }
  0x89   : > { %833 = vmatpush3.bf16.msra.mxu0 %v335_v10  ;;  %834 = vmatprep.mubr.msk.bf16.mxu0 %vm937_vm0, %v936_v0 }
  0x8a   : > { %844 = vmatprep.subr.bf16.mxu0 %v936_v0  ;;  %852 = vmatprep.mubr.msk.bf16.mxu1 %vm937_vm0, %v936_v0 }
  0x8c   : > { %v482_v11 = vpop.permute.xlu0 %481  ;;  %v531_v18 = vpop.permute.xlu1 %530 }
  0x8d   : > { %851 = vmatpush3.bf16.msra.mxu1 %v482_v11 }
  0x8e   : > { %862 = vmatprep.subr.bf16.mxu1 %v936_v0 }
  0x90   : > { %835 = vmatmul.mubr.msk.bf16.vlgmr.msra.gmra.mrb[4].mxu0 %vm244_vm1, %v785_v12  ;;  %853 = vmatmul.mubr.msk.bf16.vlgmr.msra.gmra.mrb[8].mxu1 %vm244_vm1, %v791_v13  ;;  %v580_v15 = vpop.permute.xlu0 %579  ;;  %v629_v20 = vpop.permute.xlu1 %628 }
  0x91   : > { %845 = vmatpush3.bf16.msra.mxu0 %v433_v14  ;;  %846 = vmatprep.mubr.msk.bf16.mxu0 %vm937_vm0, %v936_v0 }
  0x92   : > { %856 = vmatprep.subr.bf16.mxu0 %v936_v0  ;;  %863 = vmatpush3.bf16.msra.mxu1 %v580_v15 }
  0x93   : > { %864 = vmatprep.mubr.msk.bf16.mxu1 %vm937_vm0, %v936_v0 }
  0x98   : > { %847 = vmatmul.mubr.msk.bf16.vlgmr.msra.gmra.mrb[8].mxu0 %vm244_vm1, %v789_v16  ;;  %865 = vmatmul.mubr.msk.bf16.vlgmr.msra.gmra.mrb[12].mxu1 %vm244_vm1, %v795_v17 }
  0x99   : > { %857 = vmatpush3.bf16.msra.mxu0 %v531_v18  ;;  %858 = vmatprep.mubr.msk.bf16.mxu0 %vm937_vm0, %v936_v0 }
  0x9a   : > { %868 = vmatprep.subr.bf16.mxu0 %v936_v0 }
  0xa0   : > { %859 = vmatmul.mubr.msk.bf16.vlgmr.msra.gmra.mrb[12].mxu0 %vm244_vm1, %v793_v19 }
  0xa1   : > { %869 = vmatpush3.bf16.msra.mxu0 %v629_v20  ;;  %870 = vmatprep.mubr.msk.bf16.mxu0 %vm937_vm0, %v936_v0  ;;  %v679_v62 = vpop.permute.xlu0 %678  ;;  %v687_v2 = vpop.permute.xlu1 %686 }
  0xa8   : > { %871 = vmatmul.mubr.msk.bf16.vlgmr.msra.gmra.mrb[16].mxu0 %vm244_vm1, %v797_v21 }
  0xea   : > { %v326_v22 = vpop.f32.mrb[0].mxu1 }
  0xeb   : > { %v830_v23 = vpop.f32.mrb[1].mxu1 }
  0xec   : > { %v329_v24 = vpop.f32.mrb[2].mxu1 }
  0xed   : > { %v831_v25 = vpop.f32.mrb[3].mxu1 }
 0x15b   : > { %v282_v26 = vpop.f32.mrb[0].mxu0  ;;  %v423_v27 = vpop.f32.mrb[4].mxu1 }
 0x15c   : > { %v824_v28 = vpop.f32.mrb[1].mxu0  ;;  %v327_v29 = vadd.f32 %v326_v22, %v282_v26  ;;  %v842_v30 = vpop.f32.mrb[5].mxu1 }
 0x15d   : > { %v285_v31 = vpop.f32.mrb[2].mxu0  ;;  %v426_v32 = vpop.f32.mrb[6].mxu1 }
 0x15e   : > { %v825_v33 = vpop.f32.mrb[3].mxu0  ;;  %v843_v34 = vpop.f32.mrb[7].mxu1 }
 0x163   : > { %v374_v35 = vpop.f32.mrb[4].mxu0  ;;  %v521_v36 = vpop.f32.mrb[8].mxu1 }
 0x164   : > { %v380_v37 = vadd.f32 %v374_v35, %v327_v29  ;;  %v836_v38 = vpop.f32.mrb[5].mxu0  ;;  %v854_v39 = vpop.f32.mrb[9].mxu1 }
 0x165   : > { %v377_v40 = vpop.f32.mrb[6].mxu0  ;;  %v524_v41 = vpop.f32.mrb[10].mxu1 }
 0x166   : > { %v429_v42 = vadd.f32 %v423_v27, %v380_v37  ;;  %v837_v43 = vpop.f32.mrb[7].mxu0  ;;  %v855_v44 = vpop.f32.mrb[11].mxu1 }
 0x16b   : > { %v472_v45 = vpop.f32.mrb[8].mxu0  ;;  %v619_v46 = vpop.f32.mrb[12].mxu1 }
 0x16c   : > { %v478_v47 = vadd.f32 %v472_v45, %v429_v42  ;;  %v848_v48 = vpop.f32.mrb[9].mxu0  ;;  %v866_v49 = vpop.f32.mrb[13].mxu1 }
 0x16d   : > { %v475_v50 = vpop.f32.mrb[10].mxu0  ;;  %v622_v51 = vpop.f32.mrb[14].mxu1 }
 0x16e   : > { %v527_v52 = vadd.f32 %v521_v36, %v478_v47  ;;  %v849_v53 = vpop.f32.mrb[11].mxu0  ;;  %v867_v54 = vpop.f32.mrb[15].mxu1 }
 0x173   : > { %v570_v55 = vpop.f32.mrb[12].mxu0 }
 0x174   : > { %v576_v56 = vadd.f32 %v570_v55, %v527_v52  ;;  %v860_v57 = vpop.f32.mrb[13].mxu0 }
 0x175   : > { %v573_v58 = vpop.f32.mrb[14].mxu0 }
 0x176   : > { %v625_v59 = vadd.f32 %v619_v46, %v576_v56  ;;  %v861_v60 = vpop.f32.mrb[15].mxu0 }
 0x17b   : > { %v668_v61 = vpop.f32.mrb[16].mxu0 }
 0x17c   : > { %v674_v63 = vadd.f32 %v668_v61, %v625_v59  ;;  %v872_v0 = vpop.f32.mrb[17].mxu0 }
 0x17d   : > { %v671_v1 = vpop.f32.mrb[18].mxu0 }
 0x17e   : > { %v681_v3 = vadd.f32 %v679_v62, %v674_v63  ;;  %v873_v4 = vpop.f32.mrb[19].mxu0 }
 0x180   : > { %vm682_vm2 = vcmp.ge.f32.partialorder %v681_v3, 0.0  ;;  %v689_v5 = vmul.f32 %v687_v2, %v681_v3 }
 0x182   : > { %v690_v6 = vsel %vm682_vm2, %v681_v3, %v689_v5 }
 0x183   : > { %692 = vst.msk [vmem:[%s229_s8] sm:$0xf] %vm691_vm3, %v690_v6 }
 0x184 PF: > { %s14_s17 = sadd.s32 1, %s934_s17   ;;  %s1083_s15 = smov %s930_s16 }
 0x185   : > { %p11_p5 = scmp.ge.s32.totalorder %s14_s17, 4   ;;  %s1084_s16 = smov %s1086_s18 }
 0x187   :  { %13 = sbr.rel (!%p11_p5) target bundleno = 2 (0x2), region = 74 }

// kernel: cliquenet_forward.38
= control target key start
LH: loop header
LB: loop body
LE: loop exit
PB: predicated region body
PF: predicated region fallthrough
CT: control target
= control target key end

     0   :  { %s496_s15 = smov 0   ;;  %s498_s16 = smov 0   ;;  %s538_s0 = inlined_call_operand.vmem [shape: bf16[2,1,32,128], index: 0, kind: input, shape index: {}]   ;;  %s539_s1 = inlined_call_operand.vmem [shape: bf16[1,4,32], index: 1, kind: input, shape index: {}]   ;;  %s540_s2 = inlined_call_operand.vmem [shape: f32[4,1], index: 2, kind: input, shape index: {}]   ;;  %s541_s3 = inlined_call_operand.vmem [shape: f32[4,1], index: 3, kind: input, shape index: {}]   ;;  %s542_s4 = inlined_call_operand.vmem [shape: f32[2,1,4,64], index: 4, kind: output, shape index: {}]  }
   0x1   :  { %s500_s17 = smov 0  }
   0x2 LB: > { %s26_s18 = sadd.s32 1, %s462_s16  ;;  %p393_p0 = scmp.ge.s32.totalorder %s466_s17, 1  ;;  %s466_s17 = sphi %s500_s17, %s14_s17   ;;  %s462_s16 = sphi %s498_s16, %s544_s16   ;;  %s458_s15 = sphi %s496_s15, %s543_s15  }
   0x3   : > { %p28_p1 = scmp.ge.s32.totalorder %s26_s18, 2  ;;  %p182_p2 = scmp.lt.s32.totalorder %s466_s17, 3 }
   0x5   : > { %s546_s18 = smov (%p28_p1, %s26_s18), 0  ;;  %p183_p3 = pnand %p393_p0, %p182_p2 }
   0x6   : > { %p214_p4 = scmp.lt.s32.totalorder (!%p183_p3), %s458_s15, 1  ;;  %v468_v0 = vmov (!%p183_p3), 0.0   ;;  %vm469_vm0 = vmmov (!%p183_p3), 0   ;;  %v236_v1 = vld [vmem:[%s540_s2] sm:$0xf] (!%p183_p3)  ;;  %v470_v2 = vmov (!%p183_p3), 0  }
   0x7   : > { %186 = sbr.rel (%p183_p3) target bundleno = 243 (0xf3), region = 36  ;;  %406 = vmatprep.subr.bf16.mxu0 (!%p183_p3), %v468_v0  ;;  %410 = vmatprep.mubr.msk.bf16.mxu0 (!%p183_p3), %vm469_vm0, %v468_v0  ;;  %v299_v3 = vld [vmem:[%s541_s3] sm:$0xf] (!%p183_p3)  ;;  %vm254_vm1 = vcmask (!%p183_p3), 261120   ;;  %vm307_vm3 = vcmask (!%p183_p3), 519168  }
   0x8   : > { %441 = vset.pattern.permute.xlu0 (!%p183_p3), %v470_v2  ;;  %v235_v6 = vld [vmem:[%s539_s1] sm:$0x3] (!%p183_p3) }
   0x9   : > { %239 = vperm.xlu0 (!%p183_p3), %441, %v236_v1  }
   0xd   : > { %302 = vperm.xlu0 (!%p183_p3), %441, %v299_v3  }
   0xe   : > { %s548_s15 = smov (!%p214_p4, %s458_s15), 1 }
   0xf   : > { %s402_s21 = sshll.u32 %s548_s15, 4  ;;  %s396_s29 = sshll.u32 %s548_s15, 2 }
  0x10   : > { %s222_s26 = scalar_lea.vmem %s538_s0, %s402_s21  ;;  %s229_s6 = scalar_lea.vmem %s542_s4, %s396_s29 }
  0x11   : > { %v442_v4 = vld [vmem:[%s222_s26] sm:$0xff]   ;;  %v443_v5 = vld [vmem:[%s222_s26 + $0x8] sm:$0xff]  }
  0x12   : > { %407 = vmatpush3.bf16.msra.mxu0 %v442_v4 }
  0x13   : > { %408 = vmatprep.subr.bf16.mxu0 %v468_v0 }
  0x16   : > { %409 = vmatpush3.bf16.msra.mxu0 %v443_v5 }
  0x19   : > { %411 = vmatmul.mubr.msk.bf16.vlgmr.msra.gmra.mrb[0].mxu0 %vm254_vm1, %v235_v6 }
  0x88   : > { %v240_v7 = vpop.permute.xlu0 %239 }
  0x8c   : > { %v303_v11 = vpop.permute.xlu0 %302 }
  0xec   : > { %v292_v8 = vpop.f32.mrb[0].mxu0 }
  0xed   : > { %v293_v9 = vadd.f32 %v292_v8, %v240_v7  ;;  %v412_v10 = vpop.f32.mrb[1].mxu0 }
  0xee   : > { %v295_v12 = vpop.f32.mrb[2].mxu0 }
  0xef   : > { %vm298_vm2 = vcmp.ge.f32.partialorder %v293_v9, 0.0  ;;  %v305_v13 = vmul.f32 %v303_v11, %v293_v9  ;;  %v413_v14 = vpop.f32.mrb[3].mxu0 }
  0xf1   : > { %v306_v15 = vsel %vm298_vm2, %v293_v9, %v305_v13 }
  0xf2   : > { %308 = vst.msk [vmem:[%s229_s6] sm:$0xf] %vm307_vm3, %v306_v15 }
  0xf3 PF: > { %s14_s17 = sadd.s32 1, %s466_s17   ;;  %s543_s15 = smov %s462_s16 }
  0xf4   : > { %p11_p5 = scmp.ge.s32.totalorder %s14_s17, 4   ;;  %s544_s16 = smov %s546_s18 }
  0xf6   :  { %13 = sbr.rel (!%p11_p5) target bundleno = 2 (0x2), region = 66 }

// kernel: cliquenet_forward.39
= control target key start
LH: loop header
LB: loop body
LE: loop exit
PB: predicated region body
PF: predicated region fallthrough
CT: control target
= control target key end

     0   :  { %s1131_s12 = smov 0   ;;  %s1133_s13 = smov 0   ;;  %s1246_s0 = inlined_call_operand.vmem [shape: bf16[2,1,4,128], index: 0, kind: input, shape index: {}]   ;;  %s1247_s1 = inlined_call_operand.vmem [shape: bf16[9,12,4], index: 1, kind: input, shape index: {}]   ;;  %s1248_s2 = inlined_call_operand.vmem [shape: f32[12,1], index: 2, kind: input, shape index: {}]   ;;  %s1249_s3 = inlined_call_operand.vmem [shape: f32[2,1,12,80], index: 3, kind: output, shape index: {}]  }
   0x1   :  { %s1135_s14 = smov 0  }
   0x2 LB: > { %s25_s15 = sadd.s32 1, %s1093_s13  ;;  %p908_p0 = scmp.ge.s32.totalorder %s1097_s14, 1  ;;  %s1097_s14 = sphi %s1135_s14, %s13_s14   ;;  %s1093_s13 = sphi %s1133_s13, %s1251_s13   ;;  %s1089_s12 = sphi %s1131_s12, %s1250_s12  }
   0x3   : > { %p27_p1 = scmp.ge.s32.totalorder %s25_s15, 2  ;;  %p155_p2 = scmp.lt.s32.totalorder %s1097_s14, 3 }
   0x5   : > { %s1253_s15 = smov (%p27_p1, %s25_s15), 0  ;;  %p156_p3 = pnand %p908_p0, %p155_p2 }
   0x6   : > { %p185_p4 = scmp.lt.s32.totalorder (!%p156_p3), %s1089_s12, 1  ;;  %v217_v0 = vlaneseq (!%p156_p3)  ;;  %v1099_v1 = vmov (!%p156_p3), 1983009808   ;;  %v1100_v3 = vmov (!%p156_p3), 0.0   ;;  %vm1101_vm0 = vmmov (!%p156_p3), 0   ;;  %s1102_s22 = smov (!%p156_p3), 118  }
   0x7   : > { %159 = sbr.rel (%p156_p3) target bundleno = 390 (0x186), region = 32  ;;  %v215_v2 = vunpack.c.l.s4 (!%p156_p3), %v1099_v1  ;;  %974 = vmatprep.subr.bf16.mxu0 (!%p156_p3), %v1100_v3  ;;  %980 = vmatprep.subr.bf16.mxu1 (!%p156_p3), %v1100_v3  ;;  %vm227_vm1 = vcmask (!%p156_p3), 1041408   ;;  %v1067_v7 = vld [vmem:[%s1247_s1] sm:$0x3f] (!%p156_p3)   ;;  %vm223_vm2 = vcmask (!%p156_p3), 31744   ;;  %s1103_s23 = smov (!%p156_p3), 127  }
   0x8   : > { %v218_v4 = vshrl.u32 (!%p156_p3), %v217_v0, 7  ;;  %976 = vmatprep.mubr.msk.bf16.mxu0 (!%p156_p3), %vm1101_vm0, %v1100_v3  ;;  %982 = vmatprep.mubr.msk.bf16.mxu1 (!%p156_p3), %vm1101_vm0, %v1100_v3  ;;  %s1104_s24 = smov (!%p156_p3), 117   ;;  %s1105_s25 = smov (!%p156_p3), 126   ;;  %v800_v12 = vld [vmem:[%s1248_s2] sm:$0xff] (!%p156_p3)  ;;  %v801_v13 = vld [vmem:[%s1248_s2 + $0x8] sm:$0xf] (!%p156_p3) }
   0x9   : > { %v216_v5 = vunpack.c.0.s8 (!%p156_p3), %v215_v2  ;;  %s1106_s26 = smov (!%p156_p3), 108   ;;  %s1107_s27 = smov (!%p156_p3), 116   ;;  %v1110_v14 = vmov (!%p156_p3), 0   ;;  %v1069_v17 = vld [vmem:[%s1247_s1 + $0x18] sm:$0x3f] (!%p156_p3)   ;;  %vm814_vm3 = vcmask (!%p156_p3), 654336  }
   0xa   : > { %s1108_s28 = smov (!%p156_p3), 106   ;;  %s1109_s29 = smov (!%p156_p3), 107   ;;  %1064 = vset.pattern.permute.xlu0 (!%p156_p3), %v1110_v14  ;;  %1065 = vset.pattern.permute.xlu1 (!%p156_p3), %v1110_v14  ;;  %v1066_v20 = vld [vmem:[%s1247_s1 + $0x8] sm:$0x3f] (!%p156_p3)   ;;  %v1068_v25 = vld [vmem:[%s1247_s1 + $0x10] sm:$0x3f] (!%p156_p3)  }
   0xb   : > { %v219_v6 = vsub.s32 (!%p156_p3), %v216_v5, %v218_v4  ;;  %v1071_v27 = vld [vmem:[%s1247_s1 + $0x28] sm:$0x3f] (!%p156_p3)   ;;  %v1070_v32 = vld [vmem:[%s1247_s1 + $0x20] sm:$0x3f] (!%p156_p3)   ;;  %v1073_v33 = vld [vmem:[%s1247_s1 + $0x38] sm:$0x3f] (!%p156_p3)  }
   0xc   : > { %v1072_v36 = vld [vmem:[%s1247_s1 + $0x30] sm:$0x3f] (!%p156_p3)   ;;  %v1074_v38 = vld [vmem:[%s1247_s1 + $0x40] sm:$0x3f] (!%p156_p3)   ;;  %vm816_vm4 = vcmask (!%p156_p3), 650240  }
   0xe   : > { %s1255_s12 = smov (!%p185_p4, %s1089_s12), 1 }
   0xf   : > { %s909_s16 = sshll.u32 %s1255_s12, 1 }
  0x10   : > { %s191_s19 = scalar_lea.vmem %s1246_s0, %s909_s16 }
  0x11   : > { %v202_v8 = vld [vmem:[%s191_s19] sm:$0x3] }
  0x12   : > { %v921_v9 = vld.sshfl [vmem:[%s191_s19] sm:$0x3 pattern:$0x76325410]  ;;  %v220_v10 = vrot.slane %v202_v8, %v219_v6  ;;  %v281_v11 = vsel %vm227_vm1, %v202_v8, 0 }
  0x13   : > { %409 = vrot.lane.b32.xlu1 %v921_v9, %s1102_s22  ;;  %981 = vmatpush3.bf16.msra.mxu1 %v281_v11 }
  0x14   : > { %221 = vrot.lane.b32.xlu0 %v220_v10, %s1103_s23  ;;  %992 = vmatprep.subr.bf16.mxu1 %v1100_v3 }
  0x16   : > { %983 = vmatmul.mubr.msk.bf16.vlgmr.msra.gmra.mrb[0].mxu1 %vm223_vm2, %v1067_v7 }
  0x17   : > { %477 = vrot.lane.b32.xlu1 %v921_v9, %s1104_s24  ;;  %994 = vmatprep.mubr.msk.bf16.mxu1 %vm1101_vm0, %v1100_v3 }
  0x18   : > { %341 = vrot.lane.b32.xlu0 %v921_v9, %s1105_s25 }
  0x1b   : > { %613 = vrot.lane.b32.xlu1 %v921_v9, %s1106_s26 }
  0x1c   : > { %545 = vrot.lane.b32.xlu0 %v921_v9, %s1107_s27  ;;  %s955_s27 = sshll.u32 %s1255_s12, 4 }
  0x1d   : > { %s200_s30 = scalar_lea.vmem %s1249_s3, %s955_s27 }
  0x1f   : > { %749 = vrot.lane.b32.xlu1 %v921_v9, %s1108_s28 }
  0x20   : > { %681 = vrot.lane.b32.xlu0 %v921_v9, %s1109_s29 }
  0x23   : > { %809 = vperm.xlu1 %1065, %v801_v13  }
  0x24   : > { %804 = vperm.xlu0 %1064, %v800_v12  }
  0x85   : > { %v410_v15 = vpop.permute.xlu1 %409 }
  0x86   : > { %v415_v16 = vsel %vm227_vm1, %v410_v15, 0  ;;  %v222_v18 = vpop.permute.xlu0 %221 }
  0x87   : > { %993 = vmatpush3.bf16.msra.mxu1 %v415_v16  ;;  %v229_v19 = vsel %vm227_vm1, %v222_v18, 0 }
  0x88   : > { %1004 = vmatprep.subr.bf16.mxu1 %v1100_v3  ;;  %975 = vmatpush3.bf16.msra.mxu0 %v229_v19 }
  0x89   : > { %986 = vmatprep.subr.bf16.mxu0 %v1100_v3  ;;  %v478_v23 = vpop.permute.xlu1 %477 }
  0x8a   : > { %995 = vmatmul.mubr.msk.bf16.vlgmr.msra.gmra.mrb[4].mxu1 %vm223_vm2, %v1069_v17  ;;  %v342_v21 = vpop.permute.xlu0 %341  ;;  %v483_v28 = vsel %vm227_vm1, %v478_v23, 0 }
  0x8b   : > { %1006 = vmatprep.mubr.msk.bf16.mxu1 %vm1101_vm0, %v1100_v3  ;;  %v347_v22 = vsel %vm227_vm1, %v342_v21, 0  ;;  %977 = vmatmul.mubr.msk.bf16.vlgmr.msra.gmra.mrb[0].mxu0 %vm223_vm2, %v1066_v20 }
  0x8c   : > { %987 = vmatpush3.bf16.msra.mxu0 %v347_v22  ;;  %988 = vmatprep.mubr.msk.bf16.mxu0 %vm1101_vm0, %v1100_v3 }
  0x8d   : > { %998 = vmatprep.subr.bf16.mxu0 %v1100_v3  ;;  %v614_v31 = vpop.permute.xlu1 %613 }
  0x8e   : > { %v546_v24 = vpop.permute.xlu0 %545  ;;  %v619_v34 = vsel %vm227_vm1, %v614_v31, 0 }
  0x8f   : > { %v551_v26 = vsel %vm227_vm1, %v546_v24, 0 }
  0x90   : > { %1005 = vmatpush3.bf16.msra.mxu1 %v551_v26 }
  0x91   : > { %1016 = vmatprep.subr.bf16.mxu1 %v1100_v3  ;;  %v750_v35 = vpop.permute.xlu1 %749 }
  0x92   : > { %v682_v29 = vpop.permute.xlu0 %681  ;;  %v755_v37 = vsel %vm227_vm1, %v750_v35, 0 }
  0x93   : > { %989 = vmatmul.mubr.msk.bf16.vlgmr.msra.gmra.mrb[4].mxu0 %vm223_vm2, %v1068_v25  ;;  %1007 = vmatmul.mubr.msk.bf16.vlgmr.msra.gmra.mrb[8].mxu1 %vm223_vm2, %v1071_v27  ;;  %v687_v30 = vsel %vm227_vm1, %v682_v29, 0 }
  0x94   : > { %999 = vmatpush3.bf16.msra.mxu0 %v483_v28  ;;  %1000 = vmatprep.mubr.msk.bf16.mxu0 %vm1101_vm0, %v1100_v3 }
  0x95   : > { %1010 = vmatprep.subr.bf16.mxu0 %v1100_v3  ;;  %1017 = vmatpush3.bf16.msra.mxu1 %v687_v30 }
  0x96   : > { %1018 = vmatprep.mubr.msk.bf16.mxu1 %vm1101_vm0, %v1100_v3 }
  0x9b   : > { %1001 = vmatmul.mubr.msk.bf16.vlgmr.msra.gmra.mrb[8].mxu0 %vm223_vm2, %v1070_v32  ;;  %1019 = vmatmul.mubr.msk.bf16.vlgmr.msra.gmra.mrb[12].mxu1 %vm223_vm2, %v1073_v33 }
  0x9c   : > { %1011 = vmatpush3.bf16.msra.mxu0 %v619_v34  ;;  %1012 = vmatprep.mubr.msk.bf16.mxu0 %vm1101_vm0, %v1100_v3 }
  0x9d   : > { %1022 = vmatprep.subr.bf16.mxu0 %v1100_v3 }
  0xa2   : > { %v810_v26 = vpop.permute.xlu1 %809 }
  0xa3   : > { %1013 = vmatmul.mubr.msk.bf16.vlgmr.msra.gmra.mrb[12].mxu0 %vm223_vm2, %v1072_v36  ;;  %v805_v22 = vpop.permute.xlu0 %804 }
  0xa4   : > { %1023 = vmatpush3.bf16.msra.mxu0 %v755_v37  ;;  %1024 = vmatprep.mubr.msk.bf16.mxu0 %vm1101_vm0, %v1100_v3 }
  0xab   : > { %1025 = vmatmul.mubr.msk.bf16.vlgmr.msra.gmra.mrb[16].mxu0 %vm223_vm2, %v1074_v38 }
  0xe9   : > { %v317_v39 = vpop.f32.mrb[0].mxu1 }
  0xea   : > { %v984_v40 = vpop.f32.mrb[1].mxu1 }
  0xeb   : > { %v320_v41 = vpop.f32.mrb[2].mxu1 }
  0xec   : > { %v985_v42 = vpop.f32.mrb[3].mxu1 }
 0x15d   : > { %v451_v43 = vpop.f32.mrb[4].mxu1 }
 0x15e   : > { %v996_v44 = vpop.f32.mrb[5].mxu1  ;;  %v265_v45 = vpop.f32.mrb[0].mxu0 }
 0x15f   : > { %v454_v46 = vpop.f32.mrb[6].mxu1  ;;  %v318_v47 = vadd.f32 %v317_v39, %v265_v45  ;;  %v978_v48 = vpop.f32.mrb[1].mxu0 }
 0x160   : > { %v997_v49 = vpop.f32.mrb[7].mxu1  ;;  %v268_v50 = vpop.f32.mrb[2].mxu0 }
 0x161   : > { %v321_v51 = vadd.f32 %v320_v41, %v268_v50  ;;  %v979_v52 = vpop.f32.mrb[3].mxu0 }
 0x166   : > { %v383_v53 = vpop.f32.mrb[4].mxu0  ;;  %v587_v54 = vpop.f32.mrb[8].mxu1 }
 0x167   : > { %v390_v55 = vadd.f32 %v383_v53, %v318_v47  ;;  %v990_v56 = vpop.f32.mrb[5].mxu0  ;;  %v1008_v57 = vpop.f32.mrb[9].mxu1 }
 0x168   : > { %v386_v58 = vpop.f32.mrb[6].mxu0  ;;  %v590_v59 = vpop.f32.mrb[10].mxu1 }
 0x169   : > { %v391_v60 = vadd.f32 %v386_v58, %v321_v51  ;;  %v458_v61 = vadd.f32 %v451_v43, %v390_v55  ;;  %v991_v62 = vpop.f32.mrb[7].mxu0  ;;  %v1009_v63 = vpop.f32.mrb[11].mxu1 }
 0x16b   : > { %v459_v0 = vadd.f32 %v454_v46, %v391_v60 }
 0x16e   : > { %v519_v1 = vpop.f32.mrb[8].mxu0  ;;  %v723_v2 = vpop.f32.mrb[12].mxu1 }
 0x16f   : > { %v526_v3 = vadd.f32 %v519_v1, %v458_v61  ;;  %v1002_v4 = vpop.f32.mrb[9].mxu0  ;;  %v1020_v5 = vpop.f32.mrb[13].mxu1 }
 0x170   : > { %v522_v6 = vpop.f32.mrb[10].mxu0  ;;  %v726_v7 = vpop.f32.mrb[14].mxu1 }
 0x171   : > { %v527_v8 = vadd.f32 %v522_v6, %v459_v0  ;;  %v594_v9 = vadd.f32 %v587_v54, %v526_v3  ;;  %v1003_v10 = vpop.f32.mrb[11].mxu0  ;;  %v1021_v11 = vpop.f32.mrb[15].mxu1 }
 0x173   : > { %v595_v12 = vadd.f32 %v590_v59, %v527_v8 }
 0x176   : > { %v655_v13 = vpop.f32.mrb[12].mxu0 }
 0x177   : > { %v662_v14 = vadd.f32 %v655_v13, %v594_v9  ;;  %v1014_v15 = vpop.f32.mrb[13].mxu0 }
 0x178   : > { %v658_v16 = vpop.f32.mrb[14].mxu0 }
 0x179   : > { %v663_v17 = vadd.f32 %v658_v16, %v595_v12  ;;  %v730_v18 = vadd.f32 %v723_v2, %v662_v14  ;;  %v1015_v19 = vpop.f32.mrb[15].mxu0 }
 0x17b   : > { %v731_v20 = vadd.f32 %v726_v7, %v663_v17 }
 0x17e   : > { %v791_v21 = vpop.f32.mrb[16].mxu0 }
 0x17f   : > { %v798_v23 = vadd.f32 %v791_v21, %v730_v18  ;;  %v1026_v24 = vpop.f32.mrb[17].mxu0 }
 0x180   : > { %v794_v25 = vpop.f32.mrb[18].mxu0 }
 0x181   : > { %v799_v27 = vadd.f32 %v794_v25, %v731_v20  ;;  %v812_v28 = vadd.f32 %v805_v22, %v798_v23  ;;  %v1027_v29 = vpop.f32.mrb[19].mxu0 }
 0x183   : > { %815 = vst.msk [vmem:[%s200_s30] sm:$0xff] %vm814_vm3, %v812_v28  ;;  %v813_v30 = vadd.f32 %v810_v26, %v799_v27 }
 0x185   : > { %817 = vst.msk [vmem:[%s200_s30 + $0x8] sm:$0xf] %vm816_vm4, %v813_v30 }
 0x186 PF: > { %s13_s14 = sadd.s32 1, %s1097_s14   ;;  %s1250_s12 = smov %s1093_s13 }
 0x187   : > { %p10_p5 = scmp.ge.s32.totalorder %s13_s14, 4   ;;  %s1251_s13 = smov %s1253_s15 }
 0x189   :  { %12 = sbr.rel (!%p10_p5) target bundleno = 2 (0x2), region = 70 }

</bundles_post_ra>
